<compile_context>
chip_gen: v7x
topology: tpu7x:2x2x1
jax: 0.10.0
libtpu: 0.0.40
codegen_flags: <defaults>
</compile_context>

<pallas_src>
import functools

import jax
import jax.numpy as jnp
from jax import lax
from jax.experimental import pallas as pl
from jax.experimental.pallas import tpu as pltpu

_EPS = 1e-5   # PyTorch InstanceNorm2d default eps
_LANE = 128   # TPU lane width; channel dim padded to a multiple of this


def _round_up(x, m):
    return (x + m - 1) // m * m


def _fill_reflect_pad(pad_ref, x, H, W):
    """Write reflection-pad-1 of x (H, W, C) into pad_ref (H+2, W+2, C)."""
    pad_ref[1:H + 1, 1:W + 1, :] = x
    pad_ref[0:1, 1:W + 1, :] = x[1:2, :, :]
    pad_ref[H + 1:H + 2, 1:W + 1, :] = x[H - 2:H - 1, :, :]
    # Left/right columns (corners included) mirror the already row-padded cols.
    pad_ref[:, 0:1, :] = pad_ref[:, 2:3, :]
    pad_ref[:, W + 1:W + 2, :] = pad_ref[:, W - 1:W, :]


def _conv3x3_instnorm(pad_ref, w_ref, b, H, W, C):
    """3x3 VALID conv + bias + InstanceNorm (biased var). Returns f32 (H*W, C).

    Tap-grouped accumulation (no (H*W, 9C) im2col):
      * one sublane-offset (kw) slice of the padded image per kw (3 relayout
        copies per stage instead of 9),
      * kh shifts are cheap leading-dim slices of that copy,
      * per kw: (H*W, 3C) @ (3C, C) matmul, K = 3C keeps the v6e/v7x MXU full.
    w_ref: (3, 3C, C); rows of w_ref[kw] ordered (kh, cin).
    """
    acc = None
    for kw in range(3):
        cols = pad_ref[:, kw:kw + W, :]                 # (H+2, W, C), one shift per kw
        patches = jnp.concatenate(
            [cols[kh:kh + H].reshape(H * W, C) for kh in range(3)], axis=1)
        prod = jnp.dot(patches, w_ref[kw], preferred_element_type=jnp.float32)
        acc = prod if acc is None else acc + prod
    acc = acc + b                                       # kept for parity with Conv2d bias
    mean = jnp.mean(acc, axis=0, keepdims=True)
    centered = acc - mean
    var = jnp.mean(centered * centered, axis=0, keepdims=True)   # biased variance
    return centered * lax.rsqrt(var + _EPS)


def _resblock_kernel(H, W, C, x_ref, w1_ref, b1_ref, w2_ref, b2_ref, o_ref,
                     pad_ref):
    # stage 1: reflect-pad -> conv -> IN -> ReLU  (y1 never leaves VMEM)
    _fill_reflect_pad(pad_ref, x_ref[0], H, W)          # x not held live past here
    y1 = _conv3x3_instnorm(pad_ref, w1_ref, b1_ref[...], H, W, C)
    y1 = jnp.maximum(y1, 0.0).astype(pad_ref.dtype).reshape(H, W, C)
    # stage 2: reflect-pad -> conv -> IN  (reuses the same pad scratch)
    _fill_reflect_pad(pad_ref, y1, H, W)
    y2 = _conv3x3_instnorm(pad_ref, w2_ref, b2_ref[...], H, W, C)
    # residual add: re-read the VMEM-resident input block (short live range)
    o_ref[0] = (x_ref[0].astype(jnp.float32)
                + y2.reshape(H, W, C)).astype(o_ref.dtype)


def _vmem_limit_bytes(H, W, C, comp_isize, out_isize):
    """Tight working-set estimate, capped by the chip's physical VMEM."""
    try:
        physical = int(pltpu.get_tpu_info().vmem_capacity_bytes)
    except Exception:
        physical = 64 * 1024 * 1024       # conservative (v7x per-core VMEM)
    img = H * W * C
    est = (2 * img * comp_isize                               # input block (x2 pipeline)
           + 2 * img * out_isize                              # output block (x2 pipeline)
           + 2 * 2 * 9 * C * C * comp_isize + 4 * C * 4       # weights + biases
           + (H + 2) * _round_up(W + 2, 8) * C * comp_isize   # pad scratch (+sublane pad)
           + (H + 2) * W * C * comp_isize                     # per-kw shifted copy
           + 3 * img * comp_isize                             # (H*W, 3C) matmul operand
           + 2 * img * 4                                      # f32 acc + matmul result
           + img * comp_isize)                                # y1
    est = int(est * 1.3)                                      # ~30% headroom
    cap = int(physical * 0.85)                                # leave room for Mosaic scratch
    return max(min(est, cap), min(32 * 1024 * 1024, cap))


@functools.partial(jax.jit, static_argnames=("use_bf16",))
def residual_block_nhwc(x, w1, b1, w2, b2, use_bf16=False):
    """x: (N,H,W,C); w*: (3,3,Cin,Cout) HWIO; b*: (C,) or (1,C).

    use_bf16=True (recommended default on v6e/v7x) computes and outputs bf16
    while keeping f32 matmul accumulation and f32 InstanceNorm statistics.
    """
    N, H, W, C = x.shape
    assert H >= 2 and W >= 2, "ReflectionPad2d(1) requires H >= 2 and W >= 2"

    Cp = _round_up(C, _LANE)
    pc = Cp - C
    if pc:
        # Pad channels to a lane-dense multiple of 128 (zero channels stay
        # exactly zero through conv/IN/ReLU/residual, then get sliced off).
        x = jnp.pad(x, ((0, 0), (0, 0), (0, 0), (0, pc)))
        w1 = jnp.pad(w1, ((0, 0), (0, 0), (0, pc), (0, pc)))
        w2 = jnp.pad(w2, ((0, 0), (0, 0), (0, pc), (0, pc)))
        b1 = jnp.pad(b1.reshape(-1), ((0, pc),))
        b2 = jnp.pad(b2.reshape(-1), ((0, pc),))

    # (3,3,Cin,Cout) -> (kw, kh*Cin, Cout): per-kw weight slabs with K = 3*Cin,
    # row order (kh, cin) matching the in-kernel lane concat.
    wg1 = jnp.transpose(w1, (1, 0, 2, 3)).reshape(3, 3 * Cp, Cp)
    wg2 = jnp.transpose(w2, (1, 0, 2, 3)).reshape(3, 3 * Cp, Cp)
    b1 = b1.reshape(1, Cp).astype(jnp.float32)
    b2 = b2.reshape(1, Cp).astype(jnp.float32)

    comp_dtype = jnp.bfloat16 if use_bf16 else jnp.float32
    out_dtype = comp_dtype                      # bf16 path writes bf16 back to HBM
    x_in = x.astype(comp_dtype)
    wg1 = wg1.astype(comp_dtype)
    wg2 = wg2.astype(comp_dtype)
    comp_isize = jnp.dtype(comp_dtype).itemsize
    out_isize = jnp.dtype(out_dtype).itemsize

    out = pl.pallas_call(
        functools.partial(_resblock_kernel, H, W, Cp),
        out_shape=jax.ShapeDtypeStruct((N, H, W, Cp), out_dtype),
        grid_spec=pltpu.PrefetchScalarGridSpec(
            num_scalar_prefetch=0,
            grid=(N,),
            in_specs=[
                pl.BlockSpec((1, H, W, Cp), lambda n: (n, 0, 0, 0)),
                pl.BlockSpec((3, 3 * Cp, Cp), lambda n: (0, 0, 0)),
                pl.BlockSpec((1, Cp), lambda n: (0, 0)),
                pl.BlockSpec((3, 3 * Cp, Cp), lambda n: (0, 0, 0)),
                pl.BlockSpec((1, Cp), lambda n: (0, 0)),
            ],
            out_specs=pl.BlockSpec((1, H, W, Cp), lambda n: (n, 0, 0, 0)),
            scratch_shapes=[pltpu.VMEM((H + 2, W + 2, Cp), comp_dtype)],
        ),
        compiler_params=pltpu.CompilerParams(
            dimension_semantics=("parallel",),
            vmem_limit_bytes=_vmem_limit_bytes(H, W, Cp, comp_isize, out_isize),
        ),
    )(x_in, wg1, b1, wg2, b2)

    return out[..., :C] if pc else out


def residual_block_nchw(x_nchw, w1_oihw, b1, w2_oihw, b2, use_bf16=False):
    """PyTorch-convention entry: x NCHW, weights (Cout, Cin, kh, kw)."""
    x = jnp.transpose(x_nchw, (0, 2, 3, 1))                 # -> NHWC
    w1 = jnp.transpose(w1_oihw, (2, 3, 1, 0))               # -> (kh,kw,Cin,Cout)
    w2 = jnp.transpose(w2_oihw, (2, 3, 1, 0))
    out = residual_block_nhwc(x, w1, b1, w2, b2, use_bf16=use_bf16)
    return jnp.transpose(out, (0, 3, 1, 2))                  # -> NCHW


# ----------------------------- pure-JAX reference ---------------------------
def _ref_residual_block_nhwc(x, w1, b1, w2, b2):
    def conv_in(inp, w, b):
        p = jnp.pad(inp, ((0, 0), (1, 1), (1, 1), (0, 0)), mode="reflect")
        y = lax.conv_general_dilated(
            p, w, window_strides=(1, 1), padding="VALID",
            dimension_numbers=("NHWC", "HWIO", "NHWC"))
        y = y + b.reshape(1, 1, 1, -1)
        mean = jnp.mean(y, axis=(1, 2), keepdims=True)
        var = jnp.mean((y - mean) ** 2, axis=(1, 2), keepdims=True)
        return (y - mean) * lax.rsqrt(var + _EPS)

    h = jnp.maximum(conv_in(x, w1, b1), 0.0)
    return x + conv_in(h, w2, b2)


if __name__ == "__main__":
    N, C, H, W = 2, 4, 16, 16
    key = jax.random.PRNGKey(0)
    kx, kw1, kb1, kw2, kb2 = jax.random.split(key, 5)

    # deterministic synthetic parameters (Conv2d(C, C, 3) shapes)
    x_nchw = jax.random.normal(kx, (N, C, H, W), jnp.float32)
    w1_oihw = 0.1 * jax.random.normal(kw1, (C, C, 3, 3), jnp.float32)
    b1 = 0.1 * jax.random.normal(kb1, (C,), jnp.float32)
    w2_oihw = 0.1 * jax.random.normal(kw2, (C, C, 3, 3), jnp.float32)
    b2 = 0.1 * jax.random.normal(kb2, (C,), jnp.float32)

    # f32 path: checked tightly against the pure-JAX reference.
    out = residual_block_nchw(x_nchw, w1_oihw, b1, w2_oihw, b2)
    out = jax.block_until_ready(out)

    x_nhwc = jnp.transpose(x_nchw, (0, 2, 3, 1))
    w1_hwio = jnp.transpose(w1_oihw, (2, 3, 1, 0))
    w2_hwio = jnp.transpose(w2_oihw, (2, 3, 1, 0))
    ref = _ref_residual_block_nhwc(x_nhwc, w1_hwio, b1, w2_hwio, b2)
    ref = jnp.transpose(ref, (0, 3, 1, 2))

    assert out.shape == (N, C, H, W)
    assert jnp.allclose(out, ref, rtol=1e-4, atol=1e-4), (
        f"max abs err {jnp.max(jnp.abs(out - ref))}")

    # bf16 path (bf16 compute + bf16 output, f32 accumulation/IN stats):
    # exercised to make sure it compiles and runs; sanity-checked for finiteness.
    out_bf16 = residual_block_nchw(x_nchw, w1_oihw, b1, w2_oihw, b2,
                                   use_bf16=True)
    out_bf16 = jax.block_until_ready(out_bf16)
    assert out_bf16.shape == (N, C, H, W)
    assert bool(jnp.all(jnp.isfinite(out_bf16.astype(jnp.float32))))

    print("KERNEL_OK")
</pallas_src>

<mosaic_0001>
module attributes {stable_mosaic.version = 11 : i64} {
  func.func @_resblock_kernel(%arg0: i32, %arg1: memref<1x16x16x128xf32, #tpu.memory_space<vmem>>, %arg2: memref<3x384x128xf32, #tpu.memory_space<vmem>>, %arg3: memref<1x128xf32, #tpu.memory_space<vmem>>, %arg4: memref<3x384x128xf32, #tpu.memory_space<vmem>>, %arg5: memref<1x128xf32, #tpu.memory_space<vmem>>, %arg6: memref<1x16x16x128xf32, #tpu.memory_space<vmem>>, %arg7: memref<18x18x128xf32, #tpu.memory_space<vmem>>) attributes {dimension_semantics = [#tpu.dimension_semantics<parallel>], iteration_bounds = array<i64: 2>, scalar_prefetch = 0 : i64, scratch_operands = 1 : i64, tpu.core_type = #tpu.core_type<tc>, window_params = [{transform_indices = @transform_0, window_bounds = array<i64: 1, 16, 16, 128>}, {pipeline_mode = #tpu.pipeline_mode<synchronous>, transform_indices = @transform_1, window_bounds = array<i64: 3, 384, 128>}, {pipeline_mode = #tpu.pipeline_mode<synchronous>, transform_indices = @transform_2, window_bounds = array<i64: 1, 128>}, {pipeline_mode = #tpu.pipeline_mode<synchronous>, transform_indices = @transform_3, window_bounds = array<i64: 3, 384, 128>}, {pipeline_mode = #tpu.pipeline_mode<synchronous>, transform_indices = @transform_4, window_bounds = array<i64: 1, 128>}, {transform_indices = @transform_5, window_bounds = array<i64: 1, 16, 16, 128>}]} {
    %c0 = arith.constant 0 : index
    %c0_0 = arith.constant 0 : index
    %c0_1 = arith.constant 0 : index
    %c0_2 = arith.constant 0 : index
    %0 = vector.load %arg1[%c0, %c0_0, %c0_1, %c0_2] : memref<1x16x16x128xf32, #tpu.memory_space<vmem>>, vector<1x16x16x128xf32>
    %1 = vector.shape_cast %0 : vector<1x16x16x128xf32> to vector<16x16x128xf32>
    %c1 = arith.constant 1 : index
    %c1_3 = arith.constant 1 : index
    %c0_4 = arith.constant 0 : index
    %2 = vector.load %arg7[%c1, %c1_3, %c0_4] : memref<18x18x128xf32, #tpu.memory_space<vmem>>, vector<16x16x128xf32>
    tpu.vector_store %arg7[%c1, %c1_3, %c0_4], %1 {strides = array<i32>} : memref<18x18x128xf32, #tpu.memory_space<vmem>>, vector<16x16x128xf32>,
    %3 = vector.extract_strided_slice %1 {offsets = [1, 0, 0], sizes = [1, 16, 128], strides = [1, 1, 1]} : vector<16x16x128xf32> to vector<1x16x128xf32>
    %c0_5 = arith.constant 0 : index
    %c1_6 = arith.constant 1 : index
    %c0_7 = arith.constant 0 : index
    %4 = vector.load %arg7[%c0_5, %c1_6, %c0_7] : memref<18x18x128xf32, #tpu.memory_space<vmem>>, vector<1x16x128xf32>
    tpu.vector_store %arg7[%c0_5, %c1_6, %c0_7], %3 {strides = array<i32>} : memref<18x18x128xf32, #tpu.memory_space<vmem>>, vector<1x16x128xf32>,
    %5 = vector.extract_strided_slice %1 {offsets = [14, 0, 0], sizes = [1, 16, 128], strides = [1, 1, 1]} : vector<16x16x128xf32> to vector<1x16x128xf32>
    %c17 = arith.constant 17 : index
    %c1_8 = arith.constant 1 : index
    %c0_9 = arith.constant 0 : index
    %6 = vector.load %arg7[%c17, %c1_8, %c0_9] : memref<18x18x128xf32, #tpu.memory_space<vmem>>, vector<1x16x128xf32>
    tpu.vector_store %arg7[%c17, %c1_8, %c0_9], %5 {strides = array<i32>} : memref<18x18x128xf32, #tpu.memory_space<vmem>>, vector<1x16x128xf32>,
    %c0_10 = arith.constant 0 : index
    %c2 = arith.constant 2 : index
    %c0_11 = arith.constant 0 : index
    %7 = vector.load %arg7[%c0_10, %c2, %c0_11] : memref<18x18x128xf32, #tpu.memory_space<vmem>>, vector<18x1x128xf32>
    %c0_12 = arith.constant 0 : index
    %c0_13 = arith.constant 0 : index
    %c0_14 = arith.constant 0 : index
    %8 = vector.load %arg7[%c0_12, %c0_13, %c0_14] : memref<18x18x128xf32, #tpu.memory_space<vmem>>, vector<18x1x128xf32>
    tpu.vector_store %arg7[%c0_12, %c0_13, %c0_14], %7 {strides = array<i32>} : memref<18x18x128xf32, #tpu.memory_space<vmem>>, vector<18x1x128xf32>,
    %c0_15 = arith.constant 0 : index
    %c15 = arith.constant 15 : index
    %c0_16 = arith.constant 0 : index
    %9 = vector.load %arg7[%c0_15, %c15, %c0_16] : memref<18x18x128xf32, #tpu.memory_space<vmem>>, vector<18x1x128xf32>
    %c0_17 = arith.constant 0 : index
    %c17_18 = arith.constant 17 : index
    %c0_19 = arith.constant 0 : index
    %10 = vector.load %arg7[%c0_17, %c17_18, %c0_19] : memref<18x18x128xf32, #tpu.memory_space<vmem>>, vector<18x1x128xf32>
    tpu.vector_store %arg7[%c0_17, %c17_18, %c0_19], %9 {strides = array<i32>} : memref<18x18x128xf32, #tpu.memory_space<vmem>>, vector<18x1x128xf32>,
    %c0_20 = arith.constant 0 : index
    %c0_21 = arith.constant 0 : index
    %11 = vector.load %arg3[%c0_20, %c0_21] : memref<1x128xf32, #tpu.memory_space<vmem>>, vector<1x128xf32>
    %c0_22 = arith.constant 0 : index
    %c0_23 = arith.constant 0 : index
    %c0_24 = arith.constant 0 : index
    %12 = vector.load %arg7[%c0_22, %c0_23, %c0_24] : memref<18x18x128xf32, #tpu.memory_space<vmem>>, vector<18x16x128xf32>
    %13 = vector.extract_strided_slice %12 {offsets = [0, 0, 0], sizes = [16, 16, 128], strides = [1, 1, 1]} : vector<18x16x128xf32> to vector<16x16x128xf32>
    %14 = vector.shape_cast %13 : vector<16x16x128xf32> to vector<256x128xf32>
    %15 = vector.extract_strided_slice %12 {offsets = [1, 0, 0], sizes = [16, 16, 128], strides = [1, 1, 1]} : vector<18x16x128xf32> to vector<16x16x128xf32>
    %16 = vector.shape_cast %15 : vector<16x16x128xf32> to vector<256x128xf32>
    %17 = vector.extract_strided_slice %12 {offsets = [2, 0, 0], sizes = [16, 16, 128], strides = [1, 1, 1]} : vector<18x16x128xf32> to vector<16x16x128xf32>
    %18 = vector.shape_cast %17 : vector<16x16x128xf32> to vector<256x128xf32>
    %19 = tpu.concatenate %14, %16, %18 in 1 : vector<256x128xf32>, vector<256x128xf32>, vector<256x128xf32> -> vector<256x384xf32>
    %c0_25 = arith.constant 0 : index
    %c0_26 = arith.constant 0 : index
    %c0_27 = arith.constant 0 : index
    %20 = vector.load %arg2[%c0_25, %c0_26, %c0_27] : memref<3x384x128xf32, #tpu.memory_space<vmem>>, vector<1x384x128xf32>
    %21 = vector.shape_cast %20 : vector<1x384x128xf32> to vector<384x128xf32>
    %cst = arith.constant dense<0.000000e+00> : vector<256x128xf32>
    %22 = tpu.matmul %19, %21, %cst {dimension_numbers = #tpu.dot_dimension_numbers<[1], [0], [0], [1], [0, 0, 1, 1], [], []>} : vector<256x384xf32>, vector<384x128xf32>, vector<256x128xf32> -> vector<256x128xf32>
    %c0_28 = arith.constant 0 : index
    %c1_29 = arith.constant 1 : index
    %c0_30 = arith.constant 0 : index
    %23 = vector.load %arg7[%c0_28, %c1_29, %c0_30] : memref<18x18x128xf32, #tpu.memory_space<vmem>>, vector<18x16x128xf32>
    %24 = vector.extract_strided_slice %23 {offsets = [0, 0, 0], sizes = [16, 16, 128], strides = [1, 1, 1]} : vector<18x16x128xf32> to vector<16x16x128xf32>
    %25 = vector.shape_cast %24 : vector<16x16x128xf32> to vector<256x128xf32>
    %26 = vector.extract_strided_slice %23 {offsets = [1, 0, 0], sizes = [16, 16, 128], strides = [1, 1, 1]} : vector<18x16x128xf32> to vector<16x16x128xf32>
    %27 = vector.shape_cast %26 : vector<16x16x128xf32> to vector<256x128xf32>
    %28 = vector.extract_strided_slice %23 {offsets = [2, 0, 0], sizes = [16, 16, 128], strides = [1, 1, 1]} : vector<18x16x128xf32> to vector<16x16x128xf32>
    %29 = vector.shape_cast %28 : vector<16x16x128xf32> to vector<256x128xf32>
    %30 = tpu.concatenate %25, %27, %29 in 1 : vector<256x128xf32>, vector<256x128xf32>, vector<256x128xf32> -> vector<256x384xf32>
    %c1_31 = arith.constant 1 : index
    %c0_32 = arith.constant 0 : index
    %c0_33 = arith.constant 0 : index
    %31 = vector.load %arg2[%c1_31, %c0_32, %c0_33] : memref<3x384x128xf32, #tpu.memory_space<vmem>>, vector<1x384x128xf32>
    %32 = vector.shape_cast %31 : vector<1x384x128xf32> to vector<384x128xf32>
    %cst_34 = arith.constant dense<0.000000e+00> : vector<256x128xf32>
    %33 = tpu.matmul %30, %32, %cst_34 {dimension_numbers = #tpu.dot_dimension_numbers<[1], [0], [0], [1], [0, 0, 1, 1], [], []>} : vector<256x384xf32>, vector<384x128xf32>, vector<256x128xf32> -> vector<256x128xf32>
    %34 = arith.addf %22, %33 : vector<256x128xf32>
    %c0_35 = arith.constant 0 : index
    %c2_36 = arith.constant 2 : index
    %c0_37 = arith.constant 0 : index
    %35 = vector.load %arg7[%c0_35, %c2_36, %c0_37] : memref<18x18x128xf32, #tpu.memory_space<vmem>>, vector<18x16x128xf32>
    %36 = vector.extract_strided_slice %35 {offsets = [0, 0, 0], sizes = [16, 16, 128], strides = [1, 1, 1]} : vector<18x16x128xf32> to vector<16x16x128xf32>
    %37 = vector.shape_cast %36 : vector<16x16x128xf32> to vector<256x128xf32>
    %38 = vector.extract_strided_slice %35 {offsets = [1, 0, 0], sizes = [16, 16, 128], strides = [1, 1, 1]} : vector<18x16x128xf32> to vector<16x16x128xf32>
    %39 = vector.shape_cast %38 : vector<16x16x128xf32> to vector<256x128xf32>
    %40 = vector.extract_strided_slice %35 {offsets = [2, 0, 0], sizes = [16, 16, 128], strides = [1, 1, 1]} : vector<18x16x128xf32> to vector<16x16x128xf32>
    %41 = vector.shape_cast %40 : vector<16x16x128xf32> to vector<256x128xf32>
    %42 = tpu.concatenate %37, %39, %41 in 1 : vector<256x128xf32>, vector<256x128xf32>, vector<256x128xf32> -> vector<256x384xf32>
    %c2_38 = arith.constant 2 : index
    %c0_39 = arith.constant 0 : index
    %c0_40 = arith.constant 0 : index
    %43 = vector.load %arg2[%c2_38, %c0_39, %c0_40] : memref<3x384x128xf32, #tpu.memory_space<vmem>>, vector<1x384x128xf32>
    %44 = vector.shape_cast %43 : vector<1x384x128xf32> to vector<384x128xf32>
    %cst_41 = arith.constant dense<0.000000e+00> : vector<256x128xf32>
    %45 = tpu.matmul %42, %44, %cst_41 {dimension_numbers = #tpu.dot_dimension_numbers<[1], [0], [0], [1], [0, 0, 1, 1], [], []>} : vector<256x384xf32>, vector<384x128xf32>, vector<256x128xf32> -> vector<256x128xf32>
    %46 = arith.addf %34, %45 : vector<256x128xf32>
    %47 = vector.broadcast %11 : vector<1x128xf32> to vector<256x128xf32>
    %48 = arith.addf %46, %47 : vector<256x128xf32>
    %cst_42 = arith.constant dense<0.000000e+00> : vector<128xf32>
    %49 = vector.multi_reduction <add>, %48, %cst_42 [0] : vector<256x128xf32> to vector<128xf32>
    %50 = vector.shape_cast %49 : vector<128xf32> to vector<1x128xf32>
    %cst_43 = arith.constant 2.560000e+02 : f32
    %51 = vector.broadcast %cst_43 : f32 to vector<1x128xf32>
    %52 = arith.divf %50, %51 : vector<1x128xf32>
    %53 = vector.broadcast %52 : vector<1x128xf32> to vector<256x128xf32>
    %54 = arith.subf %48, %53 : vector<256x128xf32>
    %55 = arith.mulf %54, %54 : vector<256x128xf32>
    %cst_44 = arith.constant dense<0.000000e+00> : vector<128xf32>
    %56 = vector.multi_reduction <add>, %55, %cst_44 [0] : vector<256x128xf32> to vector<128xf32>
    %57 = vector.shape_cast %56 : vector<128xf32> to vector<1x128xf32>
    %cst_45 = arith.constant 2.560000e+02 : f32
    %58 = vector.broadcast %cst_45 : f32 to vector<1x128xf32>
    %59 = arith.divf %57, %58 : vector<1x128xf32>
    %cst_46 = arith.constant 9.99999974E-6 : f32
    %60 = vector.broadcast %cst_46 : f32 to vector<1x128xf32>
    %61 = arith.addf %59, %60 : vector<1x128xf32>
    %62 = math.rsqrt %61 : vector<1x128xf32>
    %63 = vector.broadcast %62 : vector<1x128xf32> to vector<256x128xf32>
    %64 = arith.mulf %54, %63 : vector<256x128xf32>
    %cst_47 = arith.constant 0.000000e+00 : f32
    %65 = vector.broadcast %cst_47 : f32 to vector<256x128xf32>
    %66 = arith.maximumf %64, %65 : vector<256x128xf32>
    %67 = vector.shape_cast %66 : vector<256x128xf32> to vector<16x16x128xf32>
    %c1_48 = arith.constant 1 : index
    %c1_49 = arith.constant 1 : index
    %c0_50 = arith.constant 0 : index
    %68 = vector.load %arg7[%c1_48, %c1_49, %c0_50] : memref<18x18x128xf32, #tpu.memory_space<vmem>>, vector<16x16x128xf32>
    tpu.vector_store %arg7[%c1_48, %c1_49, %c0_50], %67 {strides = array<i32>} : memref<18x18x128xf32, #tpu.memory_space<vmem>>, vector<16x16x128xf32>,
    %69 = vector.extract_strided_slice %67 {offsets = [1, 0, 0], sizes = [1, 16, 128], strides = [1, 1, 1]} : vector<16x16x128xf32> to vector<1x16x128xf32>
    %c0_51 = arith.constant 0 : index
    %c1_52 = arith.constant 1 : index
    %c0_53 = arith.constant 0 : index
    %70 = vector.load %arg7[%c0_51, %c1_52, %c0_53] : memref<18x18x128xf32, #tpu.memory_space<vmem>>, vector<1x16x128xf32>
    tpu.vector_store %arg7[%c0_51, %c1_52, %c0_53], %69 {strides = array<i32>} : memref<18x18x128xf32, #tpu.memory_space<vmem>>, vector<1x16x128xf32>,
    %71 = vector.extract_strided_slice %67 {offsets = [14, 0, 0], sizes = [1, 16, 128], strides = [1, 1, 1]} : vector<16x16x128xf32> to vector<1x16x128xf32>
    %c17_54 = arith.constant 17 : index
    %c1_55 = arith.constant 1 : index
    %c0_56 = arith.constant 0 : index
    %72 = vector.load %arg7[%c17_54, %c1_55, %c0_56] : memref<18x18x128xf32, #tpu.memory_space<vmem>>, vector<1x16x128xf32>
    tpu.vector_store %arg7[%c17_54, %c1_55, %c0_56], %71 {strides = array<i32>} : memref<18x18x128xf32, #tpu.memory_space<vmem>>, vector<1x16x128xf32>,
    %c0_57 = arith.constant 0 : index
    %c2_58 = arith.constant 2 : index
    %c0_59 = arith.constant 0 : index
    %73 = vector.load %arg7[%c0_57, %c2_58, %c0_59] : memref<18x18x128xf32, #tpu.memory_space<vmem>>, vector<18x1x128xf32>
    %c0_60 = arith.constant 0 : index
    %c0_61 = arith.constant 0 : index
    %c0_62 = arith.constant 0 : index
    %74 = vector.load %arg7[%c0_60, %c0_61, %c0_62] : memref<18x18x128xf32, #tpu.memory_space<vmem>>, vector<18x1x128xf32>
    tpu.vector_store %arg7[%c0_60, %c0_61, %c0_62], %73 {strides = array<i32>} : memref<18x18x128xf32, #tpu.memory_space<vmem>>, vector<18x1x128xf32>,
    %c0_63 = arith.constant 0 : index
    %c15_64 = arith.constant 15 : index
    %c0_65 = arith.constant 0 : index
    %75 = vector.load %arg7[%c0_63, %c15_64, %c0_65] : memref<18x18x128xf32, #tpu.memory_space<vmem>>, vector<18x1x128xf32>
    %c0_66 = arith.constant 0 : index
    %c17_67 = arith.constant 17 : index
    %c0_68 = arith.constant 0 : index
    %76 = vector.load %arg7[%c0_66, %c17_67, %c0_68] : memref<18x18x128xf32, #tpu.memory_space<vmem>>, vector<18x1x128xf32>
    tpu.vector_store %arg7[%c0_66, %c17_67, %c0_68], %75 {strides = array<i32>} : memref<18x18x128xf32, #tpu.memory_space<vmem>>, vector<18x1x128xf32>,
    %c0_69 = arith.constant 0 : index
    %c0_70 = arith.constant 0 : index
    %77 = vector.load %arg5[%c0_69, %c0_70] : memref<1x128xf32, #tpu.memory_space<vmem>>, vector<1x128xf32>
    %c0_71 = arith.constant 0 : index
    %c0_72 = arith.constant 0 : index
    %c0_73 = arith.constant 0 : index
    %78 = vector.load %arg7[%c0_71, %c0_72, %c0_73] : memref<18x18x128xf32, #tpu.memory_space<vmem>>, vector<18x16x128xf32>
    %79 = vector.extract_strided_slice %78 {offsets = [0, 0, 0], sizes = [16, 16, 128], strides = [1, 1, 1]} : vector<18x16x128xf32> to vector<16x16x128xf32>
    %80 = vector.shape_cast %79 : vector<16x16x128xf32> to vector<256x128xf32>
    %81 = vector.extract_strided_slice %78 {offsets = [1, 0, 0], sizes = [16, 16, 128], strides = [1, 1, 1]} : vector<18x16x128xf32> to vector<16x16x128xf32>
    %82 = vector.shape_cast %81 : vector<16x16x128xf32> to vector<256x128xf32>
    %83 = vector.extract_strided_slice %78 {offsets = [2, 0, 0], sizes = [16, 16, 128], strides = [1, 1, 1]} : vector<18x16x128xf32> to vector<16x16x128xf32>
    %84 = vector.shape_cast %83 : vector<16x16x128xf32> to vector<256x128xf32>
    %85 = tpu.concatenate %80, %82, %84 in 1 : vector<256x128xf32>, vector<256x128xf32>, vector<256x128xf32> -> vector<256x384xf32>
    %c0_74 = arith.constant 0 : index
    %c0_75 = arith.constant 0 : index
    %c0_76 = arith.constant 0 : index
    %86 = vector.load %arg4[%c0_74, %c0_75, %c0_76] : memref<3x384x128xf32, #tpu.memory_space<vmem>>, vector<1x384x128xf32>
    %87 = vector.shape_cast %86 : vector<1x384x128xf32> to vector<384x128xf32>
    %cst_77 = arith.constant dense<0.000000e+00> : vector<256x128xf32>
    %88 = tpu.matmul %85, %87, %cst_77 {dimension_numbers = #tpu.dot_dimension_numbers<[1], [0], [0], [1], [0, 0, 1, 1], [], []>} : vector<256x384xf32>, vector<384x128xf32>, vector<256x128xf32> -> vector<256x128xf32>
    %c0_78 = arith.constant 0 : index
    %c1_79 = arith.constant 1 : index
    %c0_80 = arith.constant 0 : index
    %89 = vector.load %arg7[%c0_78, %c1_79, %c0_80] : memref<18x18x128xf32, #tpu.memory_space<vmem>>, vector<18x16x128xf32>
    %90 = vector.extract_strided_slice %89 {offsets = [0, 0, 0], sizes = [16, 16, 128], strides = [1, 1, 1]} : vector<18x16x128xf32> to vector<16x16x128xf32>
    %91 = vector.shape_cast %90 : vector<16x16x128xf32> to vector<256x128xf32>
    %92 = vector.extract_strided_slice %89 {offsets = [1, 0, 0], sizes = [16, 16, 128], strides = [1, 1, 1]} : vector<18x16x128xf32> to vector<16x16x128xf32>
    %93 = vector.shape_cast %92 : vector<16x16x128xf32> to vector<256x128xf32>
    %94 = vector.extract_strided_slice %89 {offsets = [2, 0, 0], sizes = [16, 16, 128], strides = [1, 1, 1]} : vector<18x16x128xf32> to vector<16x16x128xf32>
    %95 = vector.shape_cast %94 : vector<16x16x128xf32> to vector<256x128xf32>
    %96 = tpu.concatenate %91, %93, %95 in 1 : vector<256x128xf32>, vector<256x128xf32>, vector<256x128xf32> -> vector<256x384xf32>
    %c1_81 = arith.constant 1 : index
    %c0_82 = arith.constant 0 : index
    %c0_83 = arith.constant 0 : index
    %97 = vector.load %arg4[%c1_81, %c0_82, %c0_83] : memref<3x384x128xf32, #tpu.memory_space<vmem>>, vector<1x384x128xf32>
    %98 = vector.shape_cast %97 : vector<1x384x128xf32> to vector<384x128xf32>
    %cst_84 = arith.constant dense<0.000000e+00> : vector<256x128xf32>
    %99 = tpu.matmul %96, %98, %cst_84 {dimension_numbers = #tpu.dot_dimension_numbers<[1], [0], [0], [1], [0, 0, 1, 1], [], []>} : vector<256x384xf32>, vector<384x128xf32>, vector<256x128xf32> -> vector<256x128xf32>
    %100 = arith.addf %88, %99 : vector<256x128xf32>
    %c0_85 = arith.constant 0 : index
    %c2_86 = arith.constant 2 : index
    %c0_87 = arith.constant 0 : index
    %101 = vector.load %arg7[%c0_85, %c2_86, %c0_87] : memref<18x18x128xf32, #tpu.memory_space<vmem>>, vector<18x16x128xf32>
    %102 = vector.extract_strided_slice %101 {offsets = [0, 0, 0], sizes = [16, 16, 128], strides = [1, 1, 1]} : vector<18x16x128xf32> to vector<16x16x128xf32>
    %103 = vector.shape_cast %102 : vector<16x16x128xf32> to vector<256x128xf32>
    %104 = vector.extract_strided_slice %101 {offsets = [1, 0, 0], sizes = [16, 16, 128], strides = [1, 1, 1]} : vector<18x16x128xf32> to vector<16x16x128xf32>
    %105 = vector.shape_cast %104 : vector<16x16x128xf32> to vector<256x128xf32>
    %106 = vector.extract_strided_slice %101 {offsets = [2, 0, 0], sizes = [16, 16, 128], strides = [1, 1, 1]} : vector<18x16x128xf32> to vector<16x16x128xf32>
    %107 = vector.shape_cast %106 : vector<16x16x128xf32> to vector<256x128xf32>
    %108 = tpu.concatenate %103, %105, %107 in 1 : vector<256x128xf32>, vector<256x128xf32>, vector<256x128xf32> -> vector<256x384xf32>
    %c2_88 = arith.constant 2 : index
    %c0_89 = arith.constant 0 : index
    %c0_90 = arith.constant 0 : index
    %109 = vector.load %arg4[%c2_88, %c0_89, %c0_90] : memref<3x384x128xf32, #tpu.memory_space<vmem>>, vector<1x384x128xf32>
    %110 = vector.shape_cast %109 : vector<1x384x128xf32> to vector<384x128xf32>
    %cst_91 = arith.constant dense<0.000000e+00> : vector<256x128xf32>
    %111 = tpu.matmul %108, %110, %cst_91 {dimension_numbers = #tpu.dot_dimension_numbers<[1], [0], [0], [1], [0, 0, 1, 1], [], []>} : vector<256x384xf32>, vector<384x128xf32>, vector<256x128xf32> -> vector<256x128xf32>
    %112 = arith.addf %100, %111 : vector<256x128xf32>
    %113 = vector.broadcast %77 : vector<1x128xf32> to vector<256x128xf32>
    %114 = arith.addf %112, %113 : vector<256x128xf32>
    %cst_92 = arith.constant dense<0.000000e+00> : vector<128xf32>
    %115 = vector.multi_reduction <add>, %114, %cst_92 [0] : vector<256x128xf32> to vector<128xf32>
    %116 = vector.shape_cast %115 : vector<128xf32> to vector<1x128xf32>
    %cst_93 = arith.constant 2.560000e+02 : f32
    %117 = vector.broadcast %cst_93 : f32 to vector<1x128xf32>
    %118 = arith.divf %116, %117 : vector<1x128xf32>
    %119 = vector.broadcast %118 : vector<1x128xf32> to vector<256x128xf32>
    %120 = arith.subf %114, %119 : vector<256x128xf32>
    %121 = arith.mulf %120, %120 : vector<256x128xf32>
    %cst_94 = arith.constant dense<0.000000e+00> : vector<128xf32>
    %122 = vector.multi_reduction <add>, %121, %cst_94 [0] : vector<256x128xf32> to vector<128xf32>
    %123 = vector.shape_cast %122 : vector<128xf32> to vector<1x128xf32>
    %cst_95 = arith.constant 2.560000e+02 : f32
    %124 = vector.broadcast %cst_95 : f32 to vector<1x128xf32>
    %125 = arith.divf %123, %124 : vector<1x128xf32>
    %cst_96 = arith.constant 9.99999974E-6 : f32
    %126 = vector.broadcast %cst_96 : f32 to vector<1x128xf32>
    %127 = arith.addf %125, %126 : vector<1x128xf32>
    %128 = math.rsqrt %127 : vector<1x128xf32>
    %129 = vector.broadcast %128 : vector<1x128xf32> to vector<256x128xf32>
    %130 = arith.mulf %120, %129 : vector<256x128xf32>
    %c0_97 = arith.constant 0 : index
    %c0_98 = arith.constant 0 : index
    %c0_99 = arith.constant 0 : index
    %c0_100 = arith.constant 0 : index
    %131 = vector.load %arg1[%c0_97, %c0_98, %c0_99, %c0_100] : memref<1x16x16x128xf32, #tpu.memory_space<vmem>>, vector<1x16x16x128xf32>
    %132 = vector.shape_cast %131 : vector<1x16x16x128xf32> to vector<16x16x128xf32>
    %133 = vector.shape_cast %130 : vector<256x128xf32> to vector<16x16x128xf32>
    %134 = arith.addf %132, %133 : vector<16x16x128xf32>
    %c0_101 = arith.constant 0 : index
    %c0_102 = arith.constant 0 : index
    %c0_103 = arith.constant 0 : index
    %c0_104 = arith.constant 0 : index
    %135 = vector.load %arg6[%c0_101, %c0_102, %c0_103, %c0_104] : memref<1x16x16x128xf32, #tpu.memory_space<vmem>>, vector<1x16x16x128xf32>
    %136 = vector.shape_cast %135 : vector<1x16x16x128xf32> to vector<16x16x128xf32>
    %137 = vector.shape_cast %134 : vector<16x16x128xf32> to vector<1x16x16x128xf32>
    tpu.vector_store %arg6[%c0_101, %c0_102, %c0_103, %c0_104], %137 {strides = array<i32>} : memref<1x16x16x128xf32, #tpu.memory_space<vmem>>, vector<1x16x16x128xf32>,
    return
  }
  func.func @transform_0(%arg0: i32) -> (i32, i32, i32, i32) {
    %c0_i32 = arith.constant 0 : i32
    %c0_i32_0 = arith.constant 0 : i32
    %c0_i32_1 = arith.constant 0 : i32
    %c0_i32_2 = arith.constant 0 : i32
    return %arg0, %c0_i32, %c0_i32_0, %c0_i32_1 : i32, i32, i32, i32
  }
  func.func @transform_1(%arg0: i32) -> (i32, i32, i32) {
    %c0_i32 = arith.constant 0 : i32
    %c0_i32_0 = arith.constant 0 : i32
    %c0_i32_1 = arith.constant 0 : i32
    %c0_i32_2 = arith.constant 0 : i32
    return %c0_i32, %c0_i32_0, %c0_i32_1 : i32, i32, i32
  }
  func.func @transform_2(%arg0: i32) -> (i32, i32) {
    %c0_i32 = arith.constant 0 : i32
    %c0_i32_0 = arith.constant 0 : i32
    %c0_i32_1 = arith.constant 0 : i32
    return %c0_i32, %c0_i32_0 : i32, i32
  }
  func.func @transform_3(%arg0: i32) -> (i32, i32, i32) {
    %c0_i32 = arith.constant 0 : i32
    %c0_i32_0 = arith.constant 0 : i32
    %c0_i32_1 = arith.constant 0 : i32
    %c0_i32_2 = arith.constant 0 : i32
    return %c0_i32, %c0_i32_0, %c0_i32_1 : i32, i32, i32
  }
  func.func @transform_4(%arg0: i32) -> (i32, i32) {
    %c0_i32 = arith.constant 0 : i32
    %c0_i32_0 = arith.constant 0 : i32
    %c0_i32_1 = arith.constant 0 : i32
    return %c0_i32, %c0_i32_0 : i32, i32
  }
  func.func @transform_5(%arg0: i32) -> (i32, i32, i32, i32) {
    %c0_i32 = arith.constant 0 : i32
    %c0_i32_0 = arith.constant 0 : i32
    %c0_i32_1 = arith.constant 0 : i32
    %c0_i32_2 = arith.constant 0 : i32
    return %arg0, %c0_i32, %c0_i32_0, %c0_i32_1 : i32, i32, i32, i32
  }
}

</mosaic_0001>

<bundles_post_ra>
// kernel: residual_block_nhwc.1
= control target key start
LH: loop header
LB: loop body
LE: loop exit
PB: predicated region body
PF: predicated region fallthrough
CT: control target
= control target key end

     0   :  { %s5864_s18 = smov 0   ;;  %s9210_s0 = inlined_call_operand.vmem [shape: f32[2,16,16,128], index: 0, kind: input, shape index: {}]   ;;  %s9211_s1 = inlined_call_operand.vmem [shape: f32[3,384,128], index: 1, kind: input, shape index: {}]   ;;  %s9212_s2 = inlined_call_operand.vmem [shape: f32[1,128], index: 2, kind: input, shape index: {}]   ;;  %s9213_s3 = inlined_call_operand.vmem [shape: f32[3,384,128], index: 3, kind: input, shape index: {}]   ;;  %s9214_s4 = inlined_call_operand.vmem [shape: f32[1,128], index: 4, kind: input, shape index: {}]   ;;  %s9215_s5 = inlined_call_operand.vmem [shape: f32[2,16,16,128], index: 5, kind: output, shape index: {}]  }
   0x1 LB: > { %s4357_s19 = sadd.s32 4294967295, %s5831_s18   ;;  %p4361_p0 = scmp.ge.s32.totalorder %s5831_s18, 1  ;;  %s5831_s18 = sphi %s5864_s18, %s15_s18  }
   0x2   : > { %p187_p1 = scmp.lt.s32.totalorder %s5831_s18, 3 }
   0x4   : > { %p188_p2 = pnand %p4361_p0, %p187_p1 }
   0x6   : > { %191 = sbr.rel (%p188_p2) target bundleno = 1380 (0x564), region = 40 }
   0xd   : > { %v4366_v0 = vld [vmem:[%s9211_s1 + $0x180] sm:$0xff]  ;;  %v4367_v1 = vld [vmem:[%s9211_s1 + $0x188] sm:$0xff]  ;;  %p215_p3 = scmp.lt.s32.totalorder %s4357_s19, 1  ;;  %v5833_v3 = vmov 0.0|0.0   ;;  %v4368_v6 = vld [vmem:[%s9211_s1 + $0x190] sm:$0xff] }
   0xe   : > { %v4398_v2 = vld [vmem:[%s9211_s1 + $0x280] sm:$0xff]  ;;  %5332 = vmatprep.subr.bf16.mxu0 %v5833_v3  ;;  %v5333_v4 = vpack.c.bf16 %v4367_v1, %v4366_v0  ;;  %v4399_v5 = vld [vmem:[%s9211_s1 + $0x288] sm:$0xff]  ;;  %v4369_v7 = vld [vmem:[%s9211_s1 + $0x198] sm:$0xff] }
   0xf   : > { %v5380_v8 = vpack.c.bf16 %v4399_v5, %v4398_v2  ;;  %v4400_v9 = vld [vmem:[%s9211_s1 + $0x290] sm:$0xff]  ;;  %v4401_v10 = vld [vmem:[%s9211_s1 + $0x298] sm:$0xff]  ;;  %s9219_s19 = smov (!%p215_p3, %s4357_s19), 1  ;;  %v5336_v11 = vpack.c.bf16 %v4369_v7, %v4368_v6  ;;  %v4402_v13 = vld [vmem:[%s9211_s1 + $0x2a0] sm:$0xff] }
  0x10   : > { %5334 = vmatpush1.bf16.msra.mxu0 %v5333_v4  ;;  %v5384_v12 = vpack.c.bf16 %v4401_v10, %v4400_v9  ;;  %v4403_v14 = vld [vmem:[%s9211_s1 + $0x2a8] sm:$0xff]  ;;  %v4370_v15 = vld [vmem:[%s9211_s1 + $0x1a0] sm:$0xff]  ;;  %s4562_s21 = sshll.u32 %s9219_s19, 8  ;;  %v4404_v19 = vld [vmem:[%s9211_s1 + $0x2b0] sm:$0xff] }
  0x11   : > { %5381 = vmatprep.subr.bf16.mxu1 %v5380_v8  ;;  %5335 = vmatprep.subr.bf16.mxu0 %v5833_v3  ;;  %v4371_v16 = vld [vmem:[%s9211_s1 + $0x1a8] sm:$0xff]  ;;  %v5388_v17 = vpack.c.bf16 %v4403_v14, %v4402_v13  ;;  %v4405_v20 = vld [vmem:[%s9211_s1 + $0x2b8] sm:$0xff]  ;;  %s5924_s28 = scalar_lea.vmem %s9210_s0, %s4562_s21  ;;  %v4372_v21 = vld [vmem:[%s9211_s1 + $0x1b0] sm:$0xff]  ;;  %s9123_s12 = scalar_lea.vmem %s9215_s5, %s4562_s21 }
  0x12   : > { %5383 = vmatpush3.bf16.msra.mxu1 %v5380_v8  ;;  %v5339_v18 = vpack.c.bf16 %v4371_v16, %v4370_v15  ;;  %v4373_v22 = vld [vmem:[%s9211_s1 + $0x1b8] sm:$0xff]  ;;  %v5392_v23 = vpack.c.bf16 %v4405_v20, %v4404_v19  ;;  %v5934_v24 = vld [vmem:[%s5924_s28 + $0x10] sm:$0xff]  ;;  %v4406_v26 = vld [vmem:[%s9211_s1 + $0x2c0] sm:$0xff] }
  0x13   : > { %5385 = vmatprep.subr.bf16.mxu1 %v5384_v12  ;;  %v5342_v25 = vpack.c.bf16 %v4373_v22, %v4372_v21  ;;  %v4407_v27 = vld [vmem:[%s9211_s1 + $0x2c8] sm:$0xff]  ;;  %260 = vst [vmem:[#allocation2 + $0x31] sm:$0xff] %v5934_v24  ;;  %4884 = vmatprep.mubr.f32.mxu1 %v5934_v24  ;;  %290 = vst [vmem:[#allocation2 + $0x1] sm:$0xff] %v5934_v24  ;;  %v5946_v28 = vld [vmem:[%s5924_s28 + $0x18] sm:$0xff] }
  0x14   : > { %5337 = vmatpush1.bf16.msra.mxu0 %v5336_v11  ;;  %v4374_v29 = vld [vmem:[%s9211_s1 + $0x1c0] sm:$0xff]  ;;  %v4375_v30 = vld [vmem:[%s9211_s1 + $0x1c8] sm:$0xff]  ;;  %261 = vst [vmem:[#allocation2 + $0x39] sm:$0xff] %v5946_v28  ;;  %291 = vst [vmem:[#allocation2 + $0x9] sm:$0xff] %v5946_v28  ;;  %v5396_v33 = vpack.c.bf16 %v4407_v27, %v4406_v26 }
  0x15   : > { %5338 = vmatprep.subr.bf16.mxu0 %v5833_v3  ;;  %v5958_v31 = vld [vmem:[%s5924_s28 + $0x20] sm:$0xff]  ;;  %v5962_v32 = vld [vmem:[%s5924_s28 + $0x28] sm:$0xff]  ;;  %v5966_v34 = vld [vmem:[%s5924_s28 + $0x30] sm:$0xff]  ;;  %v5345_v35 = vpack.c.bf16 %v4375_v30, %v4374_v29 }
  0x16   : > { %5387 = vmatpush3.bf16.msra.mxu1 %v5384_v12  ;;  %262 = vst [vmem:[#allocation2 + $0x49] sm:$0xff] %v5958_v31  ;;  %263 = vst [vmem:[#allocation2 + $0x51] sm:$0xff] %v5962_v32  ;;  %v4408_v36 = vld [vmem:[%s9211_s1 + $0x2d0] sm:$0xff]  ;;  %v4409_v37 = vld [vmem:[%s9211_s1 + $0x2d8] sm:$0xff] }
  0x17   : > { %5389 = vmatprep.subr.bf16.mxu1 %v5388_v17  ;;  %264 = vst [vmem:[#allocation2 + $0x61] sm:$0xff] %v5966_v34  ;;  %v5976_v38 = vld [vmem:[%s5924_s28 + $0x38] sm:$0xff]  ;;  %v4376_v39 = vld [vmem:[%s9211_s1 + $0x1d0] sm:$0xff]  ;;  %v5987_v41 = vld [vmem:[%s5924_s28 + $0x40] sm:$0xff]  ;;  %v5400_v43 = vpack.c.bf16 %v4409_v37, %v4408_v36 }
  0x18   : > { %5340 = vmatpush1.bf16.msra.mxu0 %v5339_v18  ;;  %v4377_v40 = vld [vmem:[%s9211_s1 + $0x1d8] sm:$0xff]  ;;  %265 = vst [vmem:[#allocation2 + $0x69] sm:$0xff] %v5976_v38  ;;  %266 = vst [vmem:[#allocation2 + $0x79] sm:$0xff] %v5987_v41  ;;  %v5991_v42 = vld [vmem:[%s5924_s28 + $0x48] sm:$0xff] }
  0x19   : > { %5341 = vmatprep.subr.bf16.mxu0 %v5833_v3  ;;  %267 = vst [vmem:[#allocation2 + $0x81] sm:$0xff] %v5991_v42  ;;  %v5995_v44 = vld [vmem:[%s5924_s28 + $0x50] sm:$0xff]  ;;  %v5348_v45 = vpack.c.bf16 %v4377_v40, %v4376_v39  ;;  %v4410_v46 = vld [vmem:[%s9211_s1 + $0x2e0] sm:$0xff]  ;;  %v4411_v47 = vld [vmem:[%s9211_s1 + $0x2e8] sm:$0xff] }
  0x1a   : > { %5391 = vmatpush3.bf16.msra.mxu1 %v5388_v17  ;;  %268 = vst [vmem:[#allocation2 + $0x91] sm:$0xff] %v5995_v44  ;;  %v6005_v48 = vld [vmem:[%s5924_s28 + $0x58] sm:$0xff]  ;;  %v4378_v49 = vld [vmem:[%s9211_s1 + $0x1e0] sm:$0xff]  ;;  %v4379_v50 = vld [vmem:[%s9211_s1 + $0x1e8] sm:$0xff]  ;;  %v5404_v53 = vpack.c.bf16 %v4411_v47, %v4410_v46 }
  0x1b   : > { %5393 = vmatprep.subr.bf16.mxu1 %v5392_v23  ;;  %269 = vst [vmem:[#allocation2 + $0x99] sm:$0xff] %v6005_v48  ;;  %v6016_v51 = vld [vmem:[%s5924_s28 + $0x60] sm:$0xff]  ;;  %v6020_v52 = vld [vmem:[%s5924_s28 + $0x68] sm:$0xff]  ;;  %v6024_v54 = vld [vmem:[%s5924_s28 + $0x70] sm:$0xff]  ;;  %v5351_v55 = vpack.c.bf16 %v4379_v50, %v4378_v49 }
  0x1c   : > { %5343 = vmatpush1.bf16.msra.mxu0 %v5342_v25  ;;  %270 = vst [vmem:[#allocation2 + $0xa9] sm:$0xff] %v6016_v51  ;;  %271 = vst [vmem:[#allocation2 + $0xb1] sm:$0xff] %v6020_v52  ;;  %v4412_v56 = vld [vmem:[%s9211_s1 + $0x2f0] sm:$0xff]  ;;  %v4413_v57 = vld [vmem:[%s9211_s1 + $0x2f8] sm:$0xff] }
  0x1d   : > { %5344 = vmatprep.subr.bf16.mxu0 %v5833_v3  ;;  %272 = vst [vmem:[#allocation2 + $0xc1] sm:$0xff] %v6024_v54  ;;  %v6034_v58 = vld [vmem:[%s5924_s28 + $0x78] sm:$0xff]  ;;  %v4380_v59 = vld [vmem:[%s9211_s1 + $0x1f0] sm:$0xff]  ;;  %v6045_v61 = vld [vmem:[%s5924_s28 + $0x80] sm:$0xff]  ;;  %v5408_v63 = vpack.c.bf16 %v4413_v57, %v4412_v56 }
  0x1e   : > { %5395 = vmatpush3.bf16.msra.mxu1 %v5392_v23  ;;  %v4381_v60 = vld [vmem:[%s9211_s1 + $0x1f8] sm:$0xff]  ;;  %273 = vst [vmem:[#allocation2 + $0xc9] sm:$0xff] %v6034_v58  ;;  %274 = vst [vmem:[#allocation2 + $0xd9] sm:$0xff] %v6045_v61  ;;  %v6049_v62 = vld [vmem:[%s5924_s28 + $0x88] sm:$0xff] }
  0x1f   : > { %5397 = vmatprep.subr.bf16.mxu1 %v5396_v33  ;;  %275 = vst [vmem:[#allocation2 + $0xe1] sm:$0xff] %v6049_v62  ;;  %v6053_v0 = vld [vmem:[%s5924_s28] sm:$0xff]  ;;  %v5354_v1 = vpack.c.bf16 %v4381_v60, %v4380_v59  ;;  %v6061_v4 = vld [vmem:[%s5924_s28 + $0x90] sm:$0xff]  ;;  %v6064_v5 = vld [vmem:[%s5924_s28 + $0x98] sm:$0xff] }
  0x20   : > { %5346 = vmatpush1.bf16.msra.mxu0 %v5345_v35  ;;  %v4382_v2 = vld [vmem:[%s9211_s1 + $0x200] sm:$0xff]  ;;  %258 = vst [vmem:[#allocation2 + $0x19] sm:$0xff] %v6053_v0  ;;  %601 = vmatprep.mubr.f32.mxu0 %v6053_v0  ;;  %v4383_v6 = vld [vmem:[%s9211_s1 + $0x208] sm:$0xff]  ;;  %276 = vst [vmem:[#allocation2 + $0xf1] sm:$0xff] %v6061_v4 }
  0x21   : > { %5347 = vmatprep.subr.bf16.mxu0 %v5833_v3  ;;  %277 = vst [vmem:[#allocation2 + $0xf9] sm:$0xff] %v6064_v5  ;;  %v6073_v7 = vld [vmem:[%s5924_s28 + $0x8] sm:$0xff]  ;;  %v6076_v8 = vld [vmem:[%s5924_s28 + $0xa0] sm:$0xff]  ;;  %v6091_v12 = vld [vmem:[%s5924_s28 + $0xb0] sm:$0xff]  ;;  %v5357_v14 = vpack.c.bf16 %v4383_v6, %v4382_v2 }
  0x22   : > { %5399 = vmatpush3.bf16.msra.mxu1 %v5396_v33  ;;  %v404_v9 = vld [vmem:[%s9211_s1] sm:$0xff]  ;;  %259 = vst [vmem:[#allocation2 + $0x21] sm:$0xff] %v6073_v7  ;;  %278 = vst [vmem:[#allocation2 + $0x109] sm:$0xff] %v6076_v8  ;;  %v6084_v10 = vld [vmem:[%s5924_s28 + $0xa8] sm:$0xff] }
  0x23   : > { %5401 = vmatprep.subr.bf16.mxu1 %v5400_v43  ;;  %v405_v11 = vld [vmem:[%s9211_s1 + $0x8] sm:$0xff]  ;;  %279 = vst [vmem:[#allocation2 + $0x111] sm:$0xff] %v6084_v10  ;;  %v6094_v13 = vld [vmem:[%s5924_s28 + $0xb8] sm:$0xff]  ;;  %280 = vst [vmem:[#allocation2 + $0x121] sm:$0xff] %v6091_v12 }
  0x24   : > { %5349 = vmatpush1.bf16.msra.mxu0 %v5348_v45  ;;  %281 = vst [vmem:[#allocation2 + $0x129] sm:$0xff] %v6094_v13  ;;  %v6099_v15 = vld [vmem:[%s5924_s28 + $0xc0] sm:$0xff]  ;;  %v6102_v16 = vld [vmem:[%s5924_s28 + $0xc8] sm:$0xff]  ;;  %v4384_v17 = vld [vmem:[%s9211_s1 + $0x210] sm:$0xff]  ;;  %v5413_v20 = vpack.c.bf16 %v405_v11, %v404_v9 }
  0x25   : > { %5350 = vmatprep.subr.bf16.mxu0 %v5833_v3  ;;  %v4385_v18 = vld [vmem:[%s9211_s1 + $0x218] sm:$0xff]  ;;  %282 = vst [vmem:[#allocation2 + $0x139] sm:$0xff] %v6099_v15  ;;  %283 = vst [vmem:[#allocation2 + $0x141] sm:$0xff] %v6102_v16  ;;  %v6114_v19 = vld [vmem:[%s5924_s28 + $0xd0] sm:$0xff] }
  0x26   : > { %5403 = vmatpush3.bf16.msra.mxu1 %v5400_v43  ;;  %v406_v21 = vld [vmem:[%s9211_s1 + $0x10] sm:$0xff]  ;;  %284 = vst [vmem:[#allocation2 + $0x151] sm:$0xff] %v6114_v19  ;;  %v6121_v22 = vld [vmem:[%s5924_s28 + $0xd8] sm:$0xff]  ;;  %v6129_v25 = vld [vmem:[%s5924_s28 + $0xe0] sm:$0xff]  ;;  %v5360_v27 = vpack.c.bf16 %v4385_v18, %v4384_v17 }
  0x27   : > { %5405 = vmatprep.subr.bf16.mxu1 %v5404_v53  ;;  %v407_v23 = vld [vmem:[%s9211_s1 + $0x18] sm:$0xff]  ;;  %285 = vst [vmem:[#allocation2 + $0x159] sm:$0xff] %v6121_v22  ;;  %v6132_v26 = vld [vmem:[%s5924_s28 + $0xe8] sm:$0xff]  ;;  %286 = vst [vmem:[#allocation2 + $0x169] sm:$0xff] %v6129_v25 }
  0x28   : > { %5352 = vmatpush1.bf16.msra.mxu0 %v5351_v55  ;;  %293 = vst [vmem:[#allocation2 + $0x199] sm:$0xff] %v6129_v25  ;;  %287 = vst [vmem:[#allocation2 + $0x171] sm:$0xff] %v6132_v26  ;;  %v6139_v29 = vld [vmem:[%s5924_s28 + $0xf0] sm:$0xff]  ;;  %v6142_v30 = vld [vmem:[%s5924_s28 + $0xf8] sm:$0xff]  ;;  %v5416_v36 = vpack.c.bf16 %v407_v23, %v406_v21 }
  0x29   : > { %5353 = vmatprep.subr.bf16.mxu0 %v5833_v3  ;;  %294 = vst [vmem:[#allocation2 + $0x1a1] sm:$0xff] %v6132_v26  ;;  %v4386_v33 = vld [vmem:[%s9211_s1 + $0x220] sm:$0xff]  ;;  %v4387_v35 = vld [vmem:[%s9211_s1 + $0x228] sm:$0xff]  ;;  %288 = vst [vmem:[#allocation2 + $0x181] sm:$0xff] %v6139_v29 }
  0x2a   : > { %5407 = vmatpush3.bf16.msra.mxu1 %v5404_v53  ;;  %289 = vst [vmem:[#allocation2 + $0x189] sm:$0xff] %v6142_v30  ;;  %v408_v37 = vld [vmem:[%s9211_s1 + $0x20] sm:$0xff]  ;;  %v409_v39 = vld [vmem:[%s9211_s1 + $0x28] sm:$0xff]  ;;  %v296_v40 = vld [vmem:[#allocation2 + $0x1a] sm:$0x1]  ;;  %v5363_v45 = vpack.c.bf16 %v4387_v35, %v4386_v33 }
  0x2b   : > { %5409 = vmatprep.subr.bf16.mxu1 %v5408_v63  ;;  %v295_v43 = vld [vmem:[#allocation2 + $0x2] sm:$0x1]  ;;  %314 = vst [vmem:[#allocation2 + $0x18] sm:$0x1] %v296_v40  ;;  %v4388_v46 = vld [vmem:[%s9211_s1 + $0x230] sm:$0xff]  ;;  %v4389_v47 = vld [vmem:[%s9211_s1 + $0x238] sm:$0xff]  ;;  %v5419_v50 = vpack.c.bf16 %v409_v39, %v408_v37 }
  0x2c   : > { %5355 = vmatpush1.bf16.msra.mxu0 %v5354_v1  ;;  %313 = vst [vmem:[#allocation2] sm:$0x1] %v295_v43  ;;  %v297_v49 = vld [vmem:[#allocation2 + $0x32] sm:$0x1]  ;;  %v411_v55 = vld [vmem:[%s9211_s1 + $0x38] sm:$0xff]  ;;  %v5366_v57 = vpack.c.bf16 %v4389_v47, %v4388_v46  ;;  %v4390_v60 = vld [vmem:[%s9211_s1 + $0x240] sm:$0xff] }
  0x2d   : > { %5356 = vmatprep.subr.bf16.mxu0 %v5833_v3  ;;  %315 = vst [vmem:[#allocation2 + $0x30] sm:$0x1] %v297_v49  ;;  %v410_v53 = vld [vmem:[%s9211_s1 + $0x30] sm:$0xff]  ;;  %v298_v56 = vld [vmem:[#allocation2 + $0x4a] sm:$0x1]  ;;  %v412_v6 = vld [vmem:[%s9211_s1 + $0x40] sm:$0xff] }
  0x2e   : > { %5411 = vmatpush3.bf16.msra.mxu1 %v5408_v63  ;;  %316 = vst [vmem:[#allocation2 + $0x48] sm:$0x1] %v298_v56  ;;  %v299_v59 = vld [vmem:[#allocation2 + $0x62] sm:$0x1]  ;;  %v4391_v63 = vld [vmem:[%s9211_s1 + $0x248] sm:$0xff]  ;;  %v5422_v1 = vpack.c.bf16 %v411_v55, %v410_v53  ;;  %v4392_v17 = vld [vmem:[%s9211_s1 + $0x250] sm:$0xff] }
  0x2f   : > { %5412 = vmatprep.subr.bf16.mxu1 %v5833_v3  ;;  %317 = vst [vmem:[#allocation2 + $0x60] sm:$0x1] %v299_v59  ;;  %v300_v2 = vld [vmem:[#allocation2 + $0x7a] sm:$0x1]  ;;  %v413_v9 = vld [vmem:[%s9211_s1 + $0x48] sm:$0xff]  ;;  %v5369_v11 = vpack.c.bf16 %v4391_v63, %v4390_v60  ;;  %v414_v23 = vld [vmem:[%s9211_s1 + $0x50] sm:$0xff] }
  0x30   : > { %5358 = vmatpush1.bf16.msra.mxu0 %v5357_v14  ;;  %318 = vst [vmem:[#allocation2 + $0x78] sm:$0x1] %v300_v2  ;;  %v301_v14 = vld [vmem:[#allocation2 + $0x92] sm:$0x1]  ;;  %v4393_v18 = vld [vmem:[%s9211_s1 + $0x258] sm:$0xff]  ;;  %v4395_v37 = vld [vmem:[%s9211_s1 + $0x268] sm:$0xff] }
  0x31   : > { %4885 = vmatmul.mubr.f32.vlgmr.msra.gmra.mrb[0].mxu1 %v5946_v28  ;;  %5359 = vmatprep.subr.bf16.mxu0 %v5833_v3  ;;  %319 = vst [vmem:[#allocation2 + $0x90] sm:$0x1] %v301_v14  ;;  %v302_v21 = vld [vmem:[#allocation2 + $0xaa] sm:$0x1]  ;;  %v5372_v33 = vpack.c.bf16 %v4393_v18, %v4392_v17  ;;  %v303_v35 = vld [vmem:[#allocation2 + $0xc2] sm:$0x1] }
  0x32   : > { %5414 = vmatpush1.bf16.msra.mxu1 %v5413_v20  ;;  %4887 = vmatprep.mubr.f32.mxu1 %v5958_v31  ;;  %v5425_v20 = vpack.c.bf16 %v413_v9, %v412_v6  ;;  %320 = vst [vmem:[#allocation2 + $0xa8] sm:$0x1] %v302_v21  ;;  %321 = vst [vmem:[#allocation2 + $0xc0] sm:$0x1] %v303_v35  ;;  %v416_v40 = vld [vmem:[%s9211_s1 + $0x60] sm:$0xff]  ;;  %v417_v43 = vld [vmem:[%s9211_s1 + $0x68] sm:$0xff] }
  0x33   : > { %5415 = vmatprep.subr.bf16.mxu1 %v5833_v3  ;;  %v305_v47 = vld [vmem:[#allocation2 + $0xf2] sm:$0x1]  ;;  %v5431_v53 = vpack.c.bf16 %v417_v43, %v416_v40  ;;  %v436_v55 = vld [vmem:[%s9211_s1 + $0x100] sm:$0xff]  ;;  %v437_v56 = vld [vmem:[%s9211_s1 + $0x108] sm:$0xff] }
  0x34   : > { %5361 = vmatpush1.bf16.msra.mxu0 %v5360_v27  ;;  %v415_v27 = vld [vmem:[%s9211_s1 + $0x58] sm:$0xff]  ;;  %v4396_v49 = vld [vmem:[%s9211_s1 + $0x270] sm:$0xff]  ;;  %323 = vst [vmem:[#allocation2 + $0xf0] sm:$0x1] %v305_v47  ;;  %v306_v60 = vld [vmem:[#allocation2 + $0x10a] sm:$0x1]  ;;  %v5460_v2 = vpack.c.bf16 %v437_v56, %v436_v55 }
  0x35   : > { %4888 = vmatmul.mubr.f32.gmra.mrb[2].mxu1 %v5962_v32  ;;  %5362 = vmatprep.subr.bf16.mxu0 %v5833_v3  ;;  %v5428_v39 = vpack.c.bf16 %v415_v27, %v414_v23  ;;  %v419_v59 = vld [vmem:[%s9211_s1 + $0x78] sm:$0xff]  ;;  %324 = vst [vmem:[#allocation2 + $0x108] sm:$0x1] %v306_v60  ;;  %v438_v9 = vld [vmem:[%s9211_s1 + $0x110] sm:$0xff]  ;;  %v420_v14 = vld [vmem:[%s9211_s1 + $0x80] sm:$0xff] }
  0x36   : > { %5417 = vmatpush1.bf16.msra.mxu1 %v5416_v36  ;;  %4890 = vmatprep.mubr.f32.mxu1 %v5966_v34  ;;  %v4394_v36 = vld [vmem:[%s9211_s1 + $0x260] sm:$0xff]  ;;  %v421_v17 = vld [vmem:[%s9211_s1 + $0x88] sm:$0xff]  ;;  %v308_v18 = vld [vmem:[#allocation2 + $0x13a] sm:$0x1] }
  0x37   : > { %5418 = vmatprep.subr.bf16.mxu1 %v5833_v3  ;;  %v5375_v46 = vpack.c.bf16 %v4395_v37, %v4394_v36  ;;  %326 = vst [vmem:[#allocation2 + $0x138] sm:$0x1] %v308_v18  ;;  %v5437_v21 = vpack.c.bf16 %v421_v17, %v420_v14  ;;  %v440_v23 = vld [vmem:[%s9211_s1 + $0x120] sm:$0xff]  ;;  %v441_v27 = vld [vmem:[%s9211_s1 + $0x128] sm:$0xff]  ;;  %v423_v35 = vld [vmem:[%s9211_s1 + $0x98] sm:$0xff] }
  0x38   : > { %5364 = vmatpush1.bf16.msra.mxu0 %v5363_v45  ;;  %v304_v45 = vld [vmem:[#allocation2 + $0xda] sm:$0x1]  ;;  %v309_v36 = vld [vmem:[#allocation2 + $0x152] sm:$0x1]  ;;  %v5468_v37 = vpack.c.bf16 %v441_v27, %v440_v23  ;;  %v311_v18 = vld [vmem:[#allocation2 + $0x182] sm:$0x1] }
  0x39   : > { %4891 = vmatmul.mubr.f32.gmra.mrb[4].mxu1 %v5976_v38  ;;  %5365 = vmatprep.subr.bf16.mxu0 %v5833_v3  ;;  %322 = vst [vmem:[#allocation2 + $0xd8] sm:$0x1] %v304_v45  ;;  %327 = vst [vmem:[#allocation2 + $0x150] sm:$0x1] %v309_v36  ;;  %v442_v40 = vld [vmem:[%s9211_s1 + $0x130] sm:$0xff]  ;;  %v443_v43 = vld [vmem:[%s9211_s1 + $0x138] sm:$0xff] }
  0x3a   : > { %5420 = vmatpush1.bf16.msra.mxu1 %v5419_v50  ;;  %4893 = vmatprep.mubr.f32.mxu1 %v5987_v41  ;;  %v4397_v50 = vld [vmem:[%s9211_s1 + $0x278] sm:$0xff]  ;;  %v424_v45 = vld [vmem:[%s9211_s1 + $0xa0] sm:$0xff]  ;;  %v5472_v47 = vpack.c.bf16 %v443_v43, %v442_v40  ;;  %v426_v55 = vld [vmem:[%s9211_s1 + $0xb0] sm:$0xff]  ;;  %329 = vst [vmem:[#allocation2 + $0x180] sm:$0x1] %v311_v18 }
  0x3b   : > { %5421 = vmatprep.subr.bf16.mxu1 %v5833_v3  ;;  %v5378_v63 = vpack.c.bf16 %v4397_v50, %v4396_v49  ;;  %v444_v50 = vld [vmem:[%s9211_s1 + $0x140] sm:$0xff]  ;;  %v427_v56 = vld [vmem:[%s9211_s1 + $0xb8] sm:$0xff]  ;;  %v446_v60 = vld [vmem:[%s9211_s1 + $0x150] sm:$0xff] }
  0x3c   : > { %5367 = vmatpush1.bf16.msra.mxu0 %v5366_v57  ;;  %v418_v57 = vld [vmem:[%s9211_s1 + $0x70] sm:$0xff]  ;;  %v431_v17 = vld [vmem:[%s9211_s1 + $0xd8] sm:$0xff]  ;;  %v432_v27 = vld [vmem:[%s9211_s1 + $0xe0] sm:$0xff] }
  0x3d   : > { %4894 = vmatmul.mubr.f32.gmra.mrb[6].mxu1 %v5991_v42  ;;  %5368 = vmatprep.subr.bf16.mxu0 %v5833_v3  ;;  %v5434_v6 = vpack.c.bf16 %v419_v59, %v418_v57  ;;  %v310_v57 = vld [vmem:[#allocation2 + $0x16a] sm:$0x1]  ;;  %v430_v14 = vld [vmem:[%s9211_s1 + $0xd0] sm:$0xff]  ;;  %v451_v23 = vld [vmem:[%s9211_s1 + $0x178] sm:$0xff] }
  0x3e   : > { %5423 = vmatpush1.bf16.msra.mxu1 %v5422_v1  ;;  %4896 = vmatprep.mubr.f32.mxu1 %v5995_v44  ;;  %v307_v1 = vld [vmem:[#allocation2 + $0x122] sm:$0x1]  ;;  %328 = vst [vmem:[#allocation2 + $0x168] sm:$0x1] %v310_v57  ;;  %v434_v36 = vld [vmem:[%s9211_s1 + $0xf0] sm:$0xff]  ;;  %v370_v40 = vld [vmem:[#allocation2 + $0x18] sm:$0xff] }
  0x3f   : > { %5424 = vmatprep.subr.bf16.mxu1 %v5833_v3  ;;  %325 = vst [vmem:[#allocation2 + $0x120] sm:$0x1] %v307_v1  ;;  %v428_v1 = vld [vmem:[%s9211_s1 + $0xc0] sm:$0xff]  ;;  %v4415_v43 = vld [vmem:[%s9211_s1 + $0x308] sm:$0xff]  ;;  %v4417_v57 = vld [vmem:[%s9211_s1 + $0x318] sm:$0xff] }
  0x40   : > { %5370 = vmatpush1.bf16.msra.mxu0 %v5369_v11  ;;  %v439_v11 = vld [vmem:[%s9211_s1 + $0x118] sm:$0xff] }
  0x41   : > { %4897 = vmatmul.mubr.f32.gmra.mrb[8].mxu1 %v6005_v48  ;;  %5371 = vmatprep.subr.bf16.mxu0 %v5833_v3 }
  0x42   : > { %5426 = vmatpush1.bf16.msra.mxu1 %v5425_v20  ;;  %4899 = vmatprep.mubr.f32.mxu1 %v6016_v51  ;;  %v5464_v20 = vpack.c.bf16 %v439_v11, %v438_v9  ;;  %v448_v9 = vld [vmem:[%s9211_s1 + $0x160] sm:$0xff]  ;;  %v449_v11 = vld [vmem:[%s9211_s1 + $0x168] sm:$0xff] }
  0x43   : > { %5427 = vmatprep.subr.bf16.mxu1 %v5833_v3 }
  0x44   : > { %5373 = vmatpush1.bf16.msra.mxu0 %v5372_v33  ;;  %v422_v33 = vld [vmem:[%s9211_s1 + $0x90] sm:$0xff] }
  0x45   : > { %4900 = vmatmul.mubr.f32.gmra.mrb[10].mxu1 %v6020_v52  ;;  %5374 = vmatprep.subr.bf16.mxu0 %v5833_v3 }
  0x46   : > { %5429 = vmatpush1.bf16.msra.mxu1 %v5428_v39  ;;  %4902 = vmatprep.mubr.f32.mxu1 %v6024_v54  ;;  %v5440_v39 = vpack.c.bf16 %v423_v35, %v422_v33  ;;  %v433_v33 = vld [vmem:[%s9211_s1 + $0xe8] sm:$0xff] }
  0x47   : > { %5430 = vmatprep.subr.bf16.mxu1 %v5833_v3 }
  0x48   : > { %5376 = vmatpush1.bf16.msra.mxu0 %v5375_v46  ;;  %v425_v46 = vld [vmem:[%s9211_s1 + $0xa8] sm:$0xff] }
  0x49   : > { %4903 = vmatmul.mubr.f32.gmra.mrb[12].mxu1 %v6034_v58  ;;  %5377 = vmatprep.subr.bf16.mxu0 %v5833_v3  ;;  %v5443_v49 = vpack.c.bf16 %v425_v46, %v424_v45  ;;  %v332_v45 = vld [vmem:[#allocation2 + $0x27] sm:$0x1]  ;;  %v331_v46 = vld [vmem:[#allocation2 + $0xf] sm:$0x1] }
  0x4a   : > { %5432 = vmatpush1.bf16.msra.mxu1 %v5431_v53  ;;  %4905 = vmatprep.mubr.f32.mxu1 %v6045_v61  ;;  %v445_v53 = vld [vmem:[%s9211_s1 + $0x148] sm:$0xff]  ;;  %350 = vst [vmem:[#allocation2 + $0x29] sm:$0x1] %v332_v45  ;;  %349 = vst [vmem:[#allocation2 + $0x11] sm:$0x1] %v331_v46  ;;  %v6496_v45 = vld [vmem:[#allocation2 + $0x80] sm:$0xff] }
  0x4b   : > { %5433 = vmatprep.subr.bf16.mxu1 %v5833_v3  ;;  %v5476_v59 = vpack.c.bf16 %v445_v53, %v444_v50  ;;  %v4432_v46 = vld [vmem:[%s9211_s1 + $0x390] sm:$0xff] }
  0x4c   : > { %5379 = vmatpush1.bf16.msra.mxu0 %v5378_v63  ;;  %v447_v63 = vld [vmem:[%s9211_s1 + $0x158] sm:$0xff] }
  0x4d   : > { %4906 = vmatmul.mubr.f32.gmra.mrb[14].mxu1 %v6049_v62  ;;  %5461 = vmatprep.subr.bf16.mxu0 %v5460_v2 }
  0x4e   : > { %5435 = vmatpush1.bf16.msra.mxu1 %v5434_v6  ;;  %4908 = vmatprep.mubr.f32.mxu1 %v6061_v4  ;;  %v5480_v6 = vpack.c.bf16 %v447_v63, %v446_v60  ;;  %v6411_v60 = vld [vmem:[#allocation2 + $0x30] sm:$0xff]  ;;  %v4419_v63 = vld [vmem:[%s9211_s1 + $0x328] sm:$0xff] }
  0x4f   : > { %602 = vmatmul.mubr.f32.vlgmr.msra.gmra.mrb[0].mxu0 %v5934_v24  ;;  %5436 = vmatprep.subr.bf16.mxu1 %v5833_v3 }
  0x50   : > { %606 = vmatprep.mubr.f32.mxu0 %v6073_v7  ;;  %5463 = vmatpush3.bf16.msra.mxu0 %v5460_v2  ;;  %v429_v2 = vld [vmem:[%s9211_s1 + $0xc8] sm:$0xff] }
  0x51   : > { %4909 = vmatmul.mubr.f32.gmra.mrb[16].mxu1 %v6064_v5  ;;  %5465 = vmatprep.subr.bf16.mxu0 %v5464_v20 }
  0x52   : > { %5438 = vmatpush1.bf16.msra.mxu1 %v5437_v21  ;;  %4911 = vmatprep.mubr.f32.mxu1 %v6076_v8  ;;  %v450_v21 = vld [vmem:[%s9211_s1 + $0x170] sm:$0xff] }
  0x53   : > { %607 = vmatmul.mubr.f32.gmra.mrb[2].mxu0 %v5946_v28  ;;  %5439 = vmatprep.subr.bf16.mxu1 %v5833_v3  ;;  %v5488_v35 = vpack.c.bf16 %v451_v23, %v450_v21  ;;  %v4426_v21 = vld [vmem:[%s9211_s1 + $0x360] sm:$0xff]  ;;  %v312_v23 = vld [vmem:[#allocation2 + $0x19a] sm:$0x1] }
  0x54   : > { %611 = vmatprep.mubr.f32.mxu0 %v5934_v24  ;;  %5467 = vmatpush3.bf16.msra.mxu0 %v5464_v20  ;;  %v5484_v20 = vpack.c.bf16 %v449_v11, %v448_v9  ;;  %v6435_v11 = vld [vmem:[#allocation2 + $0x48] sm:$0xff]  ;;  %330 = vst [vmem:[#allocation2 + $0x198] sm:$0x1] %v312_v23  ;;  %v6587_v23 = vld [vmem:[#allocation2 + $0xd8] sm:$0xff] }
  0x55   : > { %4912 = vmatmul.mubr.f32.gmra.mrb[18].mxu1 %v6084_v10  ;;  %5469 = vmatprep.subr.bf16.mxu0 %v5468_v37 }
  0x56   : > { %5441 = vmatpush1.bf16.msra.mxu1 %v5440_v39  ;;  %4914 = vmatprep.mubr.f32.mxu1 %v6091_v12  ;;  %v4414_v39 = vld [vmem:[%s9211_s1 + $0x300] sm:$0xff] }
  0x57   : > { %612 = vmatmul.mubr.f32.gmra.mrb[4].mxu0 %v6053_v0  ;;  %5442 = vmatprep.subr.bf16.mxu1 %v5833_v3  ;;  %v5446_v0 = vpack.c.bf16 %v427_v56, %v426_v55  ;;  %v5493_v50 = vpack.c.bf16 %v4415_v43, %v4414_v39  ;;  %v371_v55 = vld [vmem:[#allocation2 + $0x20] sm:$0xff]  ;;  %v4416_v56 = vld [vmem:[%s9211_s1 + $0x310] sm:$0xff] }
  0x58   : > { %616 = vmatprep.mubr.f32.mxu0 %v5946_v28  ;;  %5471 = vmatpush3.bf16.msra.mxu0 %v5468_v37  ;;  %v435_v37 = vld [vmem:[%s9211_s1 + $0xf8] sm:$0xff]  ;;  %v4430_v39 = vld [vmem:[%s9211_s1 + $0x380] sm:$0xff] }
  0x59   : > { %4915 = vmatmul.mubr.f32.gmra.mrb[20].mxu1 %v6094_v13  ;;  %5473 = vmatprep.subr.bf16.mxu0 %v5472_v47  ;;  %v336_v43 = vld [vmem:[#allocation2 + $0x87] sm:$0x1] }
  0x5a   : > { %5444 = vmatpush1.bf16.msra.mxu1 %v5443_v49  ;;  %4917 = vmatprep.mubr.f32.mxu1 %v6099_v15  ;;  %v368_v49 = vld [vmem:[#allocation2] sm:$0xff]  ;;  %354 = vst [vmem:[#allocation2 + $0x89] sm:$0x1] %v336_v43  ;;  %v4452_v43 = vld [vmem:[%s9211_s1 + $0x430] sm:$0xff] }
  0x5b   : > { %617 = vmatmul.mubr.f32.gmra.mrb[6].mxu0 %v6073_v7  ;;  %5445 = vmatprep.subr.bf16.mxu1 %v5833_v3  ;;  %v5449_v7 = vpack.c.bf16 %v429_v2, %v428_v1  ;;  %v333_v1 = vld [vmem:[#allocation2 + $0x3f] sm:$0x1] }
  0x5c   : > { %621 = vmatprep.mubr.f32.mxu0 %v5958_v31  ;;  %5475 = vmatpush3.bf16.msra.mxu0 %v5472_v47  ;;  %v4446_v47 = vld [vmem:[%s9211_s1 + $0x400] sm:$0xff]  ;;  %351 = vst [vmem:[#allocation2 + $0x41] sm:$0x1] %v333_v1  ;;  %v338_v1 = vld [vmem:[#allocation2 + $0xb7] sm:$0x1] }
  0x5d   : > { %4918 = vmatmul.mubr.f32.gmra.mrb[22].mxu1 %v6102_v16  ;;  %5477 = vmatprep.subr.bf16.mxu0 %v5476_v59  ;;  %356 = vst [vmem:[#allocation2 + $0xb9] sm:$0x1] %v338_v1  ;;  %v1440_v1 = vld [vmem:[#allocation2 + $0x22] sm:$0xff] }
  0x5e   : > { %5447 = vmatpush1.bf16.msra.mxu1 %v5446_v0  ;;  %4920 = vmatprep.mubr.f32.mxu1 %v6114_v19  ;;  %v4418_v0 = vld [vmem:[%s9211_s1 + $0x320] sm:$0xff] }
  0x5f   : > { %622 = vmatmul.mubr.f32.gmra.mrb[8].mxu0 %v5934_v24  ;;  %5448 = vmatprep.subr.bf16.mxu1 %v5833_v3  ;;  %v5452_v24 = vpack.c.bf16 %v431_v17, %v430_v14  ;;  %v5499_v2 = vpack.c.bf16 %v4419_v63, %v4418_v0  ;;  %v4423_v14 = vld [vmem:[%s9211_s1 + $0x348] sm:$0xff]  ;;  %v334_v17 = vld [vmem:[#allocation2 + $0x57] sm:$0x1]  ;;  %v4438_v0 = vld [vmem:[%s9211_s1 + $0x3c0] sm:$0xff] }
  0x60   : > { %626 = vmatprep.mubr.f32.mxu0 %v5962_v32  ;;  %5479 = vmatpush3.bf16.msra.mxu0 %v5476_v59  ;;  %v369_v59 = vld [vmem:[#allocation2 + $0x8] sm:$0xff]  ;;  %352 = vst [vmem:[#allocation2 + $0x59] sm:$0x1] %v334_v17 }
  0x61   : > { %4921 = vmatmul.mubr.f32.gmra.mrb[24].mxu1 %v6121_v22  ;;  %5481 = vmatprep.subr.bf16.mxu0 %v5480_v6  ;;  %v4439_v63 = vld [vmem:[%s9211_s1 + $0x3c8] sm:$0xff] }
  0x62   : > { %5450 = vmatpush1.bf16.msra.mxu1 %v5449_v7  ;;  %4923 = vmatprep.mubr.f32.mxu1 %v6129_v25  ;;  %v4421_v7 = vld [vmem:[%s9211_s1 + $0x338] sm:$0xff]  ;;  %v4443_v17 = vld [vmem:[%s9211_s1 + $0x3e8] sm:$0xff] }
  0x63   : > { %627 = vmatmul.mubr.f32.gmra.mrb[10].mxu0 %v5946_v28  ;;  %5451 = vmatprep.subr.bf16.mxu1 %v5833_v3  ;;  %v5455_v28 = vpack.c.bf16 %v433_v33, %v432_v27  ;;  %v6460_v27 = vld [vmem:[#allocation2 + $0x60] sm:$0xff]  ;;  %v4427_v33 = vld [vmem:[%s9211_s1 + $0x368] sm:$0xff] }
  0x64   : > { %631 = vmatprep.mubr.f32.mxu0 %v5966_v34  ;;  %5483 = vmatpush3.bf16.msra.mxu0 %v5480_v6  ;;  %v4420_v6 = vld [vmem:[%s9211_s1 + $0x330] sm:$0xff] }
  0x65   : > { %4924 = vmatmul.mubr.f32.gmra.mrb[26].mxu1 %v6132_v26  ;;  %5485 = vmatprep.subr.bf16.mxu0 %v5484_v20  ;;  %v5502_v9 = vpack.c.bf16 %v4421_v7, %v4420_v6  ;;  %v4440_v6 = vld [vmem:[%s9211_s1 + $0x3d0] sm:$0xff]  ;;  %v4441_v7 = vld [vmem:[%s9211_s1 + $0x3d8] sm:$0xff] }
  0x66   : > { %5453 = vmatpush1.bf16.msra.mxu1 %v5452_v24  ;;  %4926 = vmatprep.mubr.f32.mxu1 %v6139_v29  ;;  %v4425_v24 = vld [vmem:[%s9211_s1 + $0x358] sm:$0xff] }
  0x67   : > { %632 = vmatmul.mubr.f32.gmra.mrb[12].mxu0 %v5958_v31  ;;  %5454 = vmatprep.subr.bf16.mxu1 %v5833_v3  ;;  %v5458_v31 = vpack.c.bf16 %v435_v37, %v434_v36  ;;  %v4428_v36 = vld [vmem:[%s9211_s1 + $0x370] sm:$0xff]  ;;  %v4429_v37 = vld [vmem:[%s9211_s1 + $0x378] sm:$0xff] }
  0x68   : > { %636 = vmatprep.mubr.f32.mxu0 %v5976_v38  ;;  %5487 = vmatpush3.bf16.msra.mxu0 %v5484_v20  ;;  %v4424_v20 = vld [vmem:[%s9211_s1 + $0x350] sm:$0xff] }
  0x69   : > { %4927 = vmatmul.mubr.f32.gmra.mrb[28].mxu1 %v6142_v30  ;;  %5489 = vmatprep.subr.bf16.mxu0 %v5488_v35 }
  0x6a   : > { %5456 = vmatpush1.bf16.msra.mxu1 %v5455_v28  ;;  %4929 = vmatprep.mubr.f32.mxu1 %v6129_v25  ;;  %v5511_v28 = vpack.c.bf16 %v4427_v33, %v4426_v21  ;;  %v341_v21 = vld [vmem:[#allocation2 + $0xff] sm:$0x1]  ;;  %v6594_v33 = vld [vmem:[#allocation2 + $0xe0] sm:$0xff] }
  0x6b   : > { %637 = vmatmul.mubr.f32.gmra.mrb[14].mxu0 %v5962_v32  ;;  %5457 = vmatprep.subr.bf16.mxu1 %v5833_v3  ;;  %v4447_v32 = vld [vmem:[%s9211_s1 + $0x408] sm:$0xff]  ;;  %359 = vst [vmem:[#allocation2 + $0x101] sm:$0x1] %v341_v21 }
  0x6c   : > { %641 = vmatprep.mubr.f32.mxu0 %v5987_v41  ;;  %5491 = vmatpush3.bf16.msra.mxu0 %v5488_v35  ;;  %v6395_v53 = vpack.c.bf16 %v4447_v32, %v4446_v47  ;;  %v335_v35 = vld [vmem:[#allocation2 + $0x6f] sm:$0x1]  ;;  %v4433_v47 = vld [vmem:[%s9211_s1 + $0x398] sm:$0xff]  ;;  %v6508_v32 = vld [vmem:[#allocation2 + $0x90] sm:$0xff] }
  0x6d   : > { %4930 = vmatmul.mubr.f32.gmra.mrb[30].mxu1 %v6132_v26  ;;  %353 = vst [vmem:[#allocation2 + $0x71] sm:$0x1] %v335_v35  ;;  %v342_v35 = vld [vmem:[#allocation2 + $0x117] sm:$0x1] }
  0x6e   : > { %5459 = vmatpush1.bf16.msra.mxu1 %v5458_v31  ;;  %1051 = vmatprep.mubr.f32.mxu1 %v370_v40  ;;  %v6482_v31 = vld [vmem:[#allocation2 + $0x78] sm:$0xff]  ;;  %360 = vst [vmem:[#allocation2 + $0x119] sm:$0x1] %v342_v35 }
  0x6f   : > { %642 = vmatmul.mubr.f32.gmra.mrb[16].mxu0 %v5966_v34  ;;  %5492 = vmatprep.subr.bf16.mxu1 %v5833_v3  ;;  %v5496_v34 = vpack.c.bf16 %v4417_v57, %v4416_v56  ;;  %v6522_v56 = vld [vmem:[#allocation2 + $0x98] sm:$0xff]  ;;  %v4436_v57 = vld [vmem:[%s9211_s1 + $0x3b0] sm:$0xff] }
  0x70   : > { %646 = vmatprep.mubr.f32.mxu0 %v5991_v42  ;;  %5541 = vmatprep.subr.bf16.mxu0 %v6395_v53 }
  0x71   : > { %1052 = vmatmul.mubr.f32.vlgmr.msra.gmra.mrb[32].mxu1 %v368_v49  ;;  %v4434_v49 = vld [vmem:[%s9211_s1 + $0x3a0] sm:$0xff] }
  0x72   : > { %5494 = vmatpush1.bf16.msra.mxu1 %v5493_v50  ;;  %1056 = vmatprep.mubr.f32.mxu1 %v371_v55  ;;  %v4435_v50 = vld [vmem:[%s9211_s1 + $0x3a8] sm:$0xff] }
  0x73   : > { %647 = vmatmul.mubr.f32.gmra.mrb[18].mxu0 %v5976_v38  ;;  %5495 = vmatprep.subr.bf16.mxu1 %v5833_v3  ;;  %v6420_v38 = vld [vmem:[#allocation2 + $0x38] sm:$0xff] }
  0x74   : > { %651 = vmatprep.mubr.f32.mxu0 %v5995_v44 }
  0x75   : > { %1057 = vmatmul.mubr.f32.gmra.mrb[34].mxu1 %v369_v59  ;;  %v4437_v59 = vld [vmem:[%s9211_s1 + $0x3b8] sm:$0xff] }
  0x76   : > { %1061 = vmatprep.mubr.f32.mxu1 %v6411_v60  ;;  %5497 = vmatpush1.bf16.msra.mxu1 %v5496_v34  ;;  %v6534_v34 = vld [vmem:[#allocation2 + $0xa8] sm:$0xff] }
  0x77   : > { %652 = vmatmul.mubr.f32.gmra.mrb[20].mxu0 %v5987_v41  ;;  %5498 = vmatprep.subr.bf16.mxu1 %v5833_v3  ;;  %v4422_v41 = vld [vmem:[%s9211_s1 + $0x340] sm:$0xff] }
  0x78   : > { %656 = vmatprep.mubr.f32.mxu0 %v6005_v48  ;;  %v5505_v18 = vpack.c.bf16 %v4423_v14, %v4422_v41  ;;  %v6560_v41 = vld [vmem:[#allocation2 + $0xc0] sm:$0xff] }
  0x79   : > { %1062 = vmatmul.mubr.f32.gmra.mrb[36].mxu1 %v370_v40  ;;  %v4431_v40 = vld [vmem:[%s9211_s1 + $0x388] sm:$0xff]  ;;  %v4442_v14 = vld [vmem:[%s9211_s1 + $0x3e0] sm:$0xff] }
  0x7a   : > { %1066 = vmatprep.mubr.f32.mxu1 %v6420_v38  ;;  %5500 = vmatpush1.bf16.msra.mxu1 %v5499_v2  ;;  %v6547_v2 = vld [vmem:[#allocation2 + $0xb0] sm:$0xff] }
  0x7b   : > { %657 = vmatmul.mubr.f32.gmra.mrb[22].mxu0 %v5991_v42  ;;  %5501 = vmatprep.subr.bf16.mxu1 %v5833_v3  ;;  %v6444_v42 = vld [vmem:[#allocation2 + $0x50] sm:$0xff] }
  0x7c   : > { %661 = vmatprep.mubr.f32.mxu0 %v6016_v51 }
  0x7d   : > { %1067 = vmatmul.mubr.f32.gmra.mrb[38].mxu1 %v371_v55  ;;  %v337_v55 = vld [vmem:[#allocation2 + $0x9f] sm:$0x1] }
  0x7e   : > { %1071 = vmatprep.mubr.f32.mxu1 %v6435_v11  ;;  %5503 = vmatpush1.bf16.msra.mxu1 %v5502_v9  ;;  %355 = vst [vmem:[#allocation2 + $0xa1] sm:$0x1] %v337_v55  ;;  %v339_v9 = vld [vmem:[#allocation2 + $0xcf] sm:$0x1] }
  0x7f   : > { %662 = vmatmul.mubr.f32.gmra.mrb[24].mxu0 %v5995_v44  ;;  %5504 = vmatprep.subr.bf16.mxu1 %v5833_v3  ;;  %v5508_v44 = vpack.c.bf16 %v4425_v24, %v4424_v20  ;;  %357 = vst [vmem:[#allocation2 + $0xd1] sm:$0x1] %v339_v9  ;;  %v6573_v20 = vld [vmem:[#allocation2 + $0xc8] sm:$0xff]  ;;  %v4444_v24 = vld [vmem:[%s9211_s1 + $0x3f0] sm:$0xff] }
  0x80   : > { %666 = vmatprep.mubr.f32.mxu0 %v6020_v52  ;;  %v4459_v55 = vld [vmem:[%s9211_s1 + $0x468] sm:$0xff]  ;;  %v1444_v9 = vld [vmem:[#allocation2 + $0x52] sm:$0xff] }
  0x81   : > { %1072 = vmatmul.mubr.f32.gmra.mrb[40].mxu1 %v6411_v60 }
  0x82   : > { %1076 = vmatprep.mubr.f32.mxu1 %v6444_v42  ;;  %5506 = vmatpush1.bf16.msra.mxu1 %v5505_v18  ;;  %v340_v18 = vld [vmem:[#allocation2 + $0xe7] sm:$0x1] }
  0x83   : > { %667 = vmatmul.mubr.f32.gmra.mrb[26].mxu0 %v6005_v48  ;;  %5507 = vmatprep.subr.bf16.mxu1 %v5833_v3  ;;  %v6470_v48 = vld [vmem:[#allocation2 + $0x68] sm:$0xff]  ;;  %358 = vst [vmem:[#allocation2 + $0xe9] sm:$0x1] %v340_v18 }
  0x84   : > { %671 = vmatprep.mubr.f32.mxu0 %v6024_v54  ;;  %v1446_v18 = vld [vmem:[#allocation2 + $0x6a] sm:$0xff] }
  0x85   : > { %1077 = vmatmul.mubr.f32.gmra.mrb[42].mxu1 %v6420_v38 }
  0x86   : > { %1081 = vmatprep.mubr.f32.mxu1 %v6460_v27  ;;  %5509 = vmatpush1.bf16.msra.mxu1 %v5508_v44  ;;  %v4445_v44 = vld [vmem:[%s9211_s1 + $0x3f8] sm:$0xff] }
  0x87   : > { %672 = vmatmul.mubr.f32.gmra.mrb[28].mxu0 %v6016_v51  ;;  %5510 = vmatprep.subr.bf16.mxu1 %v5833_v3  ;;  %v5514_v51 = vpack.c.bf16 %v4429_v37, %v4428_v36  ;;  %v344_v36 = vld [vmem:[#allocation2 + $0x147] sm:$0x1]  ;;  %v345_v37 = vld [vmem:[#allocation2 + $0x15f] sm:$0x1] }
  0x88   : > { %676 = vmatprep.mubr.f32.mxu0 %v6034_v58  ;;  %362 = vst [vmem:[#allocation2 + $0x149] sm:$0x1] %v344_v36  ;;  %363 = vst [vmem:[#allocation2 + $0x161] sm:$0x1] %v345_v37 }
  0x89   : > { %1082 = vmatmul.mubr.f32.gmra.mrb[44].mxu1 %v6435_v11 }
  0x8a   : > { %1086 = vmatprep.mubr.f32.mxu1 %v6470_v48  ;;  %5512 = vmatpush1.bf16.msra.mxu1 %v5511_v28  ;;  %v343_v28 = vld [vmem:[#allocation2 + $0x12f] sm:$0x1] }
  0x8b   : > { %677 = vmatmul.mubr.f32.gmra.mrb[30].mxu0 %v6020_v52  ;;  %5513 = vmatprep.subr.bf16.mxu1 %v5833_v3  ;;  %v5517_v52 = vpack.c.bf16 %v4431_v40, %v4430_v39  ;;  %361 = vst [vmem:[#allocation2 + $0x131] sm:$0x1] %v343_v28  ;;  %v4451_v39 = vld [vmem:[%s9211_s1 + $0x428] sm:$0xff]  ;;  %v346_v40 = vld [vmem:[#allocation2 + $0x177] sm:$0x1] }
  0x8c   : > { %681 = vmatprep.mubr.f32.mxu0 %v6045_v61  ;;  %364 = vst [vmem:[#allocation2 + $0x179] sm:$0x1] %v346_v40 }
  0x8d   : > { %1087 = vmatmul.mubr.f32.gmra.mrb[46].mxu1 %v6444_v42 }
  0x8e   : > { %1091 = vmatprep.mubr.f32.mxu1 %v6482_v31  ;;  %5515 = vmatpush1.bf16.msra.mxu1 %v5514_v51  ;;  %v4450_v51 = vld [vmem:[%s9211_s1 + $0x420] sm:$0xff] }
  0x8f   : > { %682 = vmatmul.mubr.f32.gmra.mrb[32].mxu0 %v6024_v54  ;;  %5516 = vmatprep.subr.bf16.mxu1 %v5833_v3  ;;  %v5520_v54 = vpack.c.bf16 %v4433_v47, %v4432_v46  ;;  %v4455_v46 = vld [vmem:[%s9211_s1 + $0x448] sm:$0xff] }
  0x90   : > { %686 = vmatprep.mubr.f32.mxu0 %v6049_v62 }
  0x91   : > { %1092 = vmatmul.mubr.f32.gmra.mrb[48].mxu1 %v6460_v27 }
  0x92   : > { %1096 = vmatprep.mubr.f32.mxu1 %v6496_v45  ;;  %5518 = vmatpush1.bf16.msra.mxu1 %v5517_v52  ;;  %v4454_v52 = vld [vmem:[%s9211_s1 + $0x440] sm:$0xff] }
  0x93   : > { %687 = vmatmul.mubr.f32.gmra.mrb[34].mxu0 %v6034_v58  ;;  %5519 = vmatprep.subr.bf16.mxu1 %v5833_v3  ;;  %v5523_v58 = vpack.c.bf16 %v4435_v50, %v4434_v49  ;;  %v5556_v47 = vpack.c.bf16 %v4455_v46, %v4454_v52  ;;  %v6691_v49 = vld [vmem:[#allocation2 + $0x168] sm:$0xff]  ;;  %v4458_v50 = vld [vmem:[%s9211_s1 + $0x460] sm:$0xff] }
  0x94   : > { %691 = vmatprep.mubr.f32.mxu0 %v6061_v4 }
  0x95   : > { %1097 = vmatmul.mubr.f32.gmra.mrb[50].mxu1 %v6470_v48 }
  0x96   : > { %1101 = vmatprep.mubr.f32.mxu1 %v6508_v32  ;;  %5521 = vmatpush1.bf16.msra.mxu1 %v5520_v54  ;;  %v4456_v54 = vld [vmem:[%s9211_s1 + $0x450] sm:$0xff] }
  0x97   : > { %692 = vmatmul.mubr.f32.gmra.mrb[36].mxu0 %v6045_v61  ;;  %5522 = vmatprep.subr.bf16.mxu1 %v5833_v3  ;;  %v5526_v61 = vpack.c.bf16 %v4437_v59, %v4436_v57  ;;  %v4460_v57 = vld [vmem:[%s9211_s1 + $0x470] sm:$0xff]  ;;  %v4461_v59 = vld [vmem:[%s9211_s1 + $0x478] sm:$0xff] }
  0x98   : > { %696 = vmatprep.mubr.f32.mxu0 %v6064_v5 }
  0x99   : > { %1102 = vmatmul.mubr.f32.gmra.mrb[52].mxu1 %v6482_v31 }
  0x9a   : > { %1106 = vmatprep.mubr.f32.mxu1 %v6522_v56  ;;  %5524 = vmatpush1.bf16.msra.mxu1 %v5523_v58  ;;  %v348_v58 = vld [vmem:[#allocation2 + $0x1a7] sm:$0x1] }
  0x9b   : > { %697 = vmatmul.mubr.f32.gmra.mrb[38].mxu0 %v6049_v62  ;;  %5525 = vmatprep.subr.bf16.mxu1 %v5833_v3  ;;  %v5529_v62 = vpack.c.bf16 %v4439_v63, %v4438_v0  ;;  %366 = vst [vmem:[#allocation2 + $0x1a9] sm:$0x1] %v348_v58  ;;  %v1439_v0 = vld [vmem:[#allocation2 + $0x1a] sm:$0xff]  ;;  %v1437_v63 = vld [vmem:[#allocation2 + $0x2] sm:$0xff] }
  0x9c   : > { %701 = vmatprep.mubr.f32.mxu0 %v6076_v8 }
  0x9d   : > { %1107 = vmatmul.mubr.f32.gmra.mrb[54].mxu1 %v6496_v45 }
  0x9e   : > { %1111 = vmatprep.mubr.f32.mxu1 %v6534_v34  ;;  %5527 = vmatpush1.bf16.msra.mxu1 %v5526_v61  ;;  %v401_v61 = vld [vmem:[#allocation2 + $0x188] sm:$0xff] }
  0x9f   : > { %702 = vmatmul.mubr.f32.gmra.mrb[40].mxu0 %v6061_v4  ;;  %5528 = vmatprep.subr.bf16.mxu1 %v5833_v3  ;;  %v5532_v4 = vpack.c.bf16 %v4441_v7, %v4440_v6  ;;  %v1442_v6 = vld [vmem:[#allocation2 + $0x3a] sm:$0xff]  ;;  %v1443_v7 = vld [vmem:[#allocation2 + $0x4a] sm:$0xff] }
  0xa0   : > { %706 = vmatprep.mubr.f32.mxu0 %v6084_v10 }
  0xa1   : > { %1112 = vmatmul.mubr.f32.gmra.mrb[56].mxu1 %v6508_v32 }
  0xa2   : > { %1116 = vmatprep.mubr.f32.mxu1 %v6547_v2  ;;  %5530 = vmatpush1.bf16.msra.mxu1 %v5529_v62  ;;  %v1441_v62 = vld [vmem:[#allocation2 + $0x32] sm:$0xff] }
  0xa3   : > { %707 = vmatmul.mubr.f32.gmra.mrb[42].mxu0 %v6064_v5  ;;  %5531 = vmatprep.subr.bf16.mxu1 %v5833_v3  ;;  %v5535_v5 = vpack.c.bf16 %v4443_v17, %v4442_v14  ;;  %v402_v17 = vld [vmem:[#allocation2 + $0x198] sm:$0xff] }
  0xa4   : > { %711 = vmatprep.mubr.f32.mxu0 %v6091_v12 }
  0xa5   : > { %1117 = vmatmul.mubr.f32.gmra.mrb[58].mxu1 %v6522_v56 }
  0xa6   : > { %1121 = vmatprep.mubr.f32.mxu1 %v6560_v41  ;;  %5533 = vmatpush1.bf16.msra.mxu1 %v5532_v4 }
  0xa7   : > { %712 = vmatmul.mubr.f32.gmra.mrb[44].mxu0 %v6076_v8  ;;  %5534 = vmatprep.subr.bf16.mxu1 %v5833_v3  ;;  %v5538_v8 = vpack.c.bf16 %v4445_v44, %v4444_v24  ;;  %v1447_v44 = vld [vmem:[#allocation2 + $0x7a] sm:$0xff] }
  0xa8   : > { %716 = vmatprep.mubr.f32.mxu0 %v6094_v13 }
  0xa9   : > { %1122 = vmatmul.mubr.f32.gmra.mrb[60].mxu1 %v6534_v34 }
  0xaa   : > { %1126 = vmatprep.mubr.f32.mxu1 %v6573_v20  ;;  %5536 = vmatpush1.bf16.msra.mxu1 %v5535_v5  ;;  %v403_v5 = vld [vmem:[#allocation2 + $0x1a0] sm:$0xff] }
  0xab   : > { %717 = vmatmul.mubr.f32.gmra.mrb[46].mxu0 %v6084_v10  ;;  %5537 = vmatprep.subr.bf16.mxu1 %v5833_v3  ;;  %v6600_v10 = vld [vmem:[#allocation2 + $0xf0] sm:$0xff] }
  0xac   : > { %721 = vmatprep.mubr.f32.mxu0 %v6099_v15 }
  0xad   : > { %1127 = vmatmul.mubr.f32.gmra.mrb[62].mxu1 %v6547_v2 }
  0xae   : > { %1131 = vmatprep.mubr.f32.mxu1 %v6587_v23  ;;  %5539 = vmatpush1.bf16.msra.mxu1 %v5538_v8 }
  0xaf   : > { %722 = vmatmul.mubr.f32.gmra.mrb[48].mxu0 %v6091_v12  ;;  %v6606_v12 = vld [vmem:[#allocation2 + $0xf8] sm:$0xff] }
  0xb0   : > { %726 = vmatprep.mubr.f32.mxu0 %v6102_v16 }
  0xb1   : > { %1132 = vmatmul.mubr.f32.gmra.mrb[64].mxu1 %v6560_v41 }
  0xb2   : > { %1136 = vmatprep.mubr.f32.mxu1 %v6594_v33 }
  0xb3   : > { %727 = vmatmul.mubr.f32.gmra.mrb[50].mxu0 %v6094_v13  ;;  %v6612_v13 = vld [vmem:[#allocation2 + $0x108] sm:$0xff] }
  0xb4   : > { %731 = vmatprep.mubr.f32.mxu0 %v6114_v19 }
  0xb5   : > { %1137 = vmatmul.mubr.f32.gmra.mrb[66].mxu1 %v6573_v20 }
  0xb6   : > { %1141 = vmatprep.mubr.f32.mxu1 %v6600_v10 }
  0xb7   : > { %732 = vmatmul.mubr.f32.gmra.mrb[52].mxu0 %v6099_v15  ;;  %v6618_v15 = vld [vmem:[#allocation2 + $0x110] sm:$0xff] }
  0xb8   : > { %736 = vmatprep.mubr.f32.mxu0 %v6121_v22 }
  0xb9   : > { %1142 = vmatmul.mubr.f32.gmra.mrb[68].mxu1 %v6587_v23 }
  0xba   : > { %1146 = vmatprep.mubr.f32.mxu1 %v6606_v12 }
  0xbb   : > { %737 = vmatmul.mubr.f32.gmra.mrb[54].mxu0 %v6102_v16  ;;  %v6624_v16 = vld [vmem:[#allocation2 + $0x120] sm:$0xff] }
  0xbc   : > { %741 = vmatprep.mubr.f32.mxu0 %v6129_v25 }
  0xbd   : > { %1147 = vmatmul.mubr.f32.gmra.mrb[70].mxu1 %v6594_v33 }
  0xbe   : > { %1151 = vmatprep.mubr.f32.mxu1 %v6612_v13 }
  0xbf   : > { %742 = vmatmul.mubr.f32.gmra.mrb[56].mxu0 %v6114_v19  ;;  %v6630_v19 = vld [vmem:[#allocation2 + $0x128] sm:$0xff] }
  0xc0   : > { %746 = vmatprep.mubr.f32.mxu0 %v6132_v26 }
  0xc1   : > { %1152 = vmatmul.mubr.f32.gmra.mrb[72].mxu1 %v6600_v10 }
  0xc2   : > { %1156 = vmatprep.mubr.f32.mxu1 %v6618_v15 }
  0xc3   : > { %747 = vmatmul.mubr.f32.gmra.mrb[58].mxu0 %v6121_v22  ;;  %v4448_v22 = vld [vmem:[%s9211_s1 + $0x410] sm:$0xff] }
  0xc4   : > { %751 = vmatprep.mubr.f32.mxu0 %v6139_v29  ;;  %v4449_v29 = vld [vmem:[%s9211_s1 + $0x418] sm:$0xff] }
  0xc5   : > { %1157 = vmatmul.mubr.f32.gmra.mrb[74].mxu1 %v6606_v12 }
  0xc6   : > { %1161 = vmatprep.mubr.f32.mxu1 %v6624_v16 }
  0xc7   : > { %752 = vmatmul.mubr.f32.gmra.mrb[60].mxu0 %v6129_v25  ;;  %v6642_v25 = vld [vmem:[#allocation2 + $0x138] sm:$0xff] }
  0xc8   : > { %756 = vmatprep.mubr.f32.mxu0 %v6142_v30  ;;  %v5544_v30 = vpack.c.bf16 %v4449_v29, %v4448_v22  ;;  %v1452_v22 = vld [vmem:[#allocation2 + $0xb2] sm:$0xff] }
  0xc9   : > { %1162 = vmatmul.mubr.f32.gmra.mrb[76].mxu1 %v6612_v13 }
  0xca   : > { %1166 = vmatprep.mubr.f32.mxu1 %v6630_v19 }
  0xcb   : > { %757 = vmatmul.mubr.f32.gmra.mrb[62].mxu0 %v6132_v26  ;;  %v6654_v26 = vld [vmem:[#allocation2 + $0x140] sm:$0xff] }
  0xcc   : > { %4964 = vmatprep.mubr.f32.mxu0 %v6411_v60  ;;  %v5548_v60 = vpack.c.bf16 %v4451_v39, %v4450_v51 }
  0xcd   : > { %1167 = vmatmul.mubr.f32.gmra.mrb[78].mxu1 %v6618_v15 }
  0xce   : > { %1171 = vmatprep.mubr.f32.mxu1 %v6642_v25 }
  0xcf   : > { %4965 = vmatmul.mubr.f32.vlgmr.msra.gmra.mrb[64].mxu0 %v6420_v38  ;;  %v4453_v38 = vld [vmem:[%s9211_s1 + $0x438] sm:$0xff] }
  0xd0   : > { %4967 = vmatprep.mubr.f32.mxu0 %v6435_v11  ;;  %5543 = vmatpush3.bf16.msra.mxu0 %v6395_v53  ;;  %v6667_v11 = vld [vmem:[#allocation2 + $0x150] sm:$0xff]  ;;  %v5552_v53 = vpack.c.bf16 %v4453_v38, %v4452_v43  ;;  %v1455_v38 = vld [vmem:[#allocation2 + $0xda] sm:$0xff] }
  0xd1   : > { %1172 = vmatmul.mubr.f32.gmra.mrb[80].mxu1 %v6624_v16  ;;  %5545 = vmatprep.subr.bf16.mxu0 %v5544_v30 }
  0xd2   : > { %1176 = vmatprep.mubr.f32.mxu1 %v6654_v26 }
  0xd3   : > { %4968 = vmatmul.mubr.f32.gmra.mrb[66].mxu0 %v6444_v42  ;;  %v6679_v42 = vld [vmem:[#allocation2 + $0x158] sm:$0xff] }
  0xd4   : > { %4970 = vmatprep.mubr.f32.mxu0 %v6460_v27  ;;  %5547 = vmatpush3.bf16.msra.mxu0 %v5544_v30  ;;  %v347_v27 = vld [vmem:[#allocation2 + $0x18f] sm:$0x1]  ;;  %v1453_v30 = vld [vmem:[#allocation2 + $0xc2] sm:$0xff] }
  0xd5   : > { %1177 = vmatmul.mubr.f32.gmra.mrb[82].mxu1 %v6630_v19  ;;  %5549 = vmatprep.subr.bf16.mxu0 %v5548_v60  ;;  %365 = vst [vmem:[#allocation2 + $0x191] sm:$0x1] %v347_v27 }
  0xd6   : > { %1181 = vmatprep.mubr.f32.mxu1 %v6667_v11 }
  0xd7   : > { %4971 = vmatmul.mubr.f32.gmra.mrb[68].mxu0 %v6470_v48  ;;  %v4457_v48 = vld [vmem:[%s9211_s1 + $0x458] sm:$0xff] }
  0xd8   : > { %4973 = vmatprep.mubr.f32.mxu0 %v6482_v31  ;;  %5551 = vmatpush3.bf16.msra.mxu0 %v5548_v60  ;;  %v5560_v31 = vpack.c.bf16 %v4457_v48, %v4456_v54  ;;  %v1454_v60 = vld [vmem:[#allocation2 + $0xca] sm:$0xff] }
  0xd9   : > { %1182 = vmatmul.mubr.f32.gmra.mrb[84].mxu1 %v6642_v25  ;;  %5553 = vmatprep.subr.bf16.mxu0 %v5552_v53 }
  0xda   : > { %1186 = vmatprep.mubr.f32.mxu1 %v6679_v42 }
  0xdb   : > { %4974 = vmatmul.mubr.f32.gmra.mrb[70].mxu0 %v6496_v45  ;;  %v399_v45 = vld [vmem:[#allocation2 + $0x170] sm:$0xff] }
  0xdc   : > { %4976 = vmatprep.mubr.f32.mxu0 %v6508_v32  ;;  %5555 = vmatpush3.bf16.msra.mxu0 %v5552_v53  ;;  %v5564_v32 = vpack.c.bf16 %v4459_v55, %v4458_v50  ;;  %v6781_v50 = vld [vmem:[#allocation2 + $0xfa] sm:$0xff] }
  0xdd   : > { %1187 = vmatmul.mubr.f32.gmra.mrb[86].mxu1 %v6654_v26  ;;  %5557 = vmatprep.subr.bf16.mxu0 %v5556_v47 }
  0xde   : > { %1191 = vmatprep.mubr.f32.mxu1 %v6691_v49 }
  0xdf   : > { %4977 = vmatmul.mubr.f32.gmra.mrb[72].mxu0 %v6522_v56  ;;  %v400_v56 = vld [vmem:[#allocation2 + $0x180] sm:$0xff] }
  0xe0   : > { %4979 = vmatprep.mubr.f32.mxu0 %v6534_v34  ;;  %5559 = vmatpush3.bf16.msra.mxu0 %v5556_v47  ;;  %v5568_v34 = vpack.c.bf16 %v4461_v59, %v4460_v57  ;;  %v6773_v47 = vld [vmem:[#allocation2 + $0xf2] sm:$0xff] }
  0xe1   : > { %1192 = vmatmul.mubr.f32.gmra.mrb[88].mxu1 %v6667_v11  ;;  %5561 = vmatprep.subr.bf16.mxu0 %v5560_v31 }
  0xe2   : > { %1196 = vmatprep.mubr.f32.mxu1 %v399_v45 }
  0xe3   : > { %4980 = vmatmul.mubr.f32.gmra.mrb[74].mxu0 %v6547_v2  ;;  %v1438_v2 = vld [vmem:[#allocation2 + $0xa] sm:$0xff] }
  0xe4   : > { %4982 = vmatprep.mubr.f32.mxu0 %v6560_v41  ;;  %5563 = vmatpush3.bf16.msra.mxu0 %v5560_v31  ;;  %v1445_v41 = vld [vmem:[#allocation2 + $0x62] sm:$0xff] }
  0xe5   : > { %1197 = vmatmul.mubr.f32.gmra.mrb[90].mxu1 %v6679_v42  ;;  %5565 = vmatprep.subr.bf16.mxu0 %v5564_v32 }
  0xe6   : > { %1201 = vmatprep.mubr.f32.mxu1 %v400_v56 }
  0xe7   : > { %4983 = vmatmul.mubr.f32.gmra.mrb[76].mxu0 %v6573_v20 }
  0xe8   : > { %4985 = vmatprep.mubr.f32.mxu0 %v6587_v23  ;;  %5567 = vmatpush3.bf16.msra.mxu0 %v5564_v32  ;;  %v1448_v23 = vld [vmem:[#allocation2 + $0x82] sm:$0xff] }
  0xe9   : > { %1202 = vmatmul.mubr.f32.gmra.mrb[92].mxu1 %v6691_v49  ;;  %5569 = vmatprep.subr.bf16.mxu0 %v5568_v34 }
  0xea   : > { %1206 = vmatprep.mubr.f32.mxu1 %v401_v61 }
  0xeb   : > { %4986 = vmatmul.mubr.f32.gmra.mrb[78].mxu0 %v6594_v33 }
  0xec   : > { %4988 = vmatprep.mubr.f32.mxu0 %v6600_v10  ;;  %5571 = vmatpush3.bf16.msra.mxu0 %v5568_v34  ;;  %v1449_v10 = vld [vmem:[#allocation2 + $0x92] sm:$0xff] }
  0xed   : > { %1207 = vmatmul.mubr.f32.gmra.mrb[94].mxu1 %v399_v45  ;;  %5572 = vmatprep.subr.bf16.mxu0 %v5833_v3 }
  0xee   : > { %1586 = vmatprep.mubr.f32.mxu1 %v1439_v0 }
  0xef   : > { %4989 = vmatmul.mubr.f32.gmra.mrb[80].mxu0 %v6606_v12 }
  0xf0   : > { %4991 = vmatprep.mubr.f32.mxu0 %v6612_v13  ;;  %v1450_v13 = vld [vmem:[#allocation2 + $0x9a] sm:$0xff] }
  0xf1   : > { %1587 = vmatmul.mubr.f32.vlgmr.msra.gmra.mrb[96].mxu1 %v1437_v63 }
  0xf2   : > { %1591 = vmatprep.mubr.f32.mxu1 %v1440_v1 }
  0xf3   : > { %4992 = vmatmul.mubr.f32.gmra.mrb[82].mxu0 %v6618_v15 }
  0xf4   : > { %4994 = vmatprep.mubr.f32.mxu0 %v6624_v16  ;;  %v1451_v16 = vld [vmem:[#allocation2 + $0xaa] sm:$0xff] }
  0xf5   : > { %1592 = vmatmul.mubr.f32.gmra.mrb[98].mxu1 %v1438_v2 }
  0xf6   : > { %1596 = vmatprep.mubr.f32.mxu1 %v1441_v62 }
  0xf7   : > { %4995 = vmatmul.mubr.f32.gmra.mrb[84].mxu0 %v6630_v19 }
  0xf8   : > { %4997 = vmatprep.mubr.f32.mxu0 %v6642_v25 }
  0xf9   : > { %1597 = vmatmul.mubr.f32.gmra.mrb[100].mxu1 %v1439_v0 }
  0xfa   : > { %1601 = vmatprep.mubr.f32.mxu1 %v1442_v6 }
  0xfb   : > { %4998 = vmatmul.mubr.f32.gmra.mrb[86].mxu0 %v6654_v26 }
  0xfc   : > { %5000 = vmatprep.mubr.f32.mxu0 %v6667_v11 }
  0xfd   : > { %1602 = vmatmul.mubr.f32.gmra.mrb[102].mxu1 %v1440_v1 }
  0xfe   : > { %1606 = vmatprep.mubr.f32.mxu1 %v1443_v7 }
  0xff   : > { %5001 = vmatmul.mubr.f32.gmra.mrb[88].mxu0 %v6679_v42  ;;  %v1456_v42 = vld [vmem:[#allocation2 + $0xe2] sm:$0xff] }
 0x100   : > { %5003 = vmatprep.mubr.f32.mxu0 %v6691_v49 }
 0x101   : > { %1607 = vmatmul.mubr.f32.gmra.mrb[104].mxu1 %v1441_v62 }
 0x102   : > { %1611 = vmatprep.mubr.f32.mxu1 %v1444_v9 }
 0x103   : > { %5004 = vmatmul.mubr.f32.gmra.mrb[90].mxu0 %v399_v45  ;;  %v6785_v45 = vld [vmem:[#allocation2 + $0x10a] sm:$0xff] }
 0x104   : > { %v6730_v4 = vpop.f32.mrb[0].mxu1  ;;  %5006 = vmatprep.mubr.f32.mxu0 %v400_v56  ;;  %v6794_v56 = vld [vmem:[#allocation2 + $0x112] sm:$0xff] }
 0x105   : > { %v828_v14 = vpop.f32.mrb[1].mxu1  ;;  %1612 = vmatmul.mubr.f32.gmra.mrb[106].mxu1 %v1442_v6 }
 0x106   : > { %1616 = vmatprep.mubr.f32.mxu1 %v1445_v41 }
 0x107   : > { %5007 = vmatmul.mubr.f32.gmra.mrb[92].mxu0 %v401_v61  ;;  %v6798_v61 = vld [vmem:[#allocation2 + $0x122] sm:$0xff] }
 0x108   : > { %v6732_v20 = vpop.f32.mrb[2].mxu1  ;;  %5009 = vmatprep.mubr.f32.mxu0 %v402_v17  ;;  %v6821_v17 = vld [vmem:[#allocation2 + $0x142] sm:$0xff] }
 0x109   : > { %v6734_v24 = vpop.f32.mrb[3].mxu1  ;;  %1617 = vmatmul.mubr.f32.gmra.mrb[108].mxu1 %v1443_v7 }
 0x10a   : > { %1621 = vmatprep.mubr.f32.mxu1 %v1446_v18 }
 0x10b   : > { %5010 = vmatmul.mubr.f32.gmra.mrb[94].mxu0 %v403_v5 }
 0x10c   : > { %v6736_v21 = vpop.f32.mrb[4].mxu1  ;;  %5044 = vmatprep.mubr.f32.mxu0 %v1441_v62  ;;  %v6807_v62 = vld [vmem:[#allocation2 + $0x12a] sm:$0xff] }
 0x10d   : > { %v6738_v8 = vpop.f32.mrb[5].mxu1  ;;  %1622 = vmatmul.mubr.f32.gmra.mrb[110].mxu1 %v1444_v9 }
 0x10e   : > { %1626 = vmatprep.mubr.f32.mxu1 %v1447_v44 }
 0x10f   : > { %5045 = vmatmul.mubr.f32.vlgmr.msra.gmra.mrb[96].mxu0 %v1442_v6 }
 0x110   : > { %v6740_v33 = vpop.f32.mrb[6].mxu1  ;;  %5047 = vmatprep.mubr.f32.mxu0 %v1443_v7  ;;  %v6811_v7 = vld [vmem:[#allocation2 + $0x13a] sm:$0xff] }
 0x111   : > { %v6742_v35 = vpop.f32.mrb[7].mxu1  ;;  %1627 = vmatmul.mubr.f32.gmra.mrb[112].mxu1 %v1445_v41 }
 0x112   : > { %1631 = vmatprep.mubr.f32.mxu1 %v1448_v23 }
 0x113   : > { %5048 = vmatmul.mubr.f32.gmra.mrb[98].mxu0 %v1444_v9 }
 0x114   : > { %v6744_v12 = vpop.f32.mrb[8].mxu1  ;;  %5050 = vmatprep.mubr.f32.mxu0 %v1445_v41 }
 0x115   : > { %v6746_v28 = vpop.f32.mrb[9].mxu1  ;;  %1632 = vmatmul.mubr.f32.gmra.mrb[114].mxu1 %v1446_v18 }
 0x116   : > { %1636 = vmatprep.mubr.f32.mxu1 %v1449_v10 }
 0x117   : > { %5051 = vmatmul.mubr.f32.gmra.mrb[100].mxu0 %v1446_v18 }
 0x118   : > { %v6748_v15 = vpop.f32.mrb[10].mxu1  ;;  %5053 = vmatprep.mubr.f32.mxu0 %v1447_v44 }
 0x119   : > { %v6750_v36 = vpop.f32.mrb[11].mxu1  ;;  %1637 = vmatmul.mubr.f32.gmra.mrb[116].mxu1 %v1447_v44 }
 0x11a   : > { %1641 = vmatprep.mubr.f32.mxu1 %v1450_v13 }
 0x11b   : > { %5054 = vmatmul.mubr.f32.gmra.mrb[102].mxu0 %v1448_v23 }
 0x11c   : > { %v6752_v19 = vpop.f32.mrb[12].mxu1  ;;  %5056 = vmatprep.mubr.f32.mxu0 %v1449_v10 }
 0x11d   : > { %v6754_v37 = vpop.f32.mrb[13].mxu1  ;;  %1642 = vmatmul.mubr.f32.gmra.mrb[118].mxu1 %v1448_v23 }
 0x11e   : > { %1646 = vmatprep.mubr.f32.mxu1 %v1451_v16 }
 0x11f   : > { %5057 = vmatmul.mubr.f32.gmra.mrb[104].mxu0 %v1450_v13 }
 0x120   : > { %v6756_v29 = vpop.f32.mrb[14].mxu1  ;;  %5059 = vmatprep.mubr.f32.mxu0 %v1451_v16 }
 0x121   : > { %v6758_v25 = vpop.f32.mrb[15].mxu1  ;;  %1647 = vmatmul.mubr.f32.gmra.mrb[120].mxu1 %v1449_v10  ;;  %v6839_v10 = vld [vmem:[#allocation2 + $0x16a] sm:$0xff] }
 0x122   : > { %v603_v51 = vpop.f32.mrb[0].mxu0  ;;  %1651 = vmatprep.mubr.f32.mxu1 %v1452_v22 }
 0x123   : > { %5060 = vmatmul.mubr.f32.gmra.mrb[106].mxu0 %v1452_v22  ;;  %v605_v39 = vpop.f32.mrb[1].mxu0  ;;  %v6760_v26 = vadd.f32 %v828_v14, %v603_v51 }
 0x124   : > { %v6762_v40 = vpop.f32.mrb[16].mxu1  ;;  %5062 = vmatprep.mubr.f32.mxu0 %v1453_v30  ;;  %v6854_v39 = vld [vmem:[#allocation2 + $0x182] sm:$0xff] }
 0x125   : > { %v6764_v43 = vpop.f32.mrb[17].mxu1  ;;  %1652 = vmatmul.mubr.f32.gmra.mrb[122].mxu1 %v1450_v13 }
 0x126   : > { %v608_v11 = vpop.f32.mrb[2].mxu0  ;;  %1656 = vmatprep.mubr.f32.mxu1 %v1453_v30 }
 0x127   : > { %5063 = vmatmul.mubr.f32.gmra.mrb[108].mxu0 %v1454_v60  ;;  %v610_v53 = vpop.f32.mrb[3].mxu0  ;;  %v6767_v52 = vadd.f32 %v6730_v4, %v608_v11 }
 0x128   : > { %v6769_v46 = vpop.f32.mrb[18].mxu1  ;;  %5065 = vmatprep.mubr.f32.mxu0 %v1455_v38  ;;  %v6862_v53 = vld [vmem:[#allocation2 + $0x18a] sm:$0xff] }
 0x129   : > { %v6771_v27 = vpop.f32.mrb[19].mxu1  ;;  %1657 = vmatmul.mubr.f32.gmra.mrb[124].mxu1 %v1451_v16 }
 0x12a   : > { %v613_v54 = vpop.f32.mrb[4].mxu0  ;;  %1661 = vmatprep.mubr.f32.mxu1 %v1454_v60 }
 0x12b   : > { %5066 = vmatmul.mubr.f32.gmra.mrb[110].mxu0 %v1456_v42  ;;  %v615_v48 = vpop.f32.mrb[5].mxu0  ;;  %v6776_v49 = vadd.f32 %v6734_v24, %v613_v54  ;;  %v1471_v54 = vld [vmem:[#allocation2 + $0x19a] sm:$0xff] }
 0x12c   : > { %v6778_v31 = vpop.f32.mrb[20].mxu1  ;;  %5068 = vmatprep.mubr.f32.mxu0 %v6773_v47 }
 0x12d   : > { %v6783_v55 = vpop.f32.mrb[21].mxu1  ;;  %1662 = vmatmul.mubr.f32.gmra.mrb[126].mxu1 %v1452_v22 }
 0x12e   : > { %v618_v58 = vpop.f32.mrb[6].mxu0  ;;  %1666 = vmatprep.mubr.f32.mxu1 %v1455_v38 }
 0x12f   : > { %5069 = vmatmul.mubr.f32.gmra.mrb[112].mxu0 %v6781_v50  ;;  %v620_v32 = vpop.f32.mrb[7].mxu0  ;;  %v6789_v57 = vadd.f32 %v6732_v20, %v618_v58  ;;  %v6825_v20 = vld [vmem:[#allocation2 + $0x152] sm:$0xff] }
 0x130   : > { %v6791_v59 = vpop.f32.mrb[22].mxu1  ;;  %5071 = vmatprep.mubr.f32.mxu0 %v6785_v45 }
 0x131   : > { %v6796_v34 = vpop.f32.mrb[23].mxu1  ;;  %1667 = vmatmul.mubr.f32.gmra.mrb[128].mxu1 %v1453_v30  ;;  %v6849_v30 = vld [vmem:[#allocation2 + $0x172] sm:$0xff] }
 0x132   : > { %v623_v0 = vpop.f32.mrb[8].mxu0  ;;  %1671 = vmatprep.mubr.f32.mxu1 %v1456_v42 }
 0x133   : > { %v625_v63 = vpop.f32.mrb[9].mxu0  ;;  %5072 = vmatmul.mubr.f32.gmra.mrb[114].mxu0 %v6794_v56  ;;  %v6802_v1 = vadd.f32 %v6738_v8, %v623_v0  ;;  %v6835_v8 = vld [vmem:[#allocation2 + $0x15a] sm:$0xff]  ;;  %v1472_v0 = vld [vmem:[#allocation2 + $0x1a2] sm:$0xff] }
 0x134   : > { %v6804_v2 = vpop.f32.mrb[24].mxu1  ;;  %5074 = vmatprep.mubr.f32.mxu0 %v6798_v61 }
 0x135   : > { %v6809_v6 = vpop.f32.mrb[25].mxu1  ;;  %1672 = vmatmul.mubr.f32.gmra.mrb[130].mxu1 %v1454_v60 }
 0x136   : > { %v628_v9 = vpop.f32.mrb[10].mxu0  ;;  %1676 = vmatprep.mubr.f32.mxu1 %v6773_v47 }
 0x137   : > { %v630_v41 = vpop.f32.mrb[11].mxu0  ;;  %5075 = vmatmul.mubr.f32.gmra.mrb[116].mxu0 %v6807_v62  ;;  %v6816_v4 = vadd.f32 %v6736_v21, %v628_v9 }
 0x138   : > { %v6818_v14 = vpop.f32.mrb[26].mxu1  ;;  %5077 = vmatprep.mubr.f32.mxu0 %v6811_v7 }
 0x139   : > { %v6823_v18 = vpop.f32.mrb[27].mxu1  ;;  %1677 = vmatmul.mubr.f32.gmra.mrb[132].mxu1 %v1455_v38 }
 0x13a   : > { %v633_v5 = vpop.f32.mrb[12].mxu0  ;;  %1681 = vmatprep.mubr.f32.mxu1 %v6781_v50 }
 0x13b   : > { %v635_v24 = vpop.f32.mrb[13].mxu0  ;;  %5078 = vmatmul.mubr.f32.gmra.mrb[118].mxu0 %v6821_v17  ;;  %v6830_v44 = vadd.f32 %v6742_v35, %v633_v5 }
 0x13c   : > { %v6832_v21 = vpop.f32.mrb[28].mxu1  ;;  %5080 = vmatprep.mubr.f32.mxu0 %v6825_v20 }
 0x13d   : > { %v6837_v23 = vpop.f32.mrb[29].mxu1  ;;  %1682 = vmatmul.mubr.f32.gmra.mrb[134].mxu1 %v1456_v42 }
 0x13e   : > { %v638_v13 = vpop.f32.mrb[14].mxu0  ;;  %1686 = vmatprep.mubr.f32.mxu1 %v6785_v45 }
 0x13f   : > { %v640_v16 = vpop.f32.mrb[15].mxu0  ;;  %5081 = vmatmul.mubr.f32.gmra.mrb[120].mxu0 %v6835_v8  ;;  %v6844_v35 = vadd.f32 %v6740_v33, %v638_v13 }
 0x140   : > { %v6846_v22 = vpop.f32.mrb[30].mxu1  ;;  %5083 = vmatprep.mubr.f32.mxu0 %v6839_v10 }
 0x141   : > { %v6851_v51 = vpop.f32.mrb[31].mxu1  ;;  %1687 = vmatmul.mubr.f32.gmra.mrb[136].mxu1 %v6773_v47 }
 0x142   : > { %v643_v60 = vpop.f32.mrb[16].mxu0  ;;  %1691 = vmatprep.mubr.f32.mxu1 %v6794_v56 }
 0x143   : > { %v645_v38 = vpop.f32.mrb[17].mxu0  ;;  %5084 = vmatmul.mubr.f32.gmra.mrb[122].mxu0 %v6849_v30  ;;  %v6859_v33 = vadd.f32 %v6746_v28, %v643_v60 }
 0x144   : > { %v1053_v11 = vpop.f32.mrb[32].mxu1  ;;  %5086 = vmatprep.mubr.f32.mxu0 %v6854_v39 }
 0x145   : > { %v6865_v42 = vadd.f32 %v1053_v11, %v6760_v26  ;;  %v1055_v47 = vpop.f32.mrb[33].mxu1  ;;  %1692 = vmatmul.mubr.f32.gmra.mrb[138].mxu1 %v6781_v50 }
 0x146   : > { %v648_v48 = vpop.f32.mrb[18].mxu0  ;;  %1696 = vmatprep.mubr.f32.mxu1 %v6798_v61 }
 0x147   : > { %v650_v58 = vpop.f32.mrb[19].mxu0  ;;  %5087 = vmatmul.mubr.f32.gmra.mrb[124].mxu0 %v6862_v53  ;;  %v6871_v28 = vadd.f32 %v6744_v12, %v648_v48 }
 0x148   : > { %v1058_v32 = vpop.f32.mrb[34].mxu1  ;;  %5089 = vmatprep.mubr.f32.mxu0 %v1471_v54 }
 0x149   : > { %v6874_v63 = vadd.f32 %v1058_v32, %v6767_v52  ;;  %v1060_v26 = vpop.f32.mrb[35].mxu1  ;;  %1697 = vmatmul.mubr.f32.gmra.mrb[140].mxu1 %v6785_v45 }
 0x14a   : > { %v653_v50 = vpop.f32.mrb[20].mxu0  ;;  %1701 = vmatprep.mubr.f32.mxu1 %v6807_v62 }
 0x14b   : > { %v655_v9 = vpop.f32.mrb[21].mxu0  ;;  %5090 = vmatmul.mubr.f32.gmra.mrb[126].mxu0 %v1472_v0  ;;  %v6879_v41 = vadd.f32 %v6750_v36, %v653_v50 }
 0x14c   : > { %v1063_v5 = vpop.f32.mrb[36].mxu1 }
 0x14d   : > { %v6882_v12 = vadd.f32 %v1063_v5, %v6776_v49  ;;  %v1065_v24 = vpop.f32.mrb[37].mxu1  ;;  %1702 = vmatmul.mubr.f32.gmra.mrb[142].mxu1 %v6794_v56 }
 0x14e   : > { %v658_v52 = vpop.f32.mrb[22].mxu0  ;;  %1706 = vmatprep.mubr.f32.mxu1 %v6811_v7 }
 0x14f   : > { %v660_v13 = vpop.f32.mrb[23].mxu0  ;;  %v6887_v45 = vadd.f32 %v6748_v15, %v658_v52 }
 0x150   : > { %v1068_v16 = vpop.f32.mrb[38].mxu1 }
 0x151   : > { %v6890_v60 = vadd.f32 %v1068_v16, %v6789_v57  ;;  %v1070_v36 = vpop.f32.mrb[39].mxu1  ;;  %1707 = vmatmul.mubr.f32.gmra.mrb[144].mxu1 %v6798_v61 }
 0x152   : > { %v663_v38 = vpop.f32.mrb[24].mxu0  ;;  %1711 = vmatprep.mubr.f32.mxu1 %v6821_v17 }
 0x153   : > { %v665_v49 = vpop.f32.mrb[25].mxu0  ;;  %v6895_v56 = vadd.f32 %v6754_v37, %v663_v38 }
 0x154   : > { %v1073_v11 = vpop.f32.mrb[40].mxu1 }
 0x155   : > { %v6898_v47 = vadd.f32 %v1073_v11, %v6802_v1  ;;  %v1075_v15 = vpop.f32.mrb[41].mxu1  ;;  %1712 = vmatmul.mubr.f32.gmra.mrb[146].mxu1 %v6807_v62 }
 0x156   : > { %v668_v54 = vpop.f32.mrb[26].mxu0  ;;  %1716 = vmatprep.mubr.f32.mxu1 %v6825_v20 }
 0x157   : > { %v670_v57 = vpop.f32.mrb[27].mxu0  ;;  %v894_v61 = vadd.f32 %v6752_v19, %v668_v54 }
 0x158   : > { %v1078_v48 = vpop.f32.mrb[42].mxu1 }
 0x159   : > { %v6904_v58 = vadd.f32 %v1078_v48, %v6816_v4  ;;  %v1080_v32 = vpop.f32.mrb[43].mxu1  ;;  %1717 = vmatmul.mubr.f32.gmra.mrb[148].mxu1 %v6811_v7 }
 0x15a   : > { %v673_v37 = vpop.f32.mrb[28].mxu0  ;;  %1721 = vmatprep.mubr.f32.mxu1 %v6835_v8 }
 0x15b   : > { %v675_v1 = vpop.f32.mrb[29].mxu0  ;;  %v899_v0 = vadd.f32 %v6758_v25, %v673_v37 }
 0x15c   : > { %v1083_v62 = vpop.f32.mrb[44].mxu1 }
 0x15d   : > { %v6910_v26 = vadd.f32 %v1083_v62, %v6830_v44  ;;  %v1085_v50 = vpop.f32.mrb[45].mxu1  ;;  %1722 = vmatmul.mubr.f32.gmra.mrb[150].mxu1 %v6821_v17 }
 0x15e   : > { %v678_v19 = vpop.f32.mrb[30].mxu0  ;;  %1726 = vmatprep.mubr.f32.mxu1 %v6839_v10 }
 0x15f   : > { %v680_v4 = vpop.f32.mrb[31].mxu0  ;;  %v904_v9 = vadd.f32 %v6756_v29, %v678_v19 }
 0x160   : > { %v1088_v7 = vpop.f32.mrb[46].mxu1 }
 0x161   : > { %v6916_v5 = vadd.f32 %v1088_v7, %v6844_v35  ;;  %v1090_v24 = vpop.f32.mrb[47].mxu1  ;;  %1727 = vmatmul.mubr.f32.gmra.mrb[152].mxu1 %v6825_v20 }
 0x162   : > { %v683_v25 = vpop.f32.mrb[32].mxu0  ;;  %1731 = vmatprep.mubr.f32.mxu1 %v6849_v30 }
 0x163   : > { %v909_v44 = vadd.f32 %v6764_v43, %v683_v25  ;;  %v685_v52 = vpop.f32.mrb[33].mxu0 }
 0x164   : > { %v1093_v17 = vpop.f32.mrb[48].mxu1 }
 0x165   : > { %v6922_v13 = vadd.f32 %v1093_v17, %v6859_v33  ;;  %v1095_v16 = vpop.f32.mrb[49].mxu1  ;;  %1732 = vmatmul.mubr.f32.gmra.mrb[154].mxu1 %v6835_v8 }
 0x166   : > { %v688_v29 = vpop.f32.mrb[34].mxu0  ;;  %1736 = vmatprep.mubr.f32.mxu1 %v6854_v39 }
 0x167   : > { %v914_v35 = vadd.f32 %v6762_v40, %v688_v29  ;;  %v690_v36 = vpop.f32.mrb[35].mxu0 }
 0x168   : > { %v1098_v20 = vpop.f32.mrb[50].mxu1 }
 0x169   : > { %v6928_v38 = vadd.f32 %v1098_v20, %v6871_v28  ;;  %v1100_v49 = vpop.f32.mrb[51].mxu1  ;;  %1737 = vmatmul.mubr.f32.gmra.mrb[156].mxu1 %v6839_v10 }
 0x16a   : > { %v693_v43 = vpop.f32.mrb[36].mxu0  ;;  %1741 = vmatprep.mubr.f32.mxu1 %v6862_v53 }
 0x16b   : > { %v919_v33 = vadd.f32 %v6771_v27, %v693_v43  ;;  %v695_v11 = vpop.f32.mrb[37].mxu0 }
 0x16c   : > { %v1103_v8 = vpop.f32.mrb[52].mxu1 }
 0x16d   : > { %v6934_v15 = vadd.f32 %v1103_v8, %v6879_v41  ;;  %v1105_v39 = vpop.f32.mrb[53].mxu1  ;;  %1742 = vmatmul.mubr.f32.gmra.mrb[158].mxu1 %v6849_v30 }
 0x16e   : > { %v698_v40 = vpop.f32.mrb[38].mxu0 }
 0x16f   : > { %v924_v28 = vadd.f32 %v6769_v46, %v698_v40  ;;  %v700_v54 = vpop.f32.mrb[39].mxu0 }
 0x170   : > { %v1108_v57 = vpop.f32.mrb[54].mxu1 }
 0x171   : > { %v6939_v10 = vadd.f32 %v1108_v57, %v6887_v45  ;;  %v1110_v48 = vpop.f32.mrb[55].mxu1 }
 0x172   : > { %v703_v53 = vpop.f32.mrb[40].mxu0 }
 0x173   : > { %v929_v27 = vadd.f32 %v6783_v55, %v703_v53  ;;  %v705_v32 = vpop.f32.mrb[41].mxu0 }
 0x174   : > { %v1113_v37 = vpop.f32.mrb[56].mxu1 }
 0x175   : > { %v6943_v41 = vadd.f32 %v1113_v37, %v6895_v56  ;;  %v1115_v1 = vpop.f32.mrb[57].mxu1 }
 0x176   : > { %v708_v62 = vpop.f32.mrb[42].mxu0 }
 0x177   : > { %v934_v30 = vadd.f32 %v6778_v31, %v708_v62  ;;  %v710_v50 = vpop.f32.mrb[43].mxu0 }
 0x178   : > { %v1118_v46 = vpop.f32.mrb[58].mxu1 }
 0x179   : > { %v6946_v19 = vadd.f32 %v1118_v46, %v894_v61  ;;  %v1120_v4 = vpop.f32.mrb[59].mxu1 }
 0x17a   : > { %v713_v45 = vpop.f32.mrb[44].mxu0 }
 0x17b   : > { %v939_v7 = vadd.f32 %v6796_v34, %v713_v45  ;;  %v715_v24 = vpop.f32.mrb[45].mxu0 }
 0x17c   : > { %v1123_v25 = vpop.f32.mrb[60].mxu1 }
 0x17d   : > { %v6949_v55 = vadd.f32 %v1123_v25, %v899_v0  ;;  %v1125_v52 = vpop.f32.mrb[61].mxu1 }
 0x17e   : > { %v718_v17 = vpop.f32.mrb[46].mxu0 }
 0x17f   : > { %v944_v56 = vadd.f32 %v6791_v59, %v718_v17  ;;  %v720_v16 = vpop.f32.mrb[47].mxu0 }
 0x180   : > { %v1128_v29 = vpop.f32.mrb[62].mxu1 }
 0x181   : > { %v6952_v36 = vadd.f32 %v1128_v29, %v904_v9  ;;  %v1130_v31 = vpop.f32.mrb[63].mxu1 }
 0x182   : > { %v723_v20 = vpop.f32.mrb[48].mxu0 }
 0x183   : > { %v949_v61 = vadd.f32 %v6809_v6, %v723_v20  ;;  %v725_v49 = vpop.f32.mrb[49].mxu0 }
 0x184   : > { %v1133_v43 = vpop.f32.mrb[64].mxu1 }
 0x185   : > { %v6955_v11 = vadd.f32 %v1133_v43, %v909_v44  ;;  %v1135_v34 = vpop.f32.mrb[65].mxu1 }
 0x186   : > { %v728_v8 = vpop.f32.mrb[50].mxu0 }
 0x187   : > { %v954_v0 = vadd.f32 %v6804_v2, %v728_v8  ;;  %v730_v39 = vpop.f32.mrb[51].mxu0 }
 0x188   : > { %v1138_v40 = vpop.f32.mrb[66].mxu1 }
 0x189   : > { %v6958_v54 = vadd.f32 %v1138_v40, %v914_v35  ;;  %v1140_v59 = vpop.f32.mrb[67].mxu1 }
 0x18a   : > { %v733_v57 = vpop.f32.mrb[52].mxu0 }
 0x18b   : > { %v959_v9 = vadd.f32 %v6823_v18, %v733_v57  ;;  %v735_v48 = vpop.f32.mrb[53].mxu0 }
 0x18c   : > { %v1143_v53 = vpop.f32.mrb[68].mxu1 }
 0x18d   : > { %v6961_v32 = vadd.f32 %v1143_v53, %v919_v33  ;;  %v1145_v6 = vpop.f32.mrb[69].mxu1 }
 0x18e   : > { %v738_v37 = vpop.f32.mrb[54].mxu0 }
 0x18f   : > { %v964_v44 = vadd.f32 %v6818_v14, %v738_v37  ;;  %v740_v1 = vpop.f32.mrb[55].mxu0 }
 0x190   : > { %v1148_v62 = vpop.f32.mrb[70].mxu1 }
 0x191   : > { %v6964_v50 = vadd.f32 %v1148_v62, %v924_v28  ;;  %v1150_v2 = vpop.f32.mrb[71].mxu1 }
 0x192   : > { %v743_v46 = vpop.f32.mrb[56].mxu0 }
 0x193   : > { %v969_v35 = vadd.f32 %v6837_v23, %v743_v46  ;;  %v745_v4 = vpop.f32.mrb[57].mxu0 }
 0x194   : > { %v1153_v45 = vpop.f32.mrb[72].mxu1 }
 0x195   : > { %v6967_v24 = vadd.f32 %v1153_v45, %v929_v27  ;;  %v1155_v18 = vpop.f32.mrb[73].mxu1 }
 0x196   : > { %v748_v25 = vpop.f32.mrb[58].mxu0 }
 0x197   : > { %v974_v33 = vadd.f32 %v6832_v21, %v748_v25  ;;  %v750_v52 = vpop.f32.mrb[59].mxu0 }
 0x198   : > { %v1158_v17 = vpop.f32.mrb[74].mxu1 }
 0x199   : > { %v6970_v16 = vadd.f32 %v1158_v17, %v934_v30  ;;  %v1160_v14 = vpop.f32.mrb[75].mxu1 }
 0x19a   : > { %v753_v29 = vpop.f32.mrb[60].mxu0 }
 0x19b   : > { %v979_v28 = vadd.f32 %v6851_v51, %v753_v29  ;;  %v755_v31 = vpop.f32.mrb[61].mxu0 }
 0x19c   : > { %v1163_v20 = vpop.f32.mrb[76].mxu1 }
 0x19d   : > { %v6973_v49 = vadd.f32 %v1163_v20, %v939_v7  ;;  %v1165_v23 = vpop.f32.mrb[77].mxu1 }
 0x19e   : > { %v758_v43 = vpop.f32.mrb[62].mxu0 }
 0x19f   : > { %v984_v27 = vadd.f32 %v6846_v22, %v758_v43  ;;  %v760_v34 = vpop.f32.mrb[63].mxu0 }
 0x1a0   : > { %v1168_v8 = vpop.f32.mrb[78].mxu1 }
 0x1a1   : > { %v6976_v39 = vadd.f32 %v1168_v8, %v944_v56  ;;  %v1170_v21 = vpop.f32.mrb[79].mxu1 }
 0x1a2   : > { %v4966_v40 = vpop.f32.mrb[64].mxu0 }
 0x1a3   : > { %v6979_v30 = vadd.f32 %v4966_v40, %v6874_v63  ;;  %v1278_v59 = vpop.f32.mrb[65].mxu0 }
 0x1a4   : > { %v1173_v57 = vpop.f32.mrb[80].mxu1  ;;  %v6982_v51 = vadd.f32 %v1278_v59, %v6865_v42 }
 0x1a5   : > { %v6984_v7 = vadd.f32 %v1173_v57, %v949_v61  ;;  %v1175_v48 = vpop.f32.mrb[81].mxu1 }
 0x1a6   : > { %v4969_v53 = vpop.f32.mrb[66].mxu0 }
 0x1a7   : > { %v6987_v22 = vadd.f32 %v4969_v53, %v6890_v60  ;;  %v1288_v6 = vpop.f32.mrb[67].mxu0 }
 0x1a8   : > { %v1178_v56 = vpop.f32.mrb[82].mxu1  ;;  %v6990_v37 = vadd.f32 %v1288_v6, %v6882_v12 }
 0x1a9   : > { %v6992_v1 = vadd.f32 %v1178_v56, %v954_v0  ;;  %v1180_v63 = vpop.f32.mrb[83].mxu1 }
 0x1aa   : > { %v4972_v62 = vpop.f32.mrb[68].mxu0 }
 0x1ab   : > { %v6995_v2 = vadd.f32 %v4972_v62, %v6904_v58  ;;  %v1298_v42 = vpop.f32.mrb[69].mxu0 }
 0x1ac   : > { %v1183_v61 = vpop.f32.mrb[84].mxu1  ;;  %v6998_v46 = vadd.f32 %v1298_v42, %v6898_v47 }
 0x1ad   : > { %v7000_v4 = vadd.f32 %v1183_v61, %v959_v9  ;;  %v1185_v60 = vpop.f32.mrb[85].mxu1 }
 0x1ae   : > { %v4975_v45 = vpop.f32.mrb[70].mxu0 }
 0x1af   : > { %v7003_v18 = vadd.f32 %v4975_v45, %v6916_v5  ;;  %v1308_v12 = vpop.f32.mrb[71].mxu0 }
 0x1b0   : > { %v1188_v0 = vpop.f32.mrb[86].mxu1  ;;  %v7006_v25 = vadd.f32 %v1308_v12, %v6910_v26 }
 0x1b1   : > { %v1189_v52 = vadd.f32 %v1188_v0, %v964_v44  ;;  %v1190_v58 = vpop.f32.mrb[87].mxu1 }
 0x1b2   : > { %v4978_v17 = vpop.f32.mrb[72].mxu0 }
 0x1b3   : > { %v7009_v14 = vadd.f32 %v4978_v17, %v6928_v38  ;;  %v1318_v47 = vpop.f32.mrb[73].mxu0 }
 0x1b4   : > { %v1193_v29 = vpop.f32.mrb[88].mxu1  ;;  %v7012_v9 = vadd.f32 %v1318_v47, %v6922_v13 }
 0x1b5   : > { %v1194_v31 = vadd.f32 %v1193_v29, %v969_v35  ;;  %v1195_v20 = vpop.f32.mrb[89].mxu1 }
 0x1b6   : > { %v4981_v5 = vpop.f32.mrb[74].mxu0 }
 0x1b7   : > { %v7015_v23 = vadd.f32 %v4981_v5, %v6939_v10  ;;  %v1328_v43 = vpop.f32.mrb[75].mxu0 }
 0x1b8   : > { %v1198_v26 = vpop.f32.mrb[90].mxu1  ;;  %v7018_v44 = vadd.f32 %v1328_v43, %v6934_v15 }
 0x1b9   : > { %v1199_v34 = vadd.f32 %v1198_v26, %v974_v33  ;;  %v1200_v8 = vpop.f32.mrb[91].mxu1 }
 0x1ba   : > { %v4984_v38 = vpop.f32.mrb[76].mxu0 }
 0x1bb   : > { %v7021_v21 = vadd.f32 %v4984_v38, %v6946_v19  ;;  %v1338_v40 = vpop.f32.mrb[77].mxu0 }
 0x1bc   : > { %v1203_v13 = vpop.f32.mrb[92].mxu1  ;;  %v7024_v35 = vadd.f32 %v1338_v40, %v6943_v41 }
 0x1bd   : > { %v1204_v59 = vadd.f32 %v1203_v13, %v979_v28  ;;  %v1205_v57 = vpop.f32.mrb[93].mxu1 }
 0x1be   : > { %v4987_v10 = vpop.f32.mrb[78].mxu0 }
 0x1bf   : > { %v7027_v48 = vadd.f32 %v4987_v10, %v6952_v36  ;;  %v1348_v53 = vpop.f32.mrb[79].mxu0 }
 0x1c0   : > { %v1208_v15 = vpop.f32.mrb[94].mxu1  ;;  %v7030_v33 = vadd.f32 %v1348_v53, %v6949_v55 }
 0x1c1   : > { %v1209_v6 = vadd.f32 %v1208_v15, %v984_v27  ;;  %v1210_v56 = vpop.f32.mrb[95].mxu1 }
 0x1c2   : > { %v4990_v19 = vpop.f32.mrb[80].mxu0 }
 0x1c3   : > { %v7033_v63 = vadd.f32 %v4990_v19, %v6958_v54  ;;  %v1358_v62 = vpop.f32.mrb[81].mxu0 }
 0x1c4   : > { %v7036_v41 = vadd.f32 %v1358_v62, %v6955_v11  ;;  %v1588_v28 = vpop.f32.mrb[96].mxu1 }
 0x1c5   : > { %v1590_v42 = vpop.f32.mrb[97].mxu1 }
 0x1c6   : > { %v4993_v61 = vpop.f32.mrb[82].mxu0 }
 0x1c7   : > { %v7039_v36 = vadd.f32 %v4993_v61, %v6964_v50  ;;  %v1368_v60 = vpop.f32.mrb[83].mxu0 }
 0x1c8   : > { %v7042_v55 = vadd.f32 %v1368_v60, %v6961_v32  ;;  %v1593_v27 = vpop.f32.mrb[98].mxu1 }
 0x1c9   : > { %v1595_v45 = vpop.f32.mrb[99].mxu1 }
 0x1ca   : > { %v4996_v12 = vpop.f32.mrb[84].mxu0 }
 0x1cb   : > { %v7045_v54 = vadd.f32 %v4996_v12, %v6970_v16  ;;  %v1378_v0 = vpop.f32.mrb[85].mxu0 }
 0x1cc   : > { %v7048_v11 = vadd.f32 %v1378_v0, %v6967_v24  ;;  %v1598_v58 = vpop.f32.mrb[100].mxu1 }
 0x1cd   : > { %v1600_v17 = vpop.f32.mrb[101].mxu1 }
 0x1ce   : > { %v4999_v47 = vpop.f32.mrb[86].mxu0 }
 0x1cf   : > { %v7051_v50 = vadd.f32 %v4999_v47, %v6976_v39  ;;  %v1388_v29 = vpop.f32.mrb[87].mxu0 }
 0x1d0   : > { %v7054_v32 = vadd.f32 %v1388_v29, %v6973_v49  ;;  %v1603_v20 = vpop.f32.mrb[102].mxu1 }
 0x1d1   : > { %v1605_v5 = vpop.f32.mrb[103].mxu1 }
 0x1d2   : > { %v5002_v43 = vpop.f32.mrb[88].mxu0 }
 0x1d3   : > { %v7057_v16 = vadd.f32 %v5002_v43, %v6992_v1  ;;  %v1398_v26 = vpop.f32.mrb[89].mxu0 }
 0x1d4   : > { %v7060_v24 = vadd.f32 %v1398_v26, %v6984_v7  ;;  %v1608_v8 = vpop.f32.mrb[104].mxu1 }
 0x1d5   : > { %v1610_v38 = vpop.f32.mrb[105].mxu1 }
 0x1d6   : > { %v5005_v40 = vpop.f32.mrb[90].mxu0 }
 0x1d7   : > { %v7062_v13 = vadd.f32 %v5005_v40, %v1189_v52  ;;  %v1408_v39 = vpop.f32.mrb[91].mxu0 }
 0x1d8   : > { %v7065_v57 = vadd.f32 %v1408_v39, %v7000_v4  ;;  %v1613_v49 = vpop.f32.mrb[106].mxu1 }
 0x1d9   : > { %v1615_v10 = vpop.f32.mrb[107].mxu1 }
 0x1da   : > { %v5008_v53 = vpop.f32.mrb[92].mxu0 }
 0x1db   : > { %v7067_v15 = vadd.f32 %v5008_v53, %v1199_v34  ;;  %v1418_v1 = vpop.f32.mrb[93].mxu0 }
 0x1dc   : > { %v7069_v56 = vadd.f32 %v1418_v1, %v1194_v31  ;;  %v1618_v19 = vpop.f32.mrb[108].mxu1  ;;  %v7078_v31 = vld [vmem:[%s9212_s2] ss:$0 sm:$0xff] }
 0x1dd   : > { %v1620_v7 = vpop.f32.mrb[109].mxu1 }
 0x1de   : > { %v5011_v62 = vpop.f32.mrb[94].mxu0 }
 0x1df   : > { %v7071_v42 = vadd.f32 %v5011_v62, %v1209_v6  ;;  %v1428_v61 = vpop.f32.mrb[95].mxu0 }
 0x1e0   : > { %v7073_v52 = vadd.f32 %v1428_v61, %v1204_v59  ;;  %v1623_v60 = vpop.f32.mrb[110].mxu1 }
 0x1e1   : > { %v1625_v45 = vpop.f32.mrb[111].mxu1 }
 0x1e2   : > { %v5046_v4 = vpop.f32.mrb[96].mxu0 }
 0x1e3   : > { %v1819_v12 = vadd.f32 %v5046_v4, %v1593_v27  ;;  %v1813_v0 = vpop.f32.mrb[97].mxu0 }
 0x1e4   : > { %v1628_v17 = vpop.f32.mrb[112].mxu1  ;;  %v1814_v47 = vadd.f32 %v1813_v0, %v1588_v28 }
 0x1e5   : > { %v1973_v34 = vadd.f32 %v1819_v12, %v6979_v30  ;;  %v1630_v29 = vpop.f32.mrb[113].mxu1 }
 0x1e6   : > { %v1972_v6 = vadd.f32 %v1814_v47, %v6982_v51  ;;  %v5049_v5 = vpop.f32.mrb[98].mxu0 }
 0x1e7   : > { %v1829_v59 = vadd.f32 %v5049_v5, %v1603_v20  ;;  %v1823_v43 = vpop.f32.mrb[99].mxu0  ;;  %v7083_v26 = vadd.f32 %v7078_v31, %v1973_v34 }
 0x1e8   : > { %v7086_v27 = vadd.f32 %v7078_v31, %v1972_v6  ;;  %v1633_v28 = vpop.f32.mrb[114].mxu1  ;;  %v1824_v38 = vadd.f32 %v1823_v43, %v1598_v58 }
 0x1e9   : > { %v1975_v40 = vadd.f32 %v1829_v59, %v6987_v22  ;;  %v1635_v39 = vpop.f32.mrb[115].mxu1 }
 0x1ea   : > { %v1974_v10 = vadd.f32 %v1824_v38, %v6990_v37  ;;  %v5052_v30 = vpop.f32.mrb[100].mxu0  ;;  %v2042_v51 = vadd.f32 %v7083_v26, %v7086_v27 }
 0x1eb   : > { %v1839_v53 = vadd.f32 %v5052_v30, %v1613_v49  ;;  %v1833_v1 = vpop.f32.mrb[101].mxu0  ;;  %v7097_v58 = vadd.f32 %v7078_v31, %v1975_v40 }
 0x1ec   : > { %v7093_v20 = vadd.f32 %v7078_v31, %v1974_v10  ;;  %v1638_v7 = vpop.f32.mrb[116].mxu1  ;;  %v1834_v62 = vadd.f32 %v1833_v1, %v1608_v8 }
 0x1ed   : > { %v1977_v61 = vadd.f32 %v1839_v53, %v6995_v2  ;;  %v1640_v45 = vpop.f32.mrb[117].mxu1 }
 0x1ee   : > { %v2043_v22 = vadd.f32 %v2042_v51, %v7093_v20  ;;  %v1976_v37 = vadd.f32 %v1834_v62, %v6998_v46  ;;  %v5055_v49 = vpop.f32.mrb[102].mxu0 }
 0x1ef   : > { %v1849_v4 = vadd.f32 %v5055_v49, %v1623_v60  ;;  %v1843_v12 = vpop.f32.mrb[103].mxu0  ;;  %v7107_v6 = vadd.f32 %v7078_v31, %v1977_v61 }
 0x1f0   : > { %v7102_v0 = vadd.f32 %v7078_v31, %v1976_v37  ;;  %v2044_v47 = vadd.f32 %v2043_v22, %v7097_v58  ;;  %v1643_v34 = vpop.f32.mrb[118].mxu1  ;;  %v1844_v8 = vadd.f32 %v1843_v12, %v1618_v19 }
 0x1f1   : > { %v1979_v2 = vadd.f32 %v1849_v4, %v7003_v18  ;;  %v1645_v29 = vpop.f32.mrb[119].mxu1 }
 0x1f2   : > { %v2045_v5 = vadd.f32 %v2044_v47, %v7102_v0  ;;  %v1978_v46 = vadd.f32 %v1844_v8, %v7006_v25  ;;  %v5058_v59 = vpop.f32.mrb[104].mxu0 }
 0x1f3   : > { %v1859_v60 = vadd.f32 %v5058_v59, %v1633_v28  ;;  %v1853_v43 = vpop.f32.mrb[105].mxu0  ;;  %v7117_v30 = vadd.f32 %v7078_v31, %v1979_v2 }
 0x1f4   : > { %v7112_v38 = vadd.f32 %v7078_v31, %v1978_v46  ;;  %v2046_v40 = vadd.f32 %v2045_v5, %v7107_v6  ;;  %v1648_v39 = vpop.f32.mrb[120].mxu1  ;;  %v1854_v19 = vadd.f32 %v1853_v43, %v1628_v17 }
 0x1f5   : > { %v1981_v18 = vadd.f32 %v1859_v60, %v7009_v14  ;;  %v1650_v10 = vpop.f32.mrb[121].mxu1 }
 0x1f6   : > { %v2047_v53 = vadd.f32 %v2046_v40, %v7112_v38  ;;  %v1980_v25 = vadd.f32 %v1854_v19, %v7012_v9  ;;  %v5061_v1 = vpop.f32.mrb[106].mxu0 }
 0x1f7   : > { %v1869_v28 = vadd.f32 %v5061_v1, %v1643_v34  ;;  %v1863_v51 = vpop.f32.mrb[107].mxu0  ;;  %v7127_v37 = vadd.f32 %v7078_v31, %v1981_v18 }
 0x1f8   : > { %v7122_v62 = vadd.f32 %v7078_v31, %v1980_v25  ;;  %v2048_v61 = vadd.f32 %v2047_v53, %v7117_v30  ;;  %v1653_v45 = vpop.f32.mrb[122].mxu1  ;;  %v1864_v17 = vadd.f32 %v1863_v51, %v1638_v7 }
 0x1f9   : > { %v1983_v14 = vadd.f32 %v1869_v28, %v7015_v23  ;;  %v1655_v22 = vpop.f32.mrb[123].mxu1 }
 0x1fa   : > { %v2049_v49 = vadd.f32 %v2048_v61, %v7122_v62  ;;  %v1982_v9 = vadd.f32 %v1864_v17, %v7018_v44  ;;  %v5064_v4 = vpop.f32.mrb[108].mxu0 }
 0x1fb   : > { %v1879_v12 = vadd.f32 %v5064_v4, %v1653_v45  ;;  %v1873_v47 = vpop.f32.mrb[109].mxu0  ;;  %v7139_v40 = vadd.f32 %v7078_v31, %v1983_v14 }
 0x1fc   : > { %v7132_v34 = vadd.f32 %v7078_v31, %v1982_v9  ;;  %v2050_v8 = vadd.f32 %v2049_v49, %v7127_v37  ;;  %v1658_v2 = vpop.f32.mrb[124].mxu1  ;;  %v1874_v7 = vadd.f32 %v1873_v47, %v1648_v39 }
 0x1fd   : > { %v1985_v23 = vadd.f32 %v1879_v12, %v7021_v21  ;;  %v1660_v29 = vpop.f32.mrb[125].mxu1 }
 0x1fe   : > { %v1984_v5 = vadd.f32 %v1874_v7, %v7024_v35  ;;  %v5067_v46 = vpop.f32.mrb[110].mxu0  ;;  %v2051_v59 = vadd.f32 %v2050_v8, %v7132_v34 }
 0x1ff   : > { %v1883_v60 = vpop.f32.mrb[111].mxu0 }
 0x200   : > { %v1663_v44 = vpop.f32.mrb[126].mxu1  ;;  %v1884_v43 = vadd.f32 %v1883_v60, %v1658_v2  ;;  %v7143_v39 = vadd.f32 %v7078_v31, %v1984_v5  ;;  %v2052_v21 = vadd.f32 %v2051_v59, %v7139_v40  ;;  %v4463_v60 = vld [vmem:[%s9213_s3 + $0x180] sm:$0xff] }
 0x201   : > { %v1889_v19 = vadd.f32 %v5067_v46, %v1663_v44  ;;  %v1665_v18 = vpop.f32.mrb[127].mxu1 }
 0x202   : > { %v1986_v10 = vadd.f32 %v1884_v43, %v7030_v33  ;;  %v5070_v53 = vpop.f32.mrb[112].mxu0  ;;  %v2053_v45 = vadd.f32 %v2052_v21, %v7143_v39  ;;  %v7150_v33 = vadd.f32 %v7078_v31, %v1985_v23 }
 0x203   : > { %v1987_v35 = vadd.f32 %v1889_v19, %v7027_v48  ;;  %v1893_v25 = vpop.f32.mrb[113].mxu0 }
 0x204   : > { %v1668_v1 = vpop.f32.mrb[128].mxu1  ;;  %v7153_v12 = vadd.f32 %v7078_v31, %v1986_v10  ;;  %v2054_v48 = vadd.f32 %v2053_v45, %v7150_v33 }
 0x205   : > { %v1894_v28 = vadd.f32 %v1893_v25, %v1668_v1  ;;  %v1670_v51 = vpop.f32.mrb[129].mxu1  ;;  %v7168_v44 = vadd.f32 %v7078_v31, %v1987_v35  ;;  %v4465_v35 = vld [vmem:[%s9213_s3 + $0x190] sm:$0xff] }
 0x206   : > { %v5073_v61 = vpop.f32.mrb[114].mxu0  ;;  %v2055_v5 = vadd.f32 %v2054_v48, %v7153_v12 }
 0x207   : > { %v1988_v17 = vadd.f32 %v1894_v28, %v7036_v41  ;;  %v1903_v14 = vpop.f32.mrb[115].mxu0  ;;  %v4466_v28 = vld [vmem:[%s9213_s3 + $0x198] sm:$0xff] }
 0x208   : > { %v1673_v22 = vpop.f32.mrb[130].mxu1 }
 0x209   : > { %v1899_v49 = vadd.f32 %v5070_v53, %v1673_v22  ;;  %v1675_v9 = vpop.f32.mrb[131].mxu1  ;;  %v2056_v53 = vadd.f32 %v2055_v5, %v7168_v44 }
 0x20a   : > { %v5076_v4 = vpop.f32.mrb[116].mxu0 }
 0x20b   : > { %v1989_v47 = vadd.f32 %v1899_v49, %v7033_v63  ;;  %v1913_v8 = vpop.f32.mrb[117].mxu0  ;;  %v4464_v63 = vld [vmem:[%s9213_s3 + $0x188] sm:$0xff] }
 0x20c   : > { %v1678_v2 = vpop.f32.mrb[132].mxu1  ;;  %v5573_v18 = vpack.c.bf16 %v4464_v63, %v4463_v60 }
 0x20d   : > { %v1904_v7 = vadd.f32 %v1903_v14, %v1678_v2  ;;  %v1680_v29 = vpop.f32.mrb[133].mxu1  ;;  %v7185_v51 = vadd.f32 %v7078_v31, %v1989_v47  ;;  %v4467_v47 = vld [vmem:[%s9213_s3 + $0x1a0] sm:$0xff] }
 0x20e   : > { %v7157_v41 = vpop.f32.mrb[118].mxu0  ;;  %5574 = vmatpush1.bf16.msra.mxu0 %v5573_v18  ;;  %v4470_v18 = vld [vmem:[%s9213_s3 + $0x1b8] sm:$0xff] }
 0x20f   : > { %v1990_v23 = vadd.f32 %v1904_v7, %v7042_v55  ;;  %v1923_v46 = vpop.f32.mrb[119].mxu0  ;;  %v7173_v55 = vadd.f32 %v7078_v31, %v1988_v17  ;;  %5575 = vmatprep.subr.bf16.mxu0 %v5833_v3  ;;  %v5576_v17 = vpack.c.bf16 %v4466_v28, %v4465_v35 }
 0x210   : > { %v1683_v59 = vpop.f32.mrb[134].mxu1 }
 0x211   : > { %v1909_v43 = vadd.f32 %v5073_v61, %v1683_v59  ;;  %v1685_v19 = vpop.f32.mrb[135].mxu1  ;;  %v2057_v14 = vadd.f32 %v2056_v53, %v7173_v55  ;;  %v7191_v22 = vadd.f32 %v7078_v31, %v1990_v23 }
 0x212   : > { %v7170_v10 = vpop.f32.mrb[120].mxu0  ;;  %5577 = vmatpush1.bf16.msra.mxu0 %v5576_v17 }
 0x213   : > { %v1991_v21 = vadd.f32 %v1909_v43, %v7039_v36  ;;  %v1933_v25 = vpop.f32.mrb[121].mxu0  ;;  %5578 = vmatprep.subr.bf16.mxu0 %v5833_v3  ;;  %v2058_v2 = vadd.f32 %v2057_v14, %v7185_v51 }
 0x214   : > { %v1688_v1 = vpop.f32.mrb[136].mxu1 }
 0x215   : > { %v1914_v61 = vadd.f32 %v1913_v8, %v1688_v1  ;;  %v1690_v45 = vpop.f32.mrb[137].mxu1  ;;  %v4468_v8 = vld [vmem:[%s9213_s3 + $0x1a8] sm:$0xff]  ;;  %v7205_v7 = vadd.f32 %v7078_v31, %v1991_v21  ;;  %v2059_v59 = vadd.f32 %v2058_v2, %v7191_v22 }
 0x216   : > { %v7187_v36 = vpop.f32.mrb[122].mxu0  ;;  %v5579_v5 = vpack.c.bf16 %v4468_v8, %v4467_v47 }
 0x217   : > { %v1992_v49 = vadd.f32 %v1914_v61, %v7048_v11  ;;  %v7194_v9 = vpop.f32.mrb[123].mxu0  ;;  %v2060_v53 = vadd.f32 %v2059_v59, %v7205_v7  ;;  %v4473_v59 = vld [vmem:[%s9213_s3 + $0x1d0] sm:$0xff] }
 0x218   : > { %v1693_v48 = vpop.f32.mrb[138].mxu1  ;;  %5580 = vmatpush1.bf16.msra.mxu0 %v5579_v5 }
 0x219   : > { %v1919_v11 = vadd.f32 %v5076_v4, %v1693_v48  ;;  %v1695_v29 = vpop.f32.mrb[139].mxu1  ;;  %v7211_v60 = vadd.f32 %v7078_v31, %v1992_v49  ;;  %5581 = vmatprep.subr.bf16.mxu0 %v5833_v3  ;;  %v4469_v4 = vld [vmem:[%s9213_s3 + $0x1b0] sm:$0xff]  ;;  %v4471_v49 = vld [vmem:[%s9213_s3 + $0x1c0] sm:$0xff] }
 0x21a   : > { %v7207_v23 = vpop.f32.mrb[124].mxu0  ;;  %v5582_v35 = vpack.c.bf16 %v4470_v18, %v4469_v4 }
 0x21b   : > { %v1993_v63 = vadd.f32 %v1919_v11, %v7045_v54  ;;  %v7214_v43 = vpop.f32.mrb[125].mxu0  ;;  %v2061_v61 = vadd.f32 %v2060_v53, %v7211_v60 }
 0x21c   : > { %v1698_v19 = vpop.f32.mrb[140].mxu1  ;;  %5583 = vmatpush1.bf16.msra.mxu0 %v5582_v35  ;;  %v4476_v35 = vld [vmem:[%s9213_s3 + $0x1e8] sm:$0xff] }
 0x21d   : > { %v7225_v21 = vadd.f32 %v7078_v31, %v1993_v63  ;;  %v1924_v54 = vadd.f32 %v1923_v46, %v1698_v19  ;;  %v1700_v1 = vpop.f32.mrb[141].mxu1  ;;  %5584 = vmatprep.subr.bf16.mxu0 %v5833_v3  ;;  %v4472_v46 = vld [vmem:[%s9213_s3 + $0x1c8] sm:$0xff]  ;;  %v4474_v63 = vld [vmem:[%s9213_s3 + $0x1d8] sm:$0xff] }
 0x21e   : > { %v7227_v28 = vpop.f32.mrb[126].mxu0  ;;  %v5585_v2 = vpack.c.bf16 %v4472_v46, %v4471_v49  ;;  %v5588_v18 = vpack.c.bf16 %v4474_v63, %v4473_v59  ;;  %v4475_v1 = vld [vmem:[%s9213_s3 + $0x1e0] sm:$0xff]  ;;  %v4496_v59 = vld [vmem:[%s9213_s3 + $0x288] sm:$0xff] }
 0x21f   : > { %v1994_v45 = vadd.f32 %v1924_v54, %v7054_v32  ;;  %v7231_v17 = vpop.f32.mrb[127].mxu0  ;;  %v2062_v48 = vadd.f32 %v2061_v61, %v7225_v21 }
 0x220   : > { %v1703_v14 = vpop.f32.mrb[142].mxu1  ;;  %5586 = vmatpush1.bf16.msra.mxu0 %v5585_v2 }
 0x221   : > { %v7242_v47 = vadd.f32 %v7078_v31, %v1994_v45  ;;  %v1929_v32 = vadd.f32 %v7157_v41, %v1703_v14  ;;  %v1705_v8 = vpop.f32.mrb[143].mxu1  ;;  %5587 = vmatprep.subr.bf16.mxu0 %v5833_v3  ;;  %v5591_v14 = vpack.c.bf16 %v4476_v35, %v4475_v1  ;;  %v4497_v35 = vld [vmem:[%s9213_s3 + $0x290] sm:$0xff] }
 0x223   : > { %v2063_v11 = vadd.f32 %v2062_v48, %v7242_v47  ;;  %v1995_v29 = vadd.f32 %v1929_v32, %v7051_v50  ;;  %v4477_v48 = vld [vmem:[%s9213_s3 + $0x1f0] sm:$0xff]  ;;  %v4478_v32 = vld [vmem:[%s9213_s3 + $0x1f8] sm:$0xff] }
 0x224   : > { %v1708_v5 = vpop.f32.mrb[144].mxu1  ;;  %5589 = vmatpush1.bf16.msra.mxu0 %v5588_v18 }
 0x225   : > { %v7255_v41 = vadd.f32 %v7078_v31, %v1995_v29  ;;  %v1934_v19 = vadd.f32 %v1933_v25, %v1708_v5  ;;  %v1710_v4 = vpop.f32.mrb[145].mxu1  ;;  %5590 = vmatprep.subr.bf16.mxu0 %v5833_v3  ;;  %v4495_v5 = vld [vmem:[%s9213_s3 + $0x280] sm:$0xff] }
 0x227   : > { %v2064_v50 = vadd.f32 %v2063_v11, %v7255_v41  ;;  %v1996_v53 = vadd.f32 %v1934_v19, %v7060_v24  ;;  %v5594_v11 = vpack.c.bf16 %v4478_v32, %v4477_v48  ;;  %v5620_v19 = vpack.c.bf16 %v4496_v59, %v4495_v5 }
 0x228   : > { %v1713_v54 = vpop.f32.mrb[146].mxu1  ;;  %5592 = vmatpush1.bf16.msra.mxu0 %v5591_v14 }
 0x229   : > { %v7267_v25 = vadd.f32 %v7078_v31, %v1996_v53  ;;  %v1939_v61 = vadd.f32 %v7170_v10, %v1713_v54  ;;  %v1715_v45 = vpop.f32.mrb[147].mxu1  ;;  %5593 = vmatprep.subr.bf16.mxu0 %v5833_v3  ;;  %5621 = vmatprep.subr.bf16.mxu1 %v5620_v19 }
 0x22a   : > { %5623 = vmatpush3.bf16.msra.mxu1 %v5620_v19 }
 0x22b   : > { %v2065_v24 = vadd.f32 %v2064_v50, %v7267_v25  ;;  %v1997_v49 = vadd.f32 %v1939_v61, %v7057_v16  ;;  %v4498_v61 = vld [vmem:[%s9213_s3 + $0x298] sm:$0xff] }
 0x22c   : > { %v1718_v46 = vpop.f32.mrb[148].mxu1  ;;  %5595 = vmatpush1.bf16.msra.mxu0 %v5594_v11  ;;  %v5624_v14 = vpack.c.bf16 %v4498_v61, %v4497_v35  ;;  %v4500_v11 = vld [vmem:[%s9213_s3 + $0x2a8] sm:$0xff] }
 0x22d   : > { %v7280_v10 = vadd.f32 %v7078_v31, %v1997_v49  ;;  %v1944_v8 = vadd.f32 %v7194_v9, %v1718_v46  ;;  %v1720_v2 = vpop.f32.mrb[149].mxu1  ;;  %5596 = vmatprep.subr.bf16.mxu0 %v5833_v3  ;;  %v4479_v9 = vld [vmem:[%s9213_s3 + $0x200] sm:$0xff] }
 0x22e   : > { %5625 = vmatprep.subr.bf16.mxu1 %v5624_v14  ;;  %v4499_v2 = vld [vmem:[%s9213_s3 + $0x2a0] sm:$0xff] }
 0x22f   : > { %v2066_v16 = vadd.f32 %v2065_v24, %v7280_v10  ;;  %v1998_v29 = vadd.f32 %v1944_v8, %v7065_v57  ;;  %v4480_v57 = vld [vmem:[%s9213_s3 + $0x208] sm:$0xff]  ;;  %5627 = vmatpush3.bf16.msra.mxu1 %v5624_v14 }
 0x230   : > { %v1723_v63 = vpop.f32.mrb[150].mxu1  ;;  %v5597_v53 = vpack.c.bf16 %v4480_v57, %v4479_v9 }
 0x231   : > { %v7299_v4 = vadd.f32 %v7078_v31, %v1998_v29  ;;  %v1949_v18 = vadd.f32 %v7187_v36, %v1723_v63  ;;  %v1725_v50 = vpop.f32.mrb[151].mxu1  ;;  %v4481_v36 = vld [vmem:[%s9213_s3 + $0x210] sm:$0xff]  ;;  %v5628_v29 = vpack.c.bf16 %v4500_v11, %v4499_v2 }
 0x232   : > { %5598 = vmatpush1.bf16.msra.mxu0 %v5597_v53  ;;  %v4502_v50 = vld [vmem:[%s9213_s3 + $0x2b8] sm:$0xff] }
 0x233   : > { %v2067_v54 = vadd.f32 %v2066_v16, %v7299_v4  ;;  %v1999_v1 = vadd.f32 %v1949_v18, %v7062_v13  ;;  %5599 = vmatprep.subr.bf16.mxu0 %v5833_v3  ;;  %v4482_v13 = vld [vmem:[%s9213_s3 + $0x218] sm:$0xff]  ;;  %5629 = vmatprep.subr.bf16.mxu1 %v5628_v29  ;;  %v4501_v18 = vld [vmem:[%s9213_s3 + $0x2b0] sm:$0xff] }
 0x234   : > { %v1728_v45 = vpop.f32.mrb[152].mxu1  ;;  %v5600_v48 = vpack.c.bf16 %v4482_v13, %v4481_v36  ;;  %5631 = vmatpush3.bf16.msra.mxu1 %v5628_v29  ;;  %v4503_v13 = vld [vmem:[%s9213_s3 + $0x2c0] sm:$0xff] }
 0x235   : > { %v7318_v24 = vadd.f32 %v7078_v31, %v1999_v1  ;;  %v1954_v49 = vadd.f32 %v7214_v43, %v1728_v45  ;;  %v1730_v46 = vpop.f32.mrb[153].mxu1  ;;  %v4483_v43 = vld [vmem:[%s9213_s3 + $0x220] sm:$0xff] }
 0x236   : > { %5601 = vmatpush1.bf16.msra.mxu0 %v5600_v48  ;;  %v4487_v48 = vld [vmem:[%s9213_s3 + $0x240] sm:$0xff] }
 0x237   : > { %v2068_v32 = vadd.f32 %v2067_v54, %v7318_v24  ;;  %v2000_v8 = vadd.f32 %v1954_v49, %v7069_v56  ;;  %5602 = vmatprep.subr.bf16.mxu0 %v5833_v3  ;;  %v4484_v56 = vld [vmem:[%s9213_s3 + $0x228] sm:$0xff]  ;;  %v4485_v54 = vld [vmem:[%s9213_s3 + $0x230] sm:$0xff] }
 0x238   : > { %v1733_v16 = vpop.f32.mrb[154].mxu1  ;;  %v5603_v19 = vpack.c.bf16 %v4484_v56, %v4483_v43  ;;  %v4504_v49 = vld [vmem:[%s9213_s3 + $0x2c8] sm:$0xff]  ;;  %v4505_v43 = vld [vmem:[%s9213_s3 + $0x2d0] sm:$0xff]  ;;  %v4506_v56 = vld [vmem:[%s9213_s3 + $0x2d8] sm:$0xff] }
 0x239   : > { %v7337_v5 = vadd.f32 %v7078_v31, %v2000_v8  ;;  %v1959_v59 = vadd.f32 %v7207_v23, %v1733_v16  ;;  %v1735_v63 = vpop.f32.mrb[155].mxu1  ;;  %v5632_v23 = vpack.c.bf16 %v4502_v50, %v4501_v18  ;;  %v4508_v18 = vld [vmem:[%s9213_s3 + $0x2e8] sm:$0xff] }
 0x23a   : > { %5604 = vmatpush1.bf16.msra.mxu0 %v5603_v19 }
 0x23b   : > { %v2069_v9 = vadd.f32 %v2068_v32, %v7337_v5  ;;  %v2001_v57 = vadd.f32 %v1959_v59, %v7067_v15  ;;  %5605 = vmatprep.subr.bf16.mxu0 %v5833_v3  ;;  %v4486_v15 = vld [vmem:[%s9213_s3 + $0x238] sm:$0xff]  ;;  %5633 = vmatprep.subr.bf16.mxu1 %v5632_v23  ;;  %v5640_v59 = vpack.c.bf16 %v4506_v56, %v4505_v43 }
 0x23c   : > { %v1738_v53 = vpop.f32.mrb[156].mxu1  ;;  %v5606_v45 = vpack.c.bf16 %v4486_v15, %v4485_v54  ;;  %5635 = vmatpush3.bf16.msra.mxu1 %v5632_v23 }
 0x23d   : > { %v7356_v1 = vadd.f32 %v7078_v31, %v2001_v57  ;;  %v1964_v35 = vadd.f32 %v7231_v17, %v1738_v53  ;;  %v1740_v61 = vpop.f32.mrb[157].mxu1  ;;  %v5636_v17 = vpack.c.bf16 %v4504_v49, %v4503_v13  ;;  %v4507_v57 = vld [vmem:[%s9213_s3 + $0x2e0] sm:$0xff]  ;;  %v4492_v53 = vld [vmem:[%s9213_s3 + $0x268] sm:$0xff] }
 0x23e   : > { %5607 = vmatpush1.bf16.msra.mxu0 %v5606_v45  ;;  %v5644_v50 = vpack.c.bf16 %v4508_v18, %v4507_v57  ;;  %v4510_v61 = vld [vmem:[%s9213_s3 + $0x2f8] sm:$0xff] }
 0x23f   : > { %v2070_v14 = vadd.f32 %v2069_v9, %v7356_v1  ;;  %v2002_v36 = vadd.f32 %v1964_v35, %v7073_v52  ;;  %5608 = vmatprep.subr.bf16.mxu0 %v5833_v3  ;;  %v4488_v52 = vld [vmem:[%s9213_s3 + $0x248] sm:$0xff]  ;;  %5637 = vmatprep.subr.bf16.mxu1 %v5636_v17  ;;  %v4509_v35 = vld [vmem:[%s9213_s3 + $0x2f0] sm:$0xff] }
 0x240   : > { %v1743_v46 = vpop.f32.mrb[158].mxu1  ;;  %v5609_v11 = vpack.c.bf16 %v4488_v52, %v4487_v48  ;;  %5639 = vmatpush3.bf16.msra.mxu1 %v5636_v17  ;;  %v5648_v45 = vpack.c.bf16 %v4510_v61, %v4509_v35  ;;  %v2426_v48 = vld [vmem:[%s9213_s3 + $0x100] sm:$0xff]  ;;  %v2427_v52 = vld [vmem:[%s9213_s3 + $0x108] sm:$0xff] }
 0x241   : > { %v2040_v32 = vadd.f32 %v7078_v31, %v2002_v36  ;;  %v1969_v8 = vadd.f32 %v7227_v28, %v1743_v46  ;;  %v1745_v2 = vpop.f32.mrb[159].mxu1  ;;  %v4489_v28 = vld [vmem:[%s9213_s3 + $0x250] sm:$0xff]  ;;  %5641 = vmatprep.subr.bf16.mxu1 %v5640_v59  ;;  %v4494_v36 = vld [vmem:[%s9213_s3 + $0x278] sm:$0xff] }
 0x242   : > { %5610 = vmatpush1.bf16.msra.mxu0 %v5609_v11 }
 0x243   : > { %v2071_v16 = vadd.f32 %v2070_v14, %v2040_v32  ;;  %v2003_v29 = vadd.f32 %v1969_v8, %v7071_v42  ;;  %5611 = vmatprep.subr.bf16.mxu0 %v5833_v3  ;;  %v4490_v42 = vld [vmem:[%s9213_s3 + $0x258] sm:$0xff]  ;;  %v4493_v14 = vld [vmem:[%s9213_s3 + $0x270] sm:$0xff]  ;;  %v7424_v8 = vpack.c.bf16 %v2427_v52, %v2426_v48 }
 0x244   : > { %v5612_v19 = vpack.c.bf16 %v4490_v42, %v4489_v28  ;;  %5643 = vmatpush3.bf16.msra.mxu1 %v5640_v59  ;;  %v5618_v49 = vpack.c.bf16 %v4494_v36, %v4493_v14 }
 0x245   : > { %v2041_v63 = vadd.f32 %v7078_v31, %v2003_v29  ;;  %v4491_v31 = vld [vmem:[%s9213_s3 + $0x260] sm:$0xff]  ;;  %5645 = vmatprep.subr.bf16.mxu1 %v5644_v50 }
 0x246   : > { %5613 = vmatpush1.bf16.msra.mxu0 %v5612_v19  ;;  %v5615_v54 = vpack.c.bf16 %v4492_v53, %v4491_v31 }
 0x247   : > { %v2072_v9 = vadd.f32 %v2071_v16, %v2041_v63  ;;  %5614 = vmatprep.subr.bf16.mxu0 %v5833_v3 }
 0x248   : > { %5647 = vmatpush3.bf16.msra.mxu1 %v5644_v50 }
 0x249   : > { %v2073_v23 = vrot.slane %v2072_v9, 4  ;;  %5649 = vmatprep.subr.bf16.mxu1 %v5648_v45 }
 0x24a   : > { %5616 = vmatpush1.bf16.msra.mxu0 %v5615_v54 }
 0x24b   : > { %v2074_v15 = vadd.f32 %v2073_v23, %v2072_v9  ;;  %5617 = vmatprep.subr.bf16.mxu0 %v5833_v3 }
 0x24c   : > { %5651 = vmatpush3.bf16.msra.mxu1 %v5648_v45 }
 0x24d   : > { %v2075_v13 = vrot.slane %v2074_v15, 2  ;;  %5652 = vmatprep.subr.bf16.mxu1 %v5833_v3 }
 0x24e   : > { %5619 = vmatpush1.bf16.msra.mxu0 %v5618_v49 }
 0x24f   : > { %v2076_v46 = vadd.f32 %v2075_v13, %v2074_v15  ;;  %5701 = vmatprep.subr.bf16.mxu0 %v7424_v8 }
 0x251   : > { %v2077_v17 = vrot.slane %v2076_v46, 1 }
 0x253   : > { %v2078_v2 = vadd.f32 %v2077_v17, %v2076_v46 }
 0x255   : > { %v7427_v11 = vmul.f32 0.00390625, %v2078_v2 }
 0x257   : > { %v7431_v16 = vsub.f32 %v7225_v21, %v7427_v11  ;;  %v7435_v29 = vsub.f32 %v7242_v47, %v7427_v11  ;;  %v7439_v43 = vsub.f32 %v7255_v41, %v7427_v11  ;;  %v7443_v56 = vsub.f32 %v7267_v25, %v7427_v11 }
 0x258   : > { %v7447_v59 = vsub.f32 %v7280_v10, %v7427_v11  ;;  %v7451_v21 = vsub.f32 %v7299_v4, %v7427_v11  ;;  %v7455_v47 = vsub.f32 %v7318_v24, %v7427_v11  ;;  %v7459_v41 = vsub.f32 %v7337_v5, %v7427_v11 }
 0x259   : > { %v7463_v25 = vsub.f32 %v7356_v1, %v7427_v11  ;;  %v7466_v28 = vsub.f32 %v2040_v32, %v7427_v11  ;;  %v7469_v10 = vsub.f32 %v2041_v63, %v7427_v11  ;;  %v7473_v4 = vsub.f32 %v7086_v27, %v7427_v11 }
 0x25a   : > { %v7477_v24 = vsub.f32 %v7083_v26, %v7427_v11  ;;  %v7481_v5 = vsub.f32 %v7093_v20, %v7427_v11  ;;  %v7489_v42 = vsub.f32 %v7097_v58, %v7427_v11  ;;  %v7493_v27 = vsub.f32 %v7102_v0, %v7427_v11 }
 0x25b   : > { %v2113_v1 = vmul.f32 %v7473_v4, %v7473_v4  ;;  %v7499_v20 = vsub.f32 %v7107_v6, %v7427_v11  ;;  %v7505_v58 = vsub.f32 %v7112_v38, %v7427_v11  ;;  %v7511_v18 = vsub.f32 %v7117_v30, %v7427_v11 }
 0x25c   : > { %v2114_v32 = vmul.f32 %v7477_v24, %v7477_v24  ;;  %v2115_v26 = vmul.f32 %v7481_v5, %v7481_v5  ;;  %v2116_v19 = vmul.f32 %v7489_v42, %v7489_v42  ;;  %v2117_v0 = vmul.f32 %v7493_v27, %v7493_v27 }
 0x25d   : > { %v2118_v6 = vmul.f32 %v7499_v20, %v7499_v20  ;;  %v7517_v31 = vsub.f32 %v7122_v62, %v7427_v11  ;;  %v2119_v38 = vmul.f32 %v7505_v58, %v7505_v58  ;;  %v7523_v23 = vsub.f32 %v7127_v37, %v7427_v11 }
 0x25e   : > { %v2145_v63 = vadd.f32 %v2114_v32, %v2113_v1  ;;  %v2120_v30 = vmul.f32 %v7511_v18, %v7511_v18  ;;  %v7529_v15 = vsub.f32 %v7132_v34, %v7427_v11  ;;  %v7535_v61 = vsub.f32 %v7139_v40, %v7427_v11 }
 0x25f   : > { %v2121_v62 = vmul.f32 %v7517_v31, %v7517_v31  ;;  %v2122_v37 = vmul.f32 %v7523_v23, %v7523_v23  ;;  %v7541_v14 = vsub.f32 %v7143_v39, %v7427_v11  ;;  %v7547_v13 = vsub.f32 %v7150_v33, %v7427_v11 }
 0x260   : > { %v2146_v9 = vadd.f32 %v2145_v63, %v2115_v26  ;;  %v2123_v34 = vmul.f32 %v7529_v15, %v7529_v15  ;;  %v2124_v40 = vmul.f32 %v7535_v61, %v7535_v61  ;;  %v7553_v46 = vsub.f32 %v7153_v12, %v7427_v11 }
 0x261   : > { %v2125_v39 = vmul.f32 %v7541_v14, %v7541_v14  ;;  %v7559_v48 = vsub.f32 %v7168_v44, %v7427_v11  ;;  %v2126_v33 = vmul.f32 %v7547_v13, %v7547_v13  ;;  %v7565_v2 = vsub.f32 %v7173_v55, %v7427_v11 }
 0x262   : > { %v2147_v57 = vadd.f32 %v2146_v9, %v2116_v19  ;;  %v2127_v12 = vmul.f32 %v7553_v46, %v7553_v46  ;;  %v7571_v32 = vsub.f32 %v7185_v51, %v7427_v11  ;;  %v7577_v63 = vsub.f32 %v7191_v22, %v7427_v11 }
 0x263   : > { %v2128_v44 = vmul.f32 %v7559_v48, %v7559_v48  ;;  %v2129_v55 = vmul.f32 %v7565_v2, %v7565_v2  ;;  %v7583_v9 = vsub.f32 %v7205_v7, %v7427_v11 }
 0x264   : > { %v2148_v50 = vadd.f32 %v2147_v57, %v2117_v0  ;;  %v2130_v51 = vmul.f32 %v7571_v32, %v7571_v32  ;;  %v7589_v57 = vsub.f32 %v7211_v60, %v7427_v11  ;;  %v2131_v22 = vmul.f32 %v7577_v63, %v7577_v63 }
 0x265   : > { %v2135_v60 = vmul.f32 %v7435_v29, %v7435_v29 }
 0x266   : > { %v2149_v53 = vadd.f32 %v2148_v50, %v2118_v6  ;;  %v2132_v50 = vmul.f32 %v7583_v9, %v7583_v9  ;;  %v2133_v7 = vmul.f32 %v7589_v57, %v7589_v57 }
 0x268   : > { %v2150_v54 = vadd.f32 %v2149_v53, %v2119_v38 }
 0x26a   : > { %v2151_v35 = vadd.f32 %v2150_v54, %v2120_v30  ;;  %v2134_v30 = vmul.f32 %v7431_v16, %v7431_v16 }
 0x26c   : > { %v2152_v45 = vadd.f32 %v2151_v35, %v2121_v62  ;;  %v2136_v62 = vmul.f32 %v7439_v43, %v7439_v43 }
 0x26e   : > { %v2153_v36 = vadd.f32 %v2152_v45, %v2122_v37  ;;  %v2137_v37 = vmul.f32 %v7443_v56, %v7443_v56 }
 0x270   : > { %v2154_v49 = vadd.f32 %v2153_v36, %v2123_v34  ;;  %v2138_v34 = vmul.f32 %v7447_v59, %v7447_v59 }
 0x272   : > { %v2155_v17 = vadd.f32 %v2154_v49, %v2124_v40  ;;  %v2139_v40 = vmul.f32 %v7451_v21, %v7451_v21 }
 0x274   : > { %v2156_v52 = vadd.f32 %v2155_v17, %v2125_v39  ;;  %v2140_v39 = vmul.f32 %v7455_v47, %v7455_v47 }
 0x276   : > { %v2157_v1 = vadd.f32 %v2156_v52, %v2126_v33  ;;  %v2141_v33 = vmul.f32 %v7459_v41, %v7459_v41 }
 0x278   : > { %v2158_v26 = vadd.f32 %v2157_v1, %v2127_v12  ;;  %v2142_v12 = vmul.f32 %v7463_v25, %v7463_v25 }
 0x27a   : > { %v2159_v19 = vadd.f32 %v2158_v26, %v2128_v44  ;;  %v2143_v44 = vmul.f32 %v7466_v28, %v7466_v28 }
 0x27c   : > { %v2160_v0 = vadd.f32 %v2159_v19, %v2129_v55  ;;  %v2144_v55 = vmul.f32 %v7469_v10, %v7469_v10 }
 0x27e   : > { %v2161_v6 = vadd.f32 %v2160_v0, %v2130_v51 }
 0x280   : > { %v2162_v38 = vadd.f32 %v2161_v6, %v2131_v22 }
 0x282   : > { %v2163_v53 = vadd.f32 %v2162_v38, %v2132_v50 }
 0x284   : > { %v2164_v54 = vadd.f32 %v2163_v53, %v2133_v7 }
 0x286   : > { %v2165_v11 = vadd.f32 %v2164_v54, %v2134_v30  ;;  %v7622_v54 = vld [vmem:[%s9213_s3] sm:$0xff] }
 0x288   : > { %v2166_v35 = vadd.f32 %v2165_v11, %v2135_v60  ;;  %v7627_v60 = vld [vmem:[%s9213_s3 + $0x8] sm:$0xff]  ;;  %v7632_v11 = vld [vmem:[%s9213_s3 + $0x10] sm:$0xff] }
 0x28a   : > { %v2167_v45 = vadd.f32 %v2166_v35, %v2136_v62  ;;  %v7637_v62 = vld [vmem:[%s9213_s3 + $0x18] sm:$0xff]  ;;  %v2428_v35 = vld [vmem:[%s9213_s3 + $0x110] sm:$0xff] }
 0x28c   : > { %v2168_v36 = vadd.f32 %v2167_v45, %v2137_v37  ;;  %v2429_v37 = vld [vmem:[%s9213_s3 + $0x118] sm:$0xff]  ;;  %v2430_v45 = vld [vmem:[%s9213_s3 + $0x120] sm:$0xff] }
 0x28e   : > { %v2169_v49 = vadd.f32 %v2168_v36, %v2138_v34  ;;  %v2431_v34 = vld [vmem:[%s9213_s3 + $0x128] sm:$0xff] }
 0x290   : > { %v2170_v17 = vadd.f32 %v2169_v49, %v2139_v40  ;;  %v5653_v40 = vpack.c.bf16 %v7627_v60, %v7622_v54  ;;  %v5656_v49 = vpack.c.bf16 %v7637_v62, %v7632_v11  ;;  %v2399_v54 = vld [vmem:[%s9213_s3 + $0x28] sm:$0xff]  ;;  %v2434_v11 = vld [vmem:[%s9213_s3 + $0x140] sm:$0xff] }
 0x292   : > { %v2171_v52 = vadd.f32 %v2170_v17, %v2140_v39  ;;  %v7655_v39 = vpack.c.bf16 %v2429_v37, %v2428_v35  ;;  %v7657_v17 = vpack.c.bf16 %v2431_v34, %v2430_v45 }
 0x294   : > { %v2172_v1 = vadd.f32 %v2171_v52, %v2141_v33 }
 0x296   : > { %v2173_v26 = vadd.f32 %v2172_v1, %v2142_v12 }
 0x298   : > { %v2174_v19 = vadd.f32 %v2173_v26, %v2143_v44 }
 0x29a   : > { %v2175_v51 = vadd.f32 %v2174_v19, %v2144_v55 }
 0x29c   : > { %v2176_v0 = vrot.slane %v2175_v51, 4 }
 0x29e   : > { %v2177_v22 = vadd.f32 %v2176_v0, %v2175_v51 }
 0x2a0   : > { %v2178_v6 = vrot.slane %v2177_v22, 2 }
 0x2a2   : > { %v2179_v50 = vadd.f32 %v2178_v6, %v2177_v22 }
 0x2a4   : > { %v2180_v38 = vrot.slane %v2179_v50, 1 }
 0x2a6   : > { %v2181_v7 = vadd.f32 %v2180_v38, %v2179_v50 }
 0x2a8   : > { %v2182_v53 = vmul.f32 0.00390625, %v2181_v7 }
 0x2aa   : > { %v2183_v30 = vadd.f32 1e-05, %v2182_v53 }
 0x2ac   : > { %5821 = vrsqrt.f32 %v2183_v30 }
 0x2b6   : > { %v5822_v36 = vpop.eup %5821 }
 0x2b7   : > { %v2216_v33 = vmul.f32 %v5822_v36, %v7469_v10  ;;  %v2185_v52 = vmul.f32 %v5822_v36, %v7473_v4  ;;  %v2186_v12 = vmul.f32 %v5822_v36, %v7477_v24  ;;  %v2187_v1 = vmul.f32 %v5822_v36, %v7481_v5 }
 0x2b8   : > { %v2188_v44 = vmul.f32 %v5822_v36, %v7489_v42  ;;  %v2189_v26 = vmul.f32 %v5822_v36, %v7493_v27  ;;  %v2190_v55 = vmul.f32 %v5822_v36, %v7499_v20  ;;  %v2191_v19 = vmul.f32 %v5822_v36, %v7505_v58 }
 0x2b9   : > { %v7667_v51 = vmax.f32 %v2216_v33, 0.0  ;;  %v2192_v0 = vmul.f32 %v5822_v36, %v7511_v18  ;;  %v2193_v10 = vmul.f32 %v5822_v36, %v7517_v31  ;;  %v2194_v4 = vmul.f32 %v5822_v36, %v7523_v23 }
 0x2ba   : > { %v2195_v24 = vmul.f32 %v5822_v36, %v7529_v15  ;;  %v2196_v5 = vmul.f32 %v5822_v36, %v7535_v61  ;;  %v2197_v42 = vmul.f32 %v5822_v36, %v7541_v14  ;;  %v2198_v27 = vmul.f32 %v5822_v36, %v7547_v13 }
 0x2bb   : > { %2280 = vst [vmem:[#allocation2 + $0x189] sm:$0xff] %v7667_v51  ;;  %v2199_v20 = vmul.f32 %v5822_v36, %v7553_v46  ;;  %v2200_v58 = vmul.f32 %v5822_v36, %v7559_v48  ;;  %v2201_v18 = vmul.f32 %v5822_v36, %v7565_v2  ;;  %v2202_v31 = vmul.f32 %v5822_v36, %v7571_v32 }
 0x2bc   : > { %v2203_v23 = vmul.f32 %v5822_v36, %v7577_v63  ;;  %v2204_v15 = vmul.f32 %v5822_v36, %v7583_v9  ;;  %v2205_v61 = vmul.f32 %v5822_v36, %v7589_v57  ;;  %v2206_v14 = vmul.f32 %v5822_v36, %v7431_v16 }
 0x2bd   : > { %v2207_v13 = vmul.f32 %v5822_v36, %v7435_v29  ;;  %v2208_v22 = vmul.f32 %v5822_v36, %v7439_v43  ;;  %v2209_v46 = vmul.f32 %v5822_v36, %v7443_v56  ;;  %v2210_v48 = vmul.f32 %v5822_v36, %v7447_v59 }
 0x2be   : > { %v2211_v2 = vmul.f32 %v5822_v36, %v7451_v21  ;;  %v7691_v32 = vmul.f32 %v5822_v36, %v7455_v47  ;;  %v7694_v63 = vmul.f32 %v5822_v36, %v7459_v41  ;;  %v7697_v9 = vmul.f32 %v5822_v36, %v7463_v25 }
 0x2bf   : > { %v7700_v16 = vmul.f32 %v5822_v36, %v7466_v28  ;;  %v7702_v29 = vmax.f32 %v2185_v52, 0.0  ;;  %v7704_v43 = vmax.f32 %v2186_v12, 0.0  ;;  %v7706_v56 = vmax.f32 %v2187_v1, 0.0 }
 0x2c0   : > { %v7708_v59 = vmax.f32 %v2188_v44, 0.0  ;;  %v7710_v21 = vmax.f32 %v2189_v26, 0.0  ;;  %v7712_v47 = vmax.f32 %v2190_v55, 0.0  ;;  %v7714_v41 = vmax.f32 %v2191_v19, 0.0 }
 0x2c1   : > { %v7716_v57 = vmax.f32 %v2192_v0, 0.0  ;;  %v7718_v25 = vmax.f32 %v2193_v10, 0.0  ;;  %v7720_v28 = vmax.f32 %v2194_v4, 0.0  ;;  %v7722_v6 = vmax.f32 %v2195_v24, 0.0  ;;  %2249 = vst [vmem:[#allocation2 + $0x19] sm:$0xff] %v7702_v29  ;;  %2250 = vst [vmem:[#allocation2 + $0x21] sm:$0xff] %v7704_v43  ;;  %2591 = vmatprep.mubr.f32.mxu0 %v7702_v29  ;;  %5124 = vmatprep.mubr.f32.mxu1 %v7706_v56 }
 0x2c2   : > { %2251 = vst [vmem:[#allocation2 + $0x31] sm:$0xff] %v7706_v56  ;;  %2281 = vst [vmem:[#allocation2 + $0x1] sm:$0xff] %v7706_v56  ;;  %v7730_v50 = vmax.f32 %v2196_v5, 0.0  ;;  %v7732_v38 = vmax.f32 %v2197_v42, 0.0  ;;  %v7734_v7 = vmax.f32 %v2198_v27, 0.0  ;;  %v7736_v53 = vmax.f32 %v2199_v20, 0.0  ;;  %2592 = vmatmul.mubr.f32.vlgmr.msra.gmra.mrb[128].mxu0 %v7706_v56  ;;  %5125 = vmatmul.mubr.f32.vlgmr.msra.gmra.mrb[160].mxu1 %v7708_v59 }
 0x2c3   : > { %2252 = vst [vmem:[#allocation2 + $0x39] sm:$0xff] %v7708_v59  ;;  %2253 = vst [vmem:[#allocation2 + $0x49] sm:$0xff] %v7710_v21  ;;  %v2337_v30 = vld [vmem:[#allocation2 + $0x18f] sm:$0x1]  ;;  %v7745_v35 = vmax.f32 %v2200_v58, 0.0  ;;  %v7747_v37 = vmax.f32 %v2201_v18, 0.0  ;;  %2596 = vmatprep.mubr.f32.mxu0 %v7704_v43  ;;  %5127 = vmatprep.mubr.f32.mxu1 %v7710_v21 }
 0x2c4   : > { %2254 = vst [vmem:[#allocation2 + $0x51] sm:$0xff] %v7712_v47  ;;  %2255 = vst [vmem:[#allocation2 + $0x61] sm:$0xff] %v7714_v41  ;;  %v7749_v45 = vmax.f32 %v2202_v31, 0.0  ;;  %v7751_v34 = vmax.f32 %v2203_v23, 0.0  ;;  %v7759_v36 = vmax.f32 %v2204_v15, 0.0  ;;  %v7761_v33 = vmax.f32 %v2205_v61, 0.0  ;;  %5654 = vmatpush1.bf16.msra.mxu1 %v5653_v40  ;;  %5703 = vmatpush3.bf16.msra.mxu0 %v7424_v8 }
 0x2c5   : > { %2282 = vst [vmem:[#allocation2 + $0x9] sm:$0xff] %v7708_v59  ;;  %2256 = vst [vmem:[#allocation2 + $0x69] sm:$0xff] %v7716_v57  ;;  %v7763_v52 = vmax.f32 %v2206_v14, 0.0  ;;  %v7765_v12 = vmax.f32 %v2207_v13, 0.0  ;;  %v7775_v1 = vmax.f32 %v2208_v22, 0.0  ;;  %v7777_v44 = vmax.f32 %v2209_v46, 0.0  ;;  %5655 = vmatprep.subr.bf16.mxu1 %v5833_v3  ;;  %5705 = vmatprep.subr.bf16.mxu0 %v7655_v39 }
 0x2c6   : > { %2257 = vst [vmem:[#allocation2 + $0x79] sm:$0xff] %v7718_v25  ;;  %2258 = vst [vmem:[#allocation2 + $0x81] sm:$0xff] %v7720_v28  ;;  %v7779_v26 = vmax.f32 %v2210_v48, 0.0  ;;  %v7781_v55 = vmax.f32 %v2211_v2, 0.0  ;;  %v2398_v8 = vld [vmem:[%s9213_s3 + $0x20] sm:$0xff]  ;;  %v7796_v60 = vmax.f32 %v7691_v32, 0.0  ;;  %2597 = vmatmul.mubr.f32.gmra.mrb[130].mxu0 %v7708_v59  ;;  %5128 = vmatmul.mubr.f32.gmra.mrb[162].mxu1 %v7712_v47 }
 0x2c7   : > { %2259 = vst [vmem:[#allocation2 + $0x91] sm:$0xff] %v7722_v6  ;;  %2355 = vst [vmem:[#allocation2 + $0x191] sm:$0x1] %v2337_v30  ;;  %v7799_v40 = vmax.f32 %v7694_v63, 0.0  ;;  %v7802_v19 = vmax.f32 %v7697_v9, 0.0  ;;  %v7805_v0 = vmax.f32 %v7700_v16, 0.0  ;;  %2601 = vmatprep.mubr.f32.mxu0 %v7706_v56  ;;  %5130 = vmatprep.mubr.f32.mxu1 %v7714_v41  ;;  %v5659_v24 = vpack.c.bf16 %v2399_v54, %v2398_v8 }
 0x2c8   : > { %2260 = vst [vmem:[#allocation2 + $0x99] sm:$0xff] %v7730_v50  ;;  %2261 = vst [vmem:[#allocation2 + $0xa9] sm:$0xff] %v7732_v38  ;;  %v2432_v10 = vld [vmem:[%s9213_s3 + $0x130] sm:$0xff]  ;;  %v2433_v4 = vld [vmem:[%s9213_s3 + $0x138] sm:$0xff]  ;;  %5657 = vmatpush1.bf16.msra.mxu1 %v5656_v49  ;;  %5707 = vmatpush3.bf16.msra.mxu0 %v7655_v39 }
 0x2c9   : > { %2262 = vst [vmem:[#allocation2 + $0xb1] sm:$0xff] %v7734_v7  ;;  %2263 = vst [vmem:[#allocation2 + $0xc1] sm:$0xff] %v7736_v53  ;;  %v2400_v5 = vld [vmem:[%s9213_s3 + $0x30] sm:$0xff]  ;;  %v2286_v42 = vld [vmem:[#allocation2 + $0x1a] sm:$0x1]  ;;  %5658 = vmatprep.subr.bf16.mxu1 %v5833_v3  ;;  %5709 = vmatprep.subr.bf16.mxu0 %v7657_v17  ;;  %v5712_v58 = vpack.c.bf16 %v2433_v4, %v2432_v10 }
 0x2ca   : > { %2264 = vst [vmem:[#allocation2 + $0xc9] sm:$0xff] %v7745_v35  ;;  %2265 = vst [vmem:[#allocation2 + $0xd9] sm:$0xff] %v7747_v37  ;;  %v2285_v27 = vld [vmem:[#allocation2 + $0x2] sm:$0x1]  ;;  %v2401_v20 = vld [vmem:[%s9213_s3 + $0x38] sm:$0xff]  ;;  %2602 = vmatmul.mubr.f32.gmra.mrb[132].mxu0 %v7702_v29  ;;  %5131 = vmatmul.mubr.f32.gmra.mrb[164].mxu1 %v7716_v57 }
 0x2cb   : > { %2266 = vst [vmem:[#allocation2 + $0xe1] sm:$0xff] %v7749_v45  ;;  %2267 = vst [vmem:[#allocation2 + $0xf1] sm:$0xff] %v7751_v34  ;;  %v2287_v62 = vld [vmem:[#allocation2 + $0x32] sm:$0x1]  ;;  %v2435_v49 = vld [vmem:[%s9213_s3 + $0x148] sm:$0xff]  ;;  %2606 = vmatprep.mubr.f32.mxu0 %v7708_v59  ;;  %5133 = vmatprep.mubr.f32.mxu1 %v7718_v25  ;;  %v5662_v23 = vpack.c.bf16 %v2401_v20, %v2400_v5 }
 0x2cc   : > { %2268 = vst [vmem:[#allocation2 + $0xf9] sm:$0xff] %v7759_v36  ;;  %2269 = vst [vmem:[#allocation2 + $0x109] sm:$0xff] %v7761_v33  ;;  %v2288_v39 = vld [vmem:[#allocation2 + $0x4a] sm:$0x1]  ;;  %v2289_v18 = vld [vmem:[#allocation2 + $0x62] sm:$0x1]  ;;  %5660 = vmatpush1.bf16.msra.mxu1 %v5659_v24  ;;  %5711 = vmatpush3.bf16.msra.mxu0 %v7657_v17  ;;  %v5716_v22 = vpack.c.bf16 %v2435_v49, %v2434_v11 }
 0x2cd   : > { %2270 = vst [vmem:[#allocation2 + $0x111] sm:$0xff] %v7763_v52  ;;  %2271 = vst [vmem:[#allocation2 + $0x121] sm:$0xff] %v7765_v12  ;;  %v2290_v31 = vld [vmem:[#allocation2 + $0x7a] sm:$0x1]  ;;  %v2402_v15 = vld [vmem:[%s9213_s3 + $0x40] sm:$0xff]  ;;  %5661 = vmatprep.subr.bf16.mxu1 %v5833_v3  ;;  %5713 = vmatprep.subr.bf16.mxu0 %v5712_v58 }
 0x2ce   : > { %2272 = vst [vmem:[#allocation2 + $0x129] sm:$0xff] %v7775_v1  ;;  %2273 = vst [vmem:[#allocation2 + $0x139] sm:$0xff] %v7777_v44  ;;  %v2291_v61 = vld [vmem:[#allocation2 + $0x92] sm:$0x1]  ;;  %v2403_v13 = vld [vmem:[%s9213_s3 + $0x48] sm:$0xff]  ;;  %2607 = vmatmul.mubr.f32.gmra.mrb[134].mxu0 %v7704_v43  ;;  %5134 = vmatmul.mubr.f32.gmra.mrb[166].mxu1 %v7720_v28 }
 0x2cf   : > { %2274 = vst [vmem:[#allocation2 + $0x141] sm:$0xff] %v7779_v26  ;;  %2275 = vst [vmem:[#allocation2 + $0x151] sm:$0xff] %v7781_v55  ;;  %v2292_v14 = vld [vmem:[#allocation2 + $0xaa] sm:$0x1]  ;;  %v2436_v46 = vld [vmem:[%s9213_s3 + $0x150] sm:$0xff]  ;;  %2611 = vmatprep.mubr.f32.mxu0 %v7710_v21  ;;  %5136 = vmatprep.mubr.f32.mxu1 %v7722_v6  ;;  %v5665_v63 = vpack.c.bf16 %v2403_v13, %v2402_v15 }
 0x2d0   : > { %2276 = vst [vmem:[#allocation2 + $0x159] sm:$0xff] %v7796_v60  ;;  %2277 = vst [vmem:[#allocation2 + $0x169] sm:$0xff] %v7799_v40  ;;  %v2293_v48 = vld [vmem:[#allocation2 + $0xc2] sm:$0x1]  ;;  %v2437_v17 = vld [vmem:[%s9213_s3 + $0x158] sm:$0xff]  ;;  %5663 = vmatpush1.bf16.msra.mxu1 %v5662_v23  ;;  %5715 = vmatpush3.bf16.msra.mxu0 %v5712_v58 }
 0x2d1   : > { %2278 = vst [vmem:[#allocation2 + $0x171] sm:$0xff] %v7802_v19  ;;  %2279 = vst [vmem:[#allocation2 + $0x181] sm:$0xff] %v7805_v0  ;;  %v2294_v2 = vld [vmem:[#allocation2 + $0xda] sm:$0x1]  ;;  %5664 = vmatprep.subr.bf16.mxu1 %v5833_v3  ;;  %v2404_v9 = vld [vmem:[%s9213_s3 + $0x50] sm:$0xff]  ;;  %5717 = vmatprep.subr.bf16.mxu0 %v5716_v22  ;;  %v5720_v29 = vpack.c.bf16 %v2437_v17, %v2436_v46 }
 0x2d2   : > { %2283 = vst [vmem:[#allocation2 + $0x199] sm:$0xff] %v7799_v40  ;;  %2284 = vst [vmem:[#allocation2 + $0x1a1] sm:$0xff] %v7802_v19  ;;  %v2295_v32 = vld [vmem:[#allocation2 + $0xf2] sm:$0x1]  ;;  %v2405_v16 = vld [vmem:[%s9213_s3 + $0x58] sm:$0xff]  ;;  %2612 = vmatmul.mubr.f32.gmra.mrb[136].mxu0 %v7706_v56  ;;  %5137 = vmatmul.mubr.f32.gmra.mrb[168].mxu1 %v7730_v50 }
 0x2d3   : > { %2304 = vst [vmem:[#allocation2 + $0x18] sm:$0x1] %v2286_v42  ;;  %2303 = vst [vmem:[#allocation2] sm:$0x1] %v2285_v27  ;;  %v2296_v43 = vld [vmem:[#allocation2 + $0x10a] sm:$0x1]  ;;  %2616 = vmatprep.mubr.f32.mxu0 %v7712_v47  ;;  %5139 = vmatprep.mubr.f32.mxu1 %v7732_v38  ;;  %v5668_v54 = vpack.c.bf16 %v2405_v16, %v2404_v9 }
 0x2d4   : > { %2305 = vst [vmem:[#allocation2 + $0x30] sm:$0x1] %v2287_v62  ;;  %2306 = vst [vmem:[#allocation2 + $0x48] sm:$0x1] %v2288_v39  ;;  %v2438_v30 = vld [vmem:[%s9213_s3 + $0x160] sm:$0xff]  ;;  %v2439_v8 = vld [vmem:[%s9213_s3 + $0x168] sm:$0xff]  ;;  %5666 = vmatpush1.bf16.msra.mxu1 %v5665_v63  ;;  %5719 = vmatpush3.bf16.msra.mxu0 %v5716_v22 }
 0x2d5   : > { %2307 = vst [vmem:[#allocation2 + $0x60] sm:$0x1] %v2289_v18  ;;  %2308 = vst [vmem:[#allocation2 + $0x78] sm:$0x1] %v2290_v31  ;;  %5667 = vmatprep.subr.bf16.mxu1 %v5833_v3  ;;  %v2406_v56 = vld [vmem:[%s9213_s3 + $0x60] sm:$0xff]  ;;  %v2407_v10 = vld [vmem:[%s9213_s3 + $0x68] sm:$0xff]  ;;  %5721 = vmatprep.subr.bf16.mxu0 %v5720_v29  ;;  %v5724_v4 = vpack.c.bf16 %v2439_v8, %v2438_v30 }
 0x2d6   : > { %2309 = vst [vmem:[#allocation2 + $0x90] sm:$0x1] %v2291_v61  ;;  %2310 = vst [vmem:[#allocation2 + $0xa8] sm:$0x1] %v2292_v14  ;;  %2617 = vmatmul.mubr.f32.gmra.mrb[138].mxu0 %v7708_v59  ;;  %5140 = vmatmul.mubr.f32.gmra.mrb[170].mxu1 %v7734_v7  ;;  %v2440_v24 = vld [vmem:[%s9213_s3 + $0x170] sm:$0xff]  ;;  %v2441_v5 = vld [vmem:[%s9213_s3 + $0x178] sm:$0xff]  ;;  %v5671_v20 = vpack.c.bf16 %v2407_v10, %v2406_v56 }
 0x2d7   : > { %2311 = vst [vmem:[#allocation2 + $0xc0] sm:$0x1] %v2293_v48  ;;  %2312 = vst [vmem:[#allocation2 + $0xd8] sm:$0x1] %v2294_v2  ;;  %2621 = vmatprep.mubr.f32.mxu0 %v7714_v41  ;;  %5142 = vmatprep.mubr.f32.mxu1 %v7736_v53  ;;  %v2297_v42 = vld [vmem:[#allocation2 + $0x122] sm:$0x1]  ;;  %v5728_v11 = vpack.c.bf16 %v2441_v5, %v2440_v24 }
 0x2d8   : > { %2313 = vst [vmem:[#allocation2 + $0xf0] sm:$0x1] %v2295_v32  ;;  %2314 = vst [vmem:[#allocation2 + $0x108] sm:$0x1] %v2296_v43  ;;  %v2298_v27 = vld [vmem:[#allocation2 + $0x13a] sm:$0x1]  ;;  %5669 = vmatpush1.bf16.msra.mxu1 %v5668_v54  ;;  %5723 = vmatpush3.bf16.msra.mxu0 %v5720_v29 }
 0x2d9   : > { %2315 = vst [vmem:[#allocation2 + $0x120] sm:$0x1] %v2297_v42  ;;  %2316 = vst [vmem:[#allocation2 + $0x138] sm:$0x1] %v2298_v27  ;;  %5670 = vmatprep.subr.bf16.mxu1 %v5833_v3  ;;  %v2408_v59 = vld [vmem:[%s9213_s3 + $0x70] sm:$0xff]  ;;  %v2409_v58 = vld [vmem:[%s9213_s3 + $0x78] sm:$0xff]  ;;  %5725 = vmatprep.subr.bf16.mxu0 %v5724_v4 }
 0x2da   : > { %v2299_v62 = vld [vmem:[#allocation2 + $0x152] sm:$0x1]  ;;  %2622 = vmatmul.mubr.f32.gmra.mrb[140].mxu0 %v7710_v21  ;;  %5143 = vmatmul.mubr.f32.gmra.mrb[172].mxu1 %v7745_v35  ;;  %v2300_v49 = vld [vmem:[#allocation2 + $0x16a] sm:$0x1]  ;;  %v2301_v39 = vld [vmem:[#allocation2 + $0x182] sm:$0x1]  ;;  %v5674_v31 = vpack.c.bf16 %v2409_v58, %v2408_v59 }
 0x2db   : > { %2317 = vst [vmem:[#allocation2 + $0x150] sm:$0x1] %v2299_v62  ;;  %2626 = vmatprep.mubr.f32.mxu0 %v7716_v57  ;;  %5145 = vmatprep.mubr.f32.mxu1 %v7747_v37  ;;  %2318 = vst [vmem:[#allocation2 + $0x168] sm:$0x1] %v2300_v49  ;;  %v2302_v18 = vld [vmem:[#allocation2 + $0x19a] sm:$0x1] }
 0x2dc   : > { %2319 = vst [vmem:[#allocation2 + $0x180] sm:$0x1] %v2301_v39  ;;  %5672 = vmatpush1.bf16.msra.mxu1 %v5671_v20  ;;  %5727 = vmatpush3.bf16.msra.mxu0 %v5724_v4  ;;  %2320 = vst [vmem:[#allocation2 + $0x198] sm:$0x1] %v2302_v18  ;;  %v2410_v21 = vld [vmem:[%s9213_s3 + $0x80] sm:$0xff]  ;;  %v2411_v23 = vld [vmem:[%s9213_s3 + $0x88] sm:$0xff] }
 0x2dd   : > { %5673 = vmatprep.subr.bf16.mxu1 %v5833_v3  ;;  %5729 = vmatprep.subr.bf16.mxu0 %v5728_v11  ;;  %v2323_v15 = vld [vmem:[#allocation2 + $0x3f] sm:$0x1]  ;;  %v2322_v61 = vld [vmem:[#allocation2 + $0x27] sm:$0x1]  ;;  %v2321_v14 = vld [vmem:[#allocation2 + $0xf] sm:$0x1]  ;;  %v5677_v22 = vpack.c.bf16 %v2411_v23, %v2410_v21 }
 0x2de   : > { %2627 = vmatmul.mubr.f32.gmra.mrb[142].mxu0 %v7712_v47  ;;  %5146 = vmatmul.mubr.f32.gmra.mrb[174].mxu1 %v7749_v45  ;;  %2341 = vst [vmem:[#allocation2 + $0x41] sm:$0x1] %v2323_v15  ;;  %2340 = vst [vmem:[#allocation2 + $0x29] sm:$0x1] %v2322_v61  ;;  %v2324_v13 = vld [vmem:[#allocation2 + $0x57] sm:$0x1] }
 0x2df   : > { %2631 = vmatprep.mubr.f32.mxu0 %v7718_v25  ;;  %5148 = vmatprep.mubr.f32.mxu1 %v7751_v34  ;;  %2339 = vst [vmem:[#allocation2 + $0x11] sm:$0x1] %v2321_v14  ;;  %2342 = vst [vmem:[#allocation2 + $0x59] sm:$0x1] %v2324_v13  ;;  %v2412_v47 = vld [vmem:[%s9213_s3 + $0x90] sm:$0xff]  ;;  %v2413_v46 = vld [vmem:[%s9213_s3 + $0x98] sm:$0xff] }
 0x2e0   : > { %5675 = vmatpush1.bf16.msra.mxu1 %v5674_v31  ;;  %5731 = vmatpush3.bf16.msra.mxu0 %v5728_v11  ;;  %v2325_v48 = vld [vmem:[#allocation2 + $0x6f] sm:$0x1]  ;;  %v2326_v17 = vld [vmem:[#allocation2 + $0x87] sm:$0x1]  ;;  %v5680_v2 = vpack.c.bf16 %v2413_v46, %v2412_v47  ;;  %v2327_v63 = vld [vmem:[#allocation2 + $0x9f] sm:$0x1] }
 0x2e1   : > { %5676 = vmatprep.subr.bf16.mxu1 %v5833_v3  ;;  %5732 = vmatprep.subr.bf16.mxu0 %v5833_v3  ;;  %2343 = vst [vmem:[#allocation2 + $0x71] sm:$0x1] %v2325_v48  ;;  %2344 = vst [vmem:[#allocation2 + $0x89] sm:$0x1] %v2326_v17  ;;  %v2414_v32 = vld [vmem:[%s9213_s3 + $0xa0] sm:$0xff]  ;;  %v2416_v43 = vld [vmem:[%s9213_s3 + $0xb0] sm:$0xff] }
 0x2e2   : > { %2632 = vmatmul.mubr.f32.gmra.mrb[144].mxu0 %v7714_v41  ;;  %5149 = vmatmul.mubr.f32.gmra.mrb[176].mxu1 %v7759_v36  ;;  %v2415_v41 = vld [vmem:[%s9213_s3 + $0xa8] sm:$0xff]  ;;  %2345 = vst [vmem:[#allocation2 + $0xa1] sm:$0x1] %v2327_v63  ;;  %v2328_v9 = vld [vmem:[#allocation2 + $0xb7] sm:$0x1]  ;;  %v2422_v11 = vld [vmem:[%s9213_s3 + $0xe0] sm:$0xff] }
 0x2e3   : > { %2636 = vmatprep.mubr.f32.mxu0 %v7720_v28  ;;  %5151 = vmatprep.mubr.f32.mxu1 %v7761_v33  ;;  %2346 = vst [vmem:[#allocation2 + $0xb9] sm:$0x1] %v2328_v9  ;;  %v2329_v16 = vld [vmem:[#allocation2 + $0xcf] sm:$0x1]  ;;  %v5683_v29 = vpack.c.bf16 %v2415_v41, %v2414_v32  ;;  %v2330_v30 = vld [vmem:[#allocation2 + $0xe7] sm:$0x1] }
 0x2e4   : > { %5678 = vmatpush1.bf16.msra.mxu1 %v5677_v22  ;;  %2347 = vst [vmem:[#allocation2 + $0xd1] sm:$0x1] %v2329_v16  ;;  %v2331_v8 = vld [vmem:[#allocation2 + $0xff] sm:$0x1]  ;;  %2348 = vst [vmem:[#allocation2 + $0xe9] sm:$0x1] %v2330_v30 }
 0x2e5   : > { %5679 = vmatprep.subr.bf16.mxu1 %v5833_v3  ;;  %2349 = vst [vmem:[#allocation2 + $0x101] sm:$0x1] %v2331_v8  ;;  %v2332_v54 = vld [vmem:[#allocation2 + $0x117] sm:$0x1]  ;;  %v2333_v56 = vld [vmem:[#allocation2 + $0x12f] sm:$0x1] }
 0x2e6   : > { %2637 = vmatmul.mubr.f32.gmra.mrb[146].mxu0 %v7716_v57  ;;  %5152 = vmatmul.mubr.f32.gmra.mrb[178].mxu1 %v7763_v52  ;;  %v2417_v57 = vld [vmem:[%s9213_s3 + $0xb8] sm:$0xff]  ;;  %2350 = vst [vmem:[#allocation2 + $0x119] sm:$0x1] %v2332_v54  ;;  %2351 = vst [vmem:[#allocation2 + $0x131] sm:$0x1] %v2333_v56  ;;  %v2419_v4 = vld [vmem:[%s9213_s3 + $0xc8] sm:$0xff] }
 0x2e7   : > { %2641 = vmatprep.mubr.f32.mxu0 %v7722_v6  ;;  %5154 = vmatprep.mubr.f32.mxu1 %v7765_v12  ;;  %v5686_v10 = vpack.c.bf16 %v2417_v57, %v2416_v43  ;;  %v2334_v24 = vld [vmem:[#allocation2 + $0x147] sm:$0x1]  ;;  %v2335_v5 = vld [vmem:[#allocation2 + $0x15f] sm:$0x1]  ;;  %v2336_v27 = vld [vmem:[#allocation2 + $0x177] sm:$0x1] }
 0x2e8   : > { %5681 = vmatpush1.bf16.msra.mxu1 %v5680_v2  ;;  %2352 = vst [vmem:[#allocation2 + $0x149] sm:$0x1] %v2334_v24  ;;  %2353 = vst [vmem:[#allocation2 + $0x161] sm:$0x1] %v2335_v5  ;;  %v2420_v20 = vld [vmem:[%s9213_s3 + $0xd0] sm:$0xff]  ;;  %v2423_v62 = vld [vmem:[%s9213_s3 + $0xe8] sm:$0xff] }
 0x2e9   : > { %5682 = vmatprep.subr.bf16.mxu1 %v5833_v3  ;;  %2354 = vst [vmem:[#allocation2 + $0x179] sm:$0x1] %v2336_v27  ;;  %v2338_v58 = vld [vmem:[#allocation2 + $0x1a7] sm:$0x1]  ;;  %v2424_v49 = vld [vmem:[%s9213_s3 + $0xf0] sm:$0xff]  ;;  %v2425_v39 = vld [vmem:[%s9213_s3 + $0xf8] sm:$0xff] }
 0x2ea   : > { %2642 = vmatmul.mubr.f32.gmra.mrb[148].mxu0 %v7718_v25  ;;  %5155 = vmatmul.mubr.f32.gmra.mrb[180].mxu1 %v7775_v1  ;;  %v2418_v25 = vld [vmem:[%s9213_s3 + $0xc0] sm:$0xff]  ;;  %2356 = vst [vmem:[#allocation2 + $0x1a9] sm:$0x1] %v2338_v58  ;;  %v4544_v18 = vld [vmem:[%s9213_s3 + $0x408] sm:$0xff]  ;;  %v5698_v31 = vpack.c.bf16 %v2425_v39, %v2424_v49  ;;  %v4545_v23 = vld [vmem:[%s9213_s3 + $0x410] sm:$0xff] }
 0x2eb   : > { %2646 = vmatprep.mubr.f32.mxu0 %v7730_v50  ;;  %5157 = vmatprep.mubr.f32.mxu1 %v7777_v44  ;;  %v5689_v42 = vpack.c.bf16 %v2419_v4, %v2418_v25  ;;  %v4546_v15 = vld [vmem:[%s9213_s3 + $0x418] sm:$0xff]  ;;  %v4547_v14 = vld [vmem:[%s9213_s3 + $0x420] sm:$0xff]  ;;  %v4548_v13 = vld [vmem:[%s9213_s3 + $0x428] sm:$0xff] }
 0x2ec   : > { %5684 = vmatpush1.bf16.msra.mxu1 %v5683_v29  ;;  %v5784_v61 = vpack.c.bf16 %v4546_v15, %v4545_v23  ;;  %v2361_v22 = vld [vmem:[#allocation2 + $0x20] sm:$0xff]  ;;  %v5788_v47 = vpack.c.bf16 %v4548_v13, %v4547_v14  ;;  %v4549_v46 = vld [vmem:[%s9213_s3 + $0x430] sm:$0xff]  ;;  %v4550_v48 = vld [vmem:[%s9213_s3 + $0x438] sm:$0xff] }
 0x2ed   : > { %5685 = vmatprep.subr.bf16.mxu1 %v5833_v3  ;;  %v8037_v17 = vld [vmem:[#allocation2 + $0x30] sm:$0xff]  ;;  %v5792_v2 = vpack.c.bf16 %v4550_v48, %v4549_v46  ;;  %v4552_v32 = vld [vmem:[%s9213_s3 + $0x448] sm:$0xff]  ;;  %v8048_v41 = vld [vmem:[#allocation2 + $0x38] sm:$0xff] }
 0x2ee   : > { %2647 = vmatmul.mubr.f32.gmra.mrb[150].mxu0 %v7720_v28  ;;  %5158 = vmatmul.mubr.f32.gmra.mrb[182].mxu1 %v7779_v26  ;;  %v2421_v28 = vld [vmem:[%s9213_s3 + $0xd8] sm:$0xff]  ;;  %v8059_v16 = vld [vmem:[#allocation2 + $0x48] sm:$0xff]  ;;  %v8071_v57 = vld [vmem:[#allocation2 + $0x50] sm:$0xff] }
 0x2ef   : > { %2651 = vmatprep.mubr.f32.mxu0 %v7732_v38  ;;  %5160 = vmatprep.mubr.f32.mxu1 %v7781_v55  ;;  %v5692_v59 = vpack.c.bf16 %v2421_v28, %v2420_v20  ;;  %v4554_v9 = vld [vmem:[%s9213_s3 + $0x458] sm:$0xff]  ;;  %v4556_v43 = vld [vmem:[%s9213_s3 + $0x468] sm:$0xff]  ;;  %v8083_v54 = vld [vmem:[#allocation2 + $0x60] sm:$0xff] }
 0x2f0   : > { %5687 = vmatpush1.bf16.msra.mxu1 %v5686_v10  ;;  %v4558_v8 = vld [vmem:[%s9213_s3 + $0x478] sm:$0xff]  ;;  %v4513_v25 = vld [vmem:[%s9213_s3 + $0x310] sm:$0xff]  ;;  %v4515_v5 = vld [vmem:[%s9213_s3 + $0x320] sm:$0xff] }
 0x2f1   : > { %5688 = vmatprep.subr.bf16.mxu1 %v5833_v3  ;;  %v8095_v10 = vld [vmem:[#allocation2 + $0x78] sm:$0xff]  ;;  %v2378_v27 = vld [vmem:[#allocation2 + $0xf0] sm:$0xff]  ;;  %v2380_v49 = vld [vmem:[#allocation2 + $0x108] sm:$0xff] }
 0x2f2   : > { %2652 = vmatmul.mubr.f32.gmra.mrb[152].mxu0 %v7722_v6  ;;  %5161 = vmatmul.mubr.f32.gmra.mrb[184].mxu1 %v7796_v60  ;;  %v5695_v6 = vpack.c.bf16 %v2423_v62, %v2422_v11  ;;  %v4514_v4 = vld [vmem:[%s9213_s3 + $0x318] sm:$0xff]  ;;  %v4517_v28 = vld [vmem:[%s9213_s3 + $0x330] sm:$0xff]  ;;  %v4519_v62 = vld [vmem:[%s9213_s3 + $0x340] sm:$0xff] }
 0x2f3   : > { %2656 = vmatprep.mubr.f32.mxu0 %v7734_v7  ;;  %5163 = vmatprep.mubr.f32.mxu1 %v7799_v40  ;;  %v5736_v24 = vpack.c.bf16 %v4514_v4, %v4513_v25  ;;  %v2379_v58 = vld [vmem:[#allocation2 + $0xf8] sm:$0xff]  ;;  %v4524_v23 = vld [vmem:[%s9213_s3 + $0x368] sm:$0xff]  ;;  %v2382_v15 = vld [vmem:[#allocation2 + $0x120] sm:$0xff] }
 0x2f4   : > { %5690 = vmatpush1.bf16.msra.mxu1 %v5689_v42  ;;  %v4516_v42 = vld [vmem:[%s9213_s3 + $0x328] sm:$0xff]  ;;  %v4526_v14 = vld [vmem:[%s9213_s3 + $0x378] sm:$0xff] }
 0x2f5   : > { %5691 = vmatprep.subr.bf16.mxu1 %v5833_v3  ;;  %v5739_v20 = vpack.c.bf16 %v4516_v42, %v4515_v5  ;;  %v2383_v13 = vld [vmem:[#allocation2 + $0x128] sm:$0xff]  ;;  %v2384_v46 = vld [vmem:[#allocation2 + $0x138] sm:$0xff] }
 0x2f6   : > { %2657 = vmatmul.mubr.f32.gmra.mrb[154].mxu0 %v7730_v50  ;;  %5164 = vmatmul.mubr.f32.gmra.mrb[186].mxu1 %v7802_v19  ;;  %v4543_v50 = vld [vmem:[%s9213_s3 + $0x400] sm:$0xff]  ;;  %v3431_v25 = vld [vmem:[#allocation2 + $0x32] sm:$0xff]  ;;  %v3433_v5 = vld [vmem:[#allocation2 + $0x4a] sm:$0xff] }
 0x2f7   : > { %2661 = vmatprep.mubr.f32.mxu0 %v7736_v53  ;;  %5166 = vmatprep.mubr.f32.mxu1 %v7805_v0  ;;  %v5780_v21 = vpack.c.bf16 %v4544_v18, %v4543_v50  ;;  %v4521_v50 = vld [vmem:[%s9213_s3 + $0x350] sm:$0xff]  ;;  %v4522_v18 = vld [vmem:[%s9213_s3 + $0x358] sm:$0xff]  ;;  %v3427_v4 = vld [vmem:[#allocation2 + $0x2] sm:$0xff] }
 0x2f8   : > { %5693 = vmatpush1.bf16.msra.mxu1 %v5692_v59  ;;  %v4518_v59 = vld [vmem:[%s9213_s3 + $0x338] sm:$0xff]  ;;  %v3428_v42 = vld [vmem:[#allocation2 + $0xa] sm:$0xff] }
 0x2f9   : > { %5694 = vmatprep.subr.bf16.mxu1 %v5833_v3  ;;  %v5742_v11 = vpack.c.bf16 %v4518_v59, %v4517_v28  ;;  %v8282_v28 = vld [vmem:[#allocation2 + $0x7a] sm:$0xff]  ;;  %v8285_v59 = vld [vmem:[#allocation2 + $0x82] sm:$0xff] }
 0x2fa   : > { %2662 = vmatmul.mubr.f32.gmra.mrb[156].mxu0 %v7732_v38  ;;  %5167 = vmatmul.mubr.f32.gmra.mrb[188].mxu1 %v7667_v51  ;;  %v2360_v38 = vld [vmem:[#allocation2 + $0x18] sm:$0xff] }
 0x2fb   : > { %2666 = vmatprep.mubr.f32.mxu0 %v7745_v35  ;;  %5169 = vmatprep.mubr.f32.mxu1 %v7799_v40 }
 0x2fc   : > { %5696 = vmatpush1.bf16.msra.mxu1 %v5695_v6  ;;  %v4520_v6 = vld [vmem:[%s9213_s3 + $0x348] sm:$0xff] }
 0x2fd   : > { %5697 = vmatprep.subr.bf16.mxu1 %v5833_v3  ;;  %v5745_v39 = vpack.c.bf16 %v4520_v6, %v4519_v62  ;;  %v8294_v62 = vld [vmem:[#allocation2 + $0xaa] sm:$0xff] }
 0x2fe   : > { %2667 = vmatmul.mubr.f32.gmra.mrb[158].mxu0 %v7734_v7  ;;  %5170 = vmatmul.mubr.f32.gmra.mrb[190].mxu1 %v7802_v19  ;;  %v2358_v7 = vld [vmem:[#allocation2] sm:$0xff] }
 0x2ff   : > { %2671 = vmatprep.mubr.f32.mxu0 %v7747_v37  ;;  %3041 = vmatprep.mubr.f32.mxu1 %v2360_v38 }
 0x300   : > { %5699 = vmatpush1.bf16.msra.mxu1 %v5698_v31  ;;  %v2381_v31 = vld [vmem:[#allocation2 + $0x110] sm:$0xff] }
 0x301   : > { %5781 = vmatprep.subr.bf16.mxu1 %v5780_v21 }
 0x302   : > { %2672 = vmatmul.mubr.f32.gmra.mrb[160].mxu0 %v7736_v53  ;;  %v2359_v53 = vld [vmem:[#allocation2 + $0x8] sm:$0xff] }
 0x303   : > { %3042 = vmatmul.mubr.f32.vlgmr.msra.gmra.mrb[192].mxu1 %v2358_v7  ;;  %2676 = vmatprep.mubr.f32.mxu0 %v7749_v45  ;;  %v4525_v7 = vld [vmem:[%s9213_s3 + $0x370] sm:$0xff] }
 0x304   : > { %3046 = vmatprep.mubr.f32.mxu1 %v2361_v22  ;;  %5783 = vmatpush3.bf16.msra.mxu1 %v5780_v21  ;;  %v5748_v21 = vpack.c.bf16 %v4522_v18, %v4521_v50  ;;  %v8297_v18 = vld [vmem:[#allocation2 + $0xb2] sm:$0xff] }
 0x305   : > { %5785 = vmatprep.subr.bf16.mxu1 %v5784_v61 }
 0x306   : > { %2677 = vmatmul.mubr.f32.gmra.mrb[162].mxu0 %v7745_v35  ;;  %v4551_v35 = vld [vmem:[%s9213_s3 + $0x440] sm:$0xff] }
 0x307   : > { %3047 = vmatmul.mubr.f32.gmra.mrb[194].mxu1 %v2359_v53  ;;  %2681 = vmatprep.mubr.f32.mxu0 %v7751_v34  ;;  %v5796_v63 = vpack.c.bf16 %v4552_v32, %v4551_v35  ;;  %v4528_v53 = vld [vmem:[%s9213_s3 + $0x388] sm:$0xff]  ;;  %v2385_v35 = vld [vmem:[#allocation2 + $0x140] sm:$0xff] }
 0x308   : > { %3051 = vmatprep.mubr.f32.mxu1 %v8037_v17  ;;  %5787 = vmatpush3.bf16.msra.mxu1 %v5784_v61 }
 0x309   : > { %5789 = vmatprep.subr.bf16.mxu1 %v5788_v47 }
 0x30a   : > { %2682 = vmatmul.mubr.f32.gmra.mrb[164].mxu0 %v7747_v37  ;;  %v4553_v37 = vld [vmem:[%s9213_s3 + $0x450] sm:$0xff] }
 0x30b   : > { %3052 = vmatmul.mubr.f32.gmra.mrb[196].mxu1 %v2360_v38  ;;  %2686 = vmatprep.mubr.f32.mxu0 %v7759_v36  ;;  %v5800_v29 = vpack.c.bf16 %v4554_v9, %v4553_v37  ;;  %v4523_v38 = vld [vmem:[%s9213_s3 + $0x360] sm:$0xff]  ;;  %v2386_v37 = vld [vmem:[#allocation2 + $0x150] sm:$0xff] }
 0x30c   : > { %3056 = vmatprep.mubr.f32.mxu1 %v8048_v41  ;;  %5791 = vmatpush3.bf16.msra.mxu1 %v5788_v47  ;;  %v5751_v61 = vpack.c.bf16 %v4524_v23, %v4523_v38  ;;  %v4527_v47 = vld [vmem:[%s9213_s3 + $0x380] sm:$0xff] }
 0x30d   : > { %5793 = vmatprep.subr.bf16.mxu1 %v5792_v2  ;;  %v5757_v48 = vpack.c.bf16 %v4528_v53, %v4527_v47 }
 0x30e   : > { %2687 = vmatmul.mubr.f32.gmra.mrb[166].mxu0 %v7749_v45  ;;  %v4555_v45 = vld [vmem:[%s9213_s3 + $0x460] sm:$0xff] }
 0x30f   : > { %3057 = vmatmul.mubr.f32.gmra.mrb[198].mxu1 %v2361_v22  ;;  %2691 = vmatprep.mubr.f32.mxu0 %v7761_v33  ;;  %v5804_v30 = vpack.c.bf16 %v4556_v43, %v4555_v45  ;;  %v5754_v22 = vpack.c.bf16 %v4526_v14, %v4525_v7  ;;  %v2387_v45 = vld [vmem:[#allocation2 + $0x158] sm:$0xff]  ;;  %v8307_v14 = vld [vmem:[#allocation2 + $0xca] sm:$0xff] }
 0x310   : > { %3061 = vmatprep.mubr.f32.mxu1 %v8059_v16  ;;  %5795 = vmatpush3.bf16.msra.mxu1 %v5792_v2  ;;  %v4530_v2 = vld [vmem:[%s9213_s3 + $0x398] sm:$0xff] }
 0x311   : > { %5797 = vmatprep.subr.bf16.mxu1 %v5796_v63 }
 0x312   : > { %2692 = vmatmul.mubr.f32.gmra.mrb[168].mxu0 %v7751_v34  ;;  %v4557_v34 = vld [vmem:[%s9213_s3 + $0x470] sm:$0xff] }
 0x313   : > { %3062 = vmatmul.mubr.f32.gmra.mrb[200].mxu1 %v8037_v17  ;;  %2696 = vmatprep.mubr.f32.mxu0 %v7763_v52  ;;  %v5808_v56 = vpack.c.bf16 %v4558_v8, %v4557_v34  ;;  %v2388_v34 = vld [vmem:[#allocation2 + $0x168] sm:$0xff] }
 0x314   : > { %3066 = vmatprep.mubr.f32.mxu1 %v8071_v57  ;;  %5799 = vmatpush3.bf16.msra.mxu1 %v5796_v63  ;;  %v4532_v63 = vld [vmem:[%s9213_s3 + $0x3a8] sm:$0xff] }
 0x315   : > { %5801 = vmatprep.subr.bf16.mxu1 %v5800_v29 }
 0x316   : > { %2697 = vmatmul.mubr.f32.gmra.mrb[170].mxu0 %v7759_v36  ;;  %v8089_v36 = vld [vmem:[#allocation2 + $0x68] sm:$0xff] }
 0x317   : > { %3067 = vmatmul.mubr.f32.gmra.mrb[202].mxu1 %v8048_v41  ;;  %2701 = vmatprep.mubr.f32.mxu0 %v7765_v12 }
 0x318   : > { %3071 = vmatprep.mubr.f32.mxu1 %v8083_v54  ;;  %5803 = vmatpush3.bf16.msra.mxu1 %v5800_v29  ;;  %v4534_v29 = vld [vmem:[%s9213_s3 + $0x3b8] sm:$0xff] }
 0x319   : > { %5805 = vmatprep.subr.bf16.mxu1 %v5804_v30 }
 0x31a   : > { %2702 = vmatmul.mubr.f32.gmra.mrb[172].mxu0 %v7761_v33  ;;  %v8101_v33 = vld [vmem:[#allocation2 + $0x80] sm:$0xff] }
 0x31b   : > { %3072 = vmatmul.mubr.f32.gmra.mrb[204].mxu1 %v8059_v16  ;;  %2706 = vmatprep.mubr.f32.mxu0 %v7775_v1 }
 0x31c   : > { %3076 = vmatprep.mubr.f32.mxu1 %v8089_v36  ;;  %5807 = vmatpush3.bf16.msra.mxu1 %v5804_v30  ;;  %v4536_v30 = vld [vmem:[%s9213_s3 + $0x3c8] sm:$0xff] }
 0x31d   : > { %5809 = vmatprep.subr.bf16.mxu1 %v5808_v56 }
 0x31e   : > { %2707 = vmatmul.mubr.f32.gmra.mrb[174].mxu0 %v7763_v52  ;;  %v8107_v52 = vld [vmem:[#allocation2 + $0x90] sm:$0xff] }
 0x31f   : > { %3077 = vmatmul.mubr.f32.gmra.mrb[206].mxu1 %v8071_v57  ;;  %2711 = vmatprep.mubr.f32.mxu0 %v7777_v44 }
 0x320   : > { %3081 = vmatprep.mubr.f32.mxu1 %v8095_v10  ;;  %5811 = vmatpush3.bf16.msra.mxu1 %v5808_v56  ;;  %v4538_v56 = vld [vmem:[%s9213_s3 + $0x3d8] sm:$0xff] }
 0x322   : > { %2712 = vmatmul.mubr.f32.gmra.mrb[176].mxu0 %v7765_v12  ;;  %v8113_v12 = vld [vmem:[#allocation2 + $0x98] sm:$0xff] }
 0x323   : > { %3082 = vmatmul.mubr.f32.gmra.mrb[208].mxu1 %v8083_v54  ;;  %2716 = vmatprep.mubr.f32.mxu0 %v7779_v26 }
 0x324   : > { %3086 = vmatprep.mubr.f32.mxu1 %v8101_v33 }
 0x326   : > { %2717 = vmatmul.mubr.f32.gmra.mrb[178].mxu0 %v7775_v1  ;;  %v8119_v1 = vld [vmem:[#allocation2 + $0xa8] sm:$0xff] }
 0x327   : > { %3087 = vmatmul.mubr.f32.gmra.mrb[210].mxu1 %v8089_v36  ;;  %2721 = vmatprep.mubr.f32.mxu0 %v7781_v55 }
 0x328   : > { %3091 = vmatprep.mubr.f32.mxu1 %v8107_v52 }
 0x32a   : > { %2722 = vmatmul.mubr.f32.gmra.mrb[180].mxu0 %v7777_v44  ;;  %v8125_v44 = vld [vmem:[#allocation2 + $0xb0] sm:$0xff] }
 0x32b   : > { %3092 = vmatmul.mubr.f32.gmra.mrb[212].mxu1 %v8095_v10  ;;  %2726 = vmatprep.mubr.f32.mxu0 %v7796_v60 }
 0x32c   : > { %3096 = vmatprep.mubr.f32.mxu1 %v8113_v12 }
 0x32e   : > { %2727 = vmatmul.mubr.f32.gmra.mrb[182].mxu0 %v7779_v26  ;;  %v8131_v26 = vld [vmem:[#allocation2 + $0xc0] sm:$0xff] }
 0x32f   : > { %3097 = vmatmul.mubr.f32.gmra.mrb[214].mxu1 %v8101_v33  ;;  %2731 = vmatprep.mubr.f32.mxu0 %v7799_v40 }
 0x330   : > { %3101 = vmatprep.mubr.f32.mxu1 %v8119_v1 }
 0x332   : > { %2732 = vmatmul.mubr.f32.gmra.mrb[184].mxu0 %v7781_v55  ;;  %v8137_v55 = vld [vmem:[#allocation2 + $0xc8] sm:$0xff] }
 0x333   : > { %3102 = vmatmul.mubr.f32.gmra.mrb[216].mxu1 %v8107_v52  ;;  %2736 = vmatprep.mubr.f32.mxu0 %v7802_v19 }
 0x334   : > { %3106 = vmatprep.mubr.f32.mxu1 %v8125_v44 }
 0x336   : > { %2737 = vmatmul.mubr.f32.gmra.mrb[186].mxu0 %v7796_v60  ;;  %v4511_v60 = vld [vmem:[%s9213_s3 + $0x300] sm:$0xff] }
 0x337   : > { %3107 = vmatmul.mubr.f32.gmra.mrb[218].mxu1 %v8113_v12  ;;  %2741 = vmatprep.mubr.f32.mxu0 %v7805_v0  ;;  %v4512_v0 = vld [vmem:[%s9213_s3 + $0x308] sm:$0xff] }
 0x338   : > { %3111 = vmatprep.mubr.f32.mxu1 %v8131_v26 }
 0x33a   : > { %2742 = vmatmul.mubr.f32.gmra.mrb[188].mxu0 %v7799_v40  ;;  %v8148_v40 = vld [vmem:[#allocation2 + $0xd8] sm:$0xff] }
 0x33b   : > { %3112 = vmatmul.mubr.f32.gmra.mrb[220].mxu1 %v8119_v1  ;;  %2746 = vmatprep.mubr.f32.mxu0 %v7667_v51  ;;  %v5733_v51 = vpack.c.bf16 %v4512_v0, %v4511_v60  ;;  %v2392_v60 = vld [vmem:[#allocation2 + $0x198] sm:$0xff] }
 0x33c   : > { %3116 = vmatprep.mubr.f32.mxu1 %v8137_v55 }
 0x33e   : > { %2747 = vmatmul.mubr.f32.gmra.mrb[190].mxu0 %v7802_v19  ;;  %v8160_v19 = vld [vmem:[#allocation2 + $0xe0] sm:$0xff] }
 0x33f   : > { %3117 = vmatmul.mubr.f32.gmra.mrb[222].mxu1 %v8125_v44  ;;  %5204 = vmatprep.mubr.f32.mxu0 %v8037_v17  ;;  %v4529_v17 = vld [vmem:[%s9213_s3 + $0x390] sm:$0xff] }
 0x340   : > { %3121 = vmatprep.mubr.f32.mxu1 %v8148_v40  ;;  %v5760_v32 = vpack.c.bf16 %v4530_v2, %v4529_v17  ;;  %v8316_v17 = vld [vmem:[#allocation2 + $0xe2] sm:$0xff]  ;;  %v8319_v2 = vld [vmem:[#allocation2 + $0xf2] sm:$0xff] }
 0x342   : > { %5205 = vmatmul.mubr.f32.vlgmr.msra.gmra.mrb[192].mxu0 %v8048_v41  ;;  %v4531_v41 = vld [vmem:[%s9213_s3 + $0x3a0] sm:$0xff] }
 0x343   : > { %3122 = vmatmul.mubr.f32.gmra.mrb[224].mxu1 %v8131_v26  ;;  %5207 = vmatprep.mubr.f32.mxu0 %v8059_v16  ;;  %v5763_v9 = vpack.c.bf16 %v4532_v63, %v4531_v41  ;;  %v4533_v16 = vld [vmem:[%s9213_s3 + $0x3b0] sm:$0xff] }
 0x344   : > { %3126 = vmatprep.mubr.f32.mxu1 %v8160_v19  ;;  %5734 = vmatpush1.bf16.msra.mxu0 %v5733_v51  ;;  %v5766_v43 = vpack.c.bf16 %v4534_v29, %v4533_v16  ;;  %v3429_v51 = vld [vmem:[#allocation2 + $0x1a] sm:$0xff]  ;;  %v8328_v16 = vld [vmem:[#allocation2 + $0x10a] sm:$0xff] }
 0x345   : > { %5735 = vmatprep.subr.bf16.mxu0 %v5833_v3 }
 0x346   : > { %5208 = vmatmul.mubr.f32.gmra.mrb[194].mxu0 %v8071_v57  ;;  %v4535_v57 = vld [vmem:[%s9213_s3 + $0x3c0] sm:$0xff] }
 0x347   : > { %3127 = vmatmul.mubr.f32.gmra.mrb[226].mxu1 %v8137_v55  ;;  %5210 = vmatprep.mubr.f32.mxu0 %v8083_v54  ;;  %v5769_v8 = vpack.c.bf16 %v4536_v30, %v4535_v57  ;;  %v4537_v54 = vld [vmem:[%s9213_s3 + $0x3d0] sm:$0xff] }
 0x348   : > { %3131 = vmatprep.mubr.f32.mxu1 %v2378_v27  ;;  %5737 = vmatpush1.bf16.msra.mxu0 %v5736_v24  ;;  %v3430_v24 = vld [vmem:[#allocation2 + $0x22] sm:$0xff] }
 0x349   : > { %5738 = vmatprep.subr.bf16.mxu0 %v5833_v3 }
 0x34a   : > { %5211 = vmatmul.mubr.f32.gmra.mrb[196].mxu0 %v8089_v36  ;;  %v2389_v36 = vld [vmem:[#allocation2 + $0x170] sm:$0xff] }
 0x34b   : > { %3132 = vmatmul.mubr.f32.gmra.mrb[228].mxu1 %v8148_v40  ;;  %5213 = vmatprep.mubr.f32.mxu0 %v8095_v10  ;;  %v5772_v10 = vpack.c.bf16 %v4538_v56, %v4537_v54 }
 0x34c   : > { %3136 = vmatprep.mubr.f32.mxu1 %v2379_v58  ;;  %5740 = vmatpush1.bf16.msra.mxu0 %v5739_v20  ;;  %v8279_v20 = vld [vmem:[#allocation2 + $0x6a] sm:$0xff] }
 0x34d   : > { %5741 = vmatprep.subr.bf16.mxu0 %v5833_v3 }
 0x34e   : > { %5214 = vmatmul.mubr.f32.gmra.mrb[198].mxu0 %v8101_v33  ;;  %v4539_v33 = vld [vmem:[%s9213_s3 + $0x3e0] sm:$0xff] }
 0x34f   : > { %3137 = vmatmul.mubr.f32.gmra.mrb[230].mxu1 %v8160_v19  ;;  %5216 = vmatprep.mubr.f32.mxu0 %v8107_v52  ;;  %v4540_v52 = vld [vmem:[%s9213_s3 + $0x3e8] sm:$0xff] }
 0x350   : > { %3141 = vmatprep.mubr.f32.mxu1 %v2380_v49  ;;  %5743 = vmatpush1.bf16.msra.mxu0 %v5742_v11  ;;  %v8291_v11 = vld [vmem:[#allocation2 + $0x9a] sm:$0xff] }
 0x351   : > { %5744 = vmatprep.subr.bf16.mxu0 %v5833_v3 }
 0x352   : > { %5217 = vmatmul.mubr.f32.gmra.mrb[200].mxu0 %v8113_v12  ;;  %v2390_v12 = vld [vmem:[#allocation2 + $0x180] sm:$0xff] }
 0x353   : > { %3142 = vmatmul.mubr.f32.gmra.mrb[232].mxu1 %v2378_v27  ;;  %5219 = vmatprep.mubr.f32.mxu0 %v8119_v1  ;;  %v5775_v1 = vpack.c.bf16 %v4540_v52, %v4539_v33  ;;  %v8346_v52 = vld [vmem:[#allocation2 + $0x12a] sm:$0xff] }
 0x354   : > { %3146 = vmatprep.mubr.f32.mxu1 %v2381_v31  ;;  %5746 = vmatpush1.bf16.msra.mxu0 %v5745_v39 }
 0x355   : > { %5747 = vmatprep.subr.bf16.mxu0 %v5833_v3 }
 0x356   : > { %5220 = vmatmul.mubr.f32.gmra.mrb[202].mxu0 %v8125_v44  ;;  %v2391_v44 = vld [vmem:[#allocation2 + $0x188] sm:$0xff] }
 0x357   : > { %3147 = vmatmul.mubr.f32.gmra.mrb[234].mxu1 %v2379_v58  ;;  %5222 = vmatprep.mubr.f32.mxu0 %v8131_v26  ;;  %v4541_v26 = vld [vmem:[%s9213_s3 + $0x3f0] sm:$0xff] }
 0x358   : > { %3151 = vmatprep.mubr.f32.mxu1 %v2382_v15  ;;  %5749 = vmatpush1.bf16.msra.mxu0 %v5748_v21  ;;  %v8302_v21 = vld [vmem:[#allocation2 + $0xc2] sm:$0xff] }
 0x359   : > { %5750 = vmatprep.subr.bf16.mxu0 %v5833_v3 }
 0x35a   : > { %5223 = vmatmul.mubr.f32.gmra.mrb[204].mxu0 %v8137_v55  ;;  %v4542_v55 = vld [vmem:[%s9213_s3 + $0x3f8] sm:$0xff] }
 0x35b   : > { %3152 = vmatmul.mubr.f32.gmra.mrb[236].mxu1 %v2380_v49  ;;  %5225 = vmatprep.mubr.f32.mxu0 %v8148_v40  ;;  %v5778_v0 = vpack.c.bf16 %v4542_v55, %v4541_v26  ;;  %v2393_v40 = vld [vmem:[#allocation2 + $0x1a0] sm:$0xff] }
 0x35c   : > { %3156 = vmatprep.mubr.f32.mxu1 %v2383_v13  ;;  %5752 = vmatpush1.bf16.msra.mxu0 %v5751_v61 }
 0x35d   : > { %5753 = vmatprep.subr.bf16.mxu0 %v5833_v3 }
 0x35e   : > { %5226 = vmatmul.mubr.f32.gmra.mrb[206].mxu0 %v8160_v19  ;;  %v3432_v19 = vld [vmem:[#allocation2 + $0x3a] sm:$0xff] }
 0x35f   : > { %3157 = vmatmul.mubr.f32.gmra.mrb[238].mxu1 %v2381_v31  ;;  %5228 = vmatprep.mubr.f32.mxu0 %v2378_v27  ;;  %v3434_v27 = vld [vmem:[#allocation2 + $0x52] sm:$0xff] }
 0x360   : > { %3161 = vmatprep.mubr.f32.mxu1 %v2384_v46  ;;  %5755 = vmatpush1.bf16.msra.mxu0 %v5754_v22 }
 0x361   : > { %5756 = vmatprep.subr.bf16.mxu0 %v5833_v3 }
 0x362   : > { %5229 = vmatmul.mubr.f32.gmra.mrb[208].mxu0 %v2379_v58  ;;  %v8288_v58 = vld [vmem:[#allocation2 + $0x92] sm:$0xff] }
 0x363   : > { %3162 = vmatmul.mubr.f32.gmra.mrb[240].mxu1 %v2382_v15  ;;  %5231 = vmatprep.mubr.f32.mxu0 %v2380_v49 }
 0x364   : > { %3166 = vmatprep.mubr.f32.mxu1 %v2385_v35  ;;  %5758 = vmatpush1.bf16.msra.mxu0 %v5757_v48 }
 0x365   : > { %5759 = vmatprep.subr.bf16.mxu0 %v5833_v3 }
 0x366   : > { %5232 = vmatmul.mubr.f32.gmra.mrb[210].mxu0 %v2381_v31 }
 0x367   : > { %3167 = vmatmul.mubr.f32.gmra.mrb[242].mxu1 %v2383_v13  ;;  %5234 = vmatprep.mubr.f32.mxu0 %v2382_v15 }
 0x368   : > { %3171 = vmatprep.mubr.f32.mxu1 %v2386_v37  ;;  %5761 = vmatpush1.bf16.msra.mxu0 %v5760_v32 }
 0x369   : > { %5762 = vmatprep.subr.bf16.mxu0 %v5833_v3 }
 0x36a   : > { %5235 = vmatmul.mubr.f32.gmra.mrb[212].mxu0 %v2383_v13  ;;  %v8310_v13 = vld [vmem:[#allocation2 + $0xda] sm:$0xff] }
 0x36b   : > { %3172 = vmatmul.mubr.f32.gmra.mrb[244].mxu1 %v2384_v46  ;;  %5237 = vmatprep.mubr.f32.mxu0 %v2384_v46 }
 0x36c   : > { %3176 = vmatprep.mubr.f32.mxu1 %v2387_v45  ;;  %5764 = vmatpush1.bf16.msra.mxu0 %v5763_v9  ;;  %v8325_v9 = vld [vmem:[#allocation2 + $0xfa] sm:$0xff] }
 0x36d   : > { %5765 = vmatprep.subr.bf16.mxu0 %v5833_v3 }
 0x36e   : > { %5238 = vmatmul.mubr.f32.gmra.mrb[214].mxu0 %v2385_v35 }
 0x36f   : > { %3177 = vmatmul.mubr.f32.gmra.mrb[246].mxu1 %v2385_v35  ;;  %5240 = vmatprep.mubr.f32.mxu0 %v2386_v37 }
 0x370   : > { %3181 = vmatprep.mubr.f32.mxu1 %v2388_v34  ;;  %5767 = vmatpush1.bf16.msra.mxu0 %v5766_v43 }
 0x371   : > { %5768 = vmatprep.subr.bf16.mxu0 %v5833_v3 }
 0x372   : > { %5241 = vmatmul.mubr.f32.gmra.mrb[216].mxu0 %v2387_v45 }
 0x373   : > { %3182 = vmatmul.mubr.f32.gmra.mrb[248].mxu1 %v2386_v37  ;;  %5243 = vmatprep.mubr.f32.mxu0 %v2388_v34 }
 0x374   : > { %3186 = vmatprep.mubr.f32.mxu1 %v2389_v36  ;;  %5770 = vmatpush1.bf16.msra.mxu0 %v5769_v8  ;;  %v8338_v8 = vld [vmem:[#allocation2 + $0x122] sm:$0xff] }
 0x375   : > { %5771 = vmatprep.subr.bf16.mxu0 %v5833_v3 }
 0x376   : > { %5244 = vmatmul.mubr.f32.gmra.mrb[218].mxu0 %v2389_v36 }
 0x377   : > { %3187 = vmatmul.mubr.f32.gmra.mrb[250].mxu1 %v2387_v45  ;;  %5246 = vmatprep.mubr.f32.mxu0 %v2390_v12 }
 0x378   : > { %3191 = vmatprep.mubr.f32.mxu1 %v2390_v12  ;;  %5773 = vmatpush1.bf16.msra.mxu0 %v5772_v10  ;;  %v8350_v12 = vld [vmem:[#allocation2 + $0x13a] sm:$0xff] }
 0x379   : > { %5774 = vmatprep.subr.bf16.mxu0 %v5833_v3 }
 0x37a   : > { %5247 = vmatmul.mubr.f32.gmra.mrb[220].mxu0 %v2391_v44 }
 0x37b   : > { %3192 = vmatmul.mubr.f32.gmra.mrb[252].mxu1 %v2388_v34  ;;  %5249 = vmatprep.mubr.f32.mxu0 %v2392_v60  ;;  %v8334_v34 = vld [vmem:[#allocation2 + $0x112] sm:$0xff] }
 0x37c   : > { %3196 = vmatprep.mubr.f32.mxu1 %v2391_v44  ;;  %5776 = vmatpush1.bf16.msra.mxu0 %v5775_v1 }
 0x37d   : > { %5777 = vmatprep.subr.bf16.mxu0 %v5833_v3  ;;  %v3435_v3 = vld [vmem:[#allocation2 + $0x62] sm:$0xff] }
 0x37e   : > { %5250 = vmatmul.mubr.f32.gmra.mrb[222].mxu0 %v2393_v40  ;;  %v8362_v40 = vld [vmem:[#allocation2 + $0x152] sm:$0xff] }
 0x37f   : > { %3197 = vmatmul.mubr.f32.gmra.mrb[254].mxu1 %v2389_v36  ;;  %3576 = vmatprep.mubr.f32.mxu0 %v3429_v51 }
 0x380   : > { %5779 = vmatpush1.bf16.msra.mxu0 %v5778_v0  ;;  %5284 = vmatprep.mubr.f32.mxu1 %v3431_v25  ;;  %v8358_v0 = vld [vmem:[#allocation2 + $0x142] sm:$0xff] }
 0x383   : > { %3577 = vmatmul.mubr.f32.vlgmr.msra.gmra.mrb[224].mxu0 %v3427_v4  ;;  %5285 = vmatmul.mubr.f32.vlgmr.msra.gmra.mrb[0].mxu1 %v3432_v19 }
 0x384   : > { %3581 = vmatprep.mubr.f32.mxu0 %v3430_v24  ;;  %5287 = vmatprep.mubr.f32.mxu1 %v3433_v5 }
 0x387   : > { %3582 = vmatmul.mubr.f32.gmra.mrb[226].mxu0 %v3428_v42  ;;  %5288 = vmatmul.mubr.f32.gmra.mrb[2].mxu1 %v3434_v27  ;;  %v8374_v42 = vld [vmem:[#allocation2 + $0x16a] sm:$0xff] }
 0x388   : > { %3586 = vmatprep.mubr.f32.mxu0 %v3431_v25  ;;  %5290 = vmatprep.mubr.f32.mxu1 %v3435_v3 }
 0x38b   : > { %3587 = vmatmul.mubr.f32.gmra.mrb[228].mxu0 %v3429_v51  ;;  %5291 = vmatmul.mubr.f32.gmra.mrb[4].mxu1 %v8279_v20 }
 0x38c   : > { %3591 = vmatprep.mubr.f32.mxu0 %v3432_v19  ;;  %5293 = vmatprep.mubr.f32.mxu1 %v8282_v28 }
 0x38f   : > { %3592 = vmatmul.mubr.f32.gmra.mrb[230].mxu0 %v3430_v24  ;;  %5294 = vmatmul.mubr.f32.gmra.mrb[6].mxu1 %v8285_v59 }
 0x390   : > { %3596 = vmatprep.mubr.f32.mxu0 %v3433_v5  ;;  %5296 = vmatprep.mubr.f32.mxu1 %v8288_v58 }
 0x393   : > { %3597 = vmatmul.mubr.f32.gmra.mrb[232].mxu0 %v3431_v25  ;;  %5297 = vmatmul.mubr.f32.gmra.mrb[8].mxu1 %v8291_v11 }
 0x394   : > { %3601 = vmatprep.mubr.f32.mxu0 %v3434_v27  ;;  %5299 = vmatprep.mubr.f32.mxu1 %v8294_v62 }
 0x395   : > { %v2593_v6 = vpop.f32.mrb[128].mxu0  ;;  %v5126_v49 = vpop.f32.mrb[160].mxu1 }
 0x396   : > { %v2595_v39 = vpop.f32.mrb[129].mxu0  ;;  %v2818_v50 = vpop.f32.mrb[161].mxu1 }
 0x397   : > { %v8299_v31 = vadd.f32 %v2818_v50, %v2593_v6  ;;  %3602 = vmatmul.mubr.f32.gmra.mrb[234].mxu0 %v3432_v19  ;;  %5300 = vmatmul.mubr.f32.gmra.mrb[10].mxu1 %v8297_v18  ;;  %v8384_v6 = vld [vmem:[#allocation2 + $0x172] sm:$0xff] }
 0x398   : > { %3606 = vmatprep.mubr.f32.mxu0 %v3435_v3  ;;  %5302 = vmatprep.mubr.f32.mxu1 %v8302_v21 }
 0x399   : > { %v2598_v38 = vpop.f32.mrb[130].mxu0  ;;  %v5129_v23 = vpop.f32.mrb[162].mxu1 }
 0x39a   : > { %v8305_v15 = vadd.f32 %v5126_v49, %v2598_v38  ;;  %v2600_v61 = vpop.f32.mrb[131].mxu0  ;;  %v2828_v7 = vpop.f32.mrb[163].mxu1 }
 0x39b   : > { %3607 = vmatmul.mubr.f32.gmra.mrb[236].mxu0 %v3433_v5  ;;  %5303 = vmatmul.mubr.f32.gmra.mrb[12].mxu1 %v8307_v14  ;;  %v8370_v5 = vld [vmem:[#allocation2 + $0x15a] sm:$0xff]  ;;  %v8398_v61 = vld [vmem:[#allocation2 + $0x18a] sm:$0xff] }
 0x39c   : > { %3611 = vmatprep.mubr.f32.mxu0 %v8279_v20  ;;  %5305 = vmatprep.mubr.f32.mxu1 %v8310_v13 }
 0x39d   : > { %v2603_v22 = vpop.f32.mrb[132].mxu0  ;;  %v5132_v47 = vpop.f32.mrb[164].mxu1 }
 0x39e   : > { %v8314_v53 = vadd.f32 %v2828_v7, %v2603_v22  ;;  %v2605_v46 = vpop.f32.mrb[133].mxu0  ;;  %v2838_v48 = vpop.f32.mrb[165].mxu1 }
 0x39f   : > { %3612 = vmatmul.mubr.f32.gmra.mrb[238].mxu0 %v3434_v27  ;;  %5306 = vmatmul.mubr.f32.gmra.mrb[14].mxu1 %v8316_v17 }
 0x3a0   : > { %3616 = vmatprep.mubr.f32.mxu0 %v8282_v28  ;;  %5308 = vmatprep.mubr.f32.mxu1 %v8319_v2 }
 0x3a1   : > { %v2608_v35 = vpop.f32.mrb[134].mxu0  ;;  %v5135_v32 = vpop.f32.mrb[166].mxu1 }
 0x3a2   : > { %v8323_v41 = vadd.f32 %v5129_v23, %v2608_v35  ;;  %v2610_v63 = vpop.f32.mrb[135].mxu0  ;;  %v2848_v37 = vpop.f32.mrb[167].mxu1  ;;  %v3462_v35 = vld [vmem:[#allocation2 + $0x1a2] sm:$0xff] }
 0x3a3   : > { %3617 = vmatmul.mubr.f32.gmra.mrb[240].mxu0 %v3435_v3  ;;  %5309 = vmatmul.mubr.f32.gmra.mrb[16].mxu1 %v8325_v9 }
 0x3a4   : > { %3621 = vmatprep.mubr.f32.mxu0 %v8285_v59  ;;  %5311 = vmatprep.mubr.f32.mxu1 %v8328_v16 }
 0x3a5   : > { %v2613_v29 = vpop.f32.mrb[136].mxu0  ;;  %v5138_v45 = vpop.f32.mrb[168].mxu1 }
 0x3a6   : > { %v8332_v43 = vadd.f32 %v2838_v48, %v2613_v29  ;;  %v2615_v57 = vpop.f32.mrb[137].mxu0  ;;  %v2858_v30 = vpop.f32.mrb[169].mxu1 }
 0x3a7   : > { %3622 = vmatmul.mubr.f32.gmra.mrb[242].mxu0 %v8279_v20  ;;  %5312 = vmatmul.mubr.f32.gmra.mrb[18].mxu1 %v8334_v34 }
 0x3a8   : > { %3626 = vmatprep.mubr.f32.mxu0 %v8288_v58  ;;  %5314 = vmatprep.mubr.f32.mxu1 %v8338_v8 }
 0x3a9   : > { %v2618_v54 = vpop.f32.mrb[138].mxu0  ;;  %v8342_v56 = vpop.f32.mrb[170].mxu1 }
 0x3aa   : > { %v8344_v36 = vadd.f32 %v5132_v47, %v2618_v54  ;;  %v2620_v10 = vpop.f32.mrb[139].mxu0  ;;  %v2868_v33 = vpop.f32.mrb[171].mxu1 }
 0x3ab   : > { %3627 = vmatmul.mubr.f32.gmra.mrb[244].mxu0 %v8282_v28  ;;  %5315 = vmatmul.mubr.f32.gmra.mrb[20].mxu1 %v8346_v52 }
 0x3ac   : > { %3631 = vmatprep.mubr.f32.mxu0 %v8291_v11  ;;  %5317 = vmatprep.mubr.f32.mxu1 %v8350_v12 }
 0x3ad   : > { %v2623_v1 = vpop.f32.mrb[140].mxu0  ;;  %v8354_v44 = vpop.f32.mrb[172].mxu1 }
 0x3ae   : > { %v8356_v26 = vadd.f32 %v2848_v37, %v2623_v1  ;;  %v2625_v55 = vpop.f32.mrb[141].mxu0  ;;  %v2878_v60 = vpop.f32.mrb[173].mxu1 }
 0x3af   : > { %3632 = vmatmul.mubr.f32.gmra.mrb[246].mxu0 %v8285_v59  ;;  %5318 = vmatmul.mubr.f32.gmra.mrb[22].mxu1 %v8358_v0 }
 0x3b0   : > { %3636 = vmatprep.mubr.f32.mxu0 %v8294_v62  ;;  %5320 = vmatprep.mubr.f32.mxu1 %v8362_v40 }
 0x3b1   : > { %v2628_v51 = vpop.f32.mrb[142].mxu0  ;;  %v8366_v25 = vpop.f32.mrb[174].mxu1 }
 0x3b2   : > { %v8368_v4 = vadd.f32 %v5135_v32, %v2628_v51  ;;  %v2630_v19 = vpop.f32.mrb[143].mxu0  ;;  %v2888_v24 = vpop.f32.mrb[175].mxu1 }
 0x3b3   : > { %3637 = vmatmul.mubr.f32.gmra.mrb[248].mxu0 %v8288_v58  ;;  %5321 = vmatmul.mubr.f32.gmra.mrb[24].mxu1 %v8370_v5  ;;  %v8388_v58 = vld [vmem:[#allocation2 + $0x182] sm:$0xff] }
 0x3b4   : > { %3641 = vmatprep.mubr.f32.mxu0 %v8297_v18  ;;  %5323 = vmatprep.mubr.f32.mxu1 %v8374_v42 }
 0x3b5   : > { %v2633_v27 = vpop.f32.mrb[144].mxu0  ;;  %v8378_v3 = vpop.f32.mrb[176].mxu1 }
 0x3b6   : > { %v8380_v20 = vadd.f32 %v2858_v30, %v2633_v27  ;;  %v2635_v28 = vpop.f32.mrb[145].mxu0  ;;  %v8382_v59 = vpop.f32.mrb[177].mxu1 }
 0x3b7   : > { %3642 = vmatmul.mubr.f32.gmra.mrb[250].mxu0 %v8291_v11  ;;  %5324 = vmatmul.mubr.f32.gmra.mrb[26].mxu1 %v8384_v6  ;;  %v3461_v11 = vld [vmem:[#allocation2 + $0x19a] sm:$0xff] }
 0x3b8   : > { %3646 = vmatprep.mubr.f32.mxu0 %v8302_v21  ;;  %5326 = vmatprep.mubr.f32.mxu1 %v8388_v58 }
 0x3b9   : > { %v2638_v49 = vpop.f32.mrb[146].mxu0  ;;  %v8392_v39 = vpop.f32.mrb[178].mxu1 }
 0x3ba   : > { %v8394_v50 = vadd.f32 %v5138_v45, %v2638_v49  ;;  %v2640_v38 = vpop.f32.mrb[147].mxu0  ;;  %v8396_v23 = vpop.f32.mrb[179].mxu1 }
 0x3bb   : > { %3647 = vmatmul.mubr.f32.gmra.mrb[252].mxu0 %v8294_v62  ;;  %5327 = vmatmul.mubr.f32.gmra.mrb[28].mxu1 %v8398_v61 }
 0x3bc   : > { %3651 = vmatprep.mubr.f32.mxu0 %v8307_v14  ;;  %5329 = vmatprep.mubr.f32.mxu1 %v3461_v11 }
 0x3bd   : > { %v2643_v7 = vpop.f32.mrb[148].mxu0  ;;  %v8403_v22 = vpop.f32.mrb[180].mxu1 }
 0x3be   : > { %v8405_v47 = vadd.f32 %v2868_v33, %v2643_v7  ;;  %v2645_v46 = vpop.f32.mrb[149].mxu0  ;;  %v8407_v48 = vpop.f32.mrb[181].mxu1 }
 0x3bf   : > { %3652 = vmatmul.mubr.f32.gmra.mrb[254].mxu0 %v8297_v18  ;;  %5330 = vmatmul.mubr.f32.gmra.mrb[30].mxu1 %v3462_v35 }
 0x3c0   : > { %3656 = vmatprep.mubr.f32.mxu0 %v8310_v13 }
 0x3c1   : > { %v2648_v62 = vpop.f32.mrb[150].mxu0  ;;  %v8411_v32 = vpop.f32.mrb[182].mxu1 }
 0x3c2   : > { %v8414_v63 = vadd.f32 %v8342_v56, %v2648_v62  ;;  %v2650_v37 = vpop.f32.mrb[151].mxu0  ;;  %v8416_v29 = vpop.f32.mrb[183].mxu1 }
 0x3c3   : > { %3657 = vmatmul.mubr.f32.gmra.mrb[0].mxu0 %v8302_v21 }
 0x3c4   : > { %3661 = vmatprep.mubr.f32.mxu0 %v8316_v17 }
 0x3c5   : > { %v2653_v45 = vpop.f32.mrb[152].mxu0  ;;  %v8420_v57 = vpop.f32.mrb[184].mxu1 }
 0x3c6   : > { %v8422_v18 = vadd.f32 %v2878_v60, %v2653_v45  ;;  %v2655_v30 = vpop.f32.mrb[153].mxu0  ;;  %v8424_v54 = vpop.f32.mrb[185].mxu1 }
 0x3c7   : > { %3662 = vmatmul.mubr.f32.gmra.mrb[2].mxu0 %v8307_v14 }
 0x3c8   : > { %3666 = vmatprep.mubr.f32.mxu0 %v8319_v2 }
 0x3c9   : > { %v2658_v56 = vpop.f32.mrb[154].mxu0  ;;  %v8428_v10 = vpop.f32.mrb[186].mxu1 }
 0x3ca   : > { %v8431_v33 = vadd.f32 %v8354_v44, %v2658_v56  ;;  %v2660_v21 = vpop.f32.mrb[155].mxu0  ;;  %v8433_v1 = vpop.f32.mrb[187].mxu1 }
 0x3cb   : > { %3667 = vmatmul.mubr.f32.gmra.mrb[4].mxu0 %v8310_v13 }
 0x3cc   : > { %3671 = vmatprep.mubr.f32.mxu0 %v8325_v9 }
 0x3cd   : > { %v2663_v55 = vpop.f32.mrb[156].mxu0  ;;  %v8437_v60 = vpop.f32.mrb[188].mxu1 }
 0x3ce   : > { %v8439_v51 = vadd.f32 %v2888_v24, %v2663_v55  ;;  %v2665_v14 = vpop.f32.mrb[157].mxu0  ;;  %v8441_v19 = vpop.f32.mrb[189].mxu1 }
 0x3cf   : > { %3672 = vmatmul.mubr.f32.gmra.mrb[6].mxu0 %v8316_v17 }
 0x3d0   : > { %3676 = vmatprep.mubr.f32.mxu0 %v8328_v16 }
 0x3d1   : > { %v2668_v44 = vpop.f32.mrb[158].mxu0  ;;  %v8445_v27 = vpop.f32.mrb[190].mxu1 }
 0x3d2   : > { %v8448_v28 = vadd.f32 %v8366_v25, %v2668_v44  ;;  %v2670_v13 = vpop.f32.mrb[159].mxu0  ;;  %v8450_v49 = vpop.f32.mrb[191].mxu1 }
 0x3d3   : > { %3677 = vmatmul.mubr.f32.gmra.mrb[8].mxu0 %v8319_v2 }
 0x3d4   : > { %3681 = vmatprep.mubr.f32.mxu0 %v8334_v34 }
 0x3d5   : > { %v2673_v24 = vpop.f32.mrb[160].mxu0 }
 0x3d6   : > { %v8455_v38 = vadd.f32 %v8382_v59, %v2673_v24  ;;  %v3043_v17 = vpop.f32.mrb[192].mxu1  ;;  %v2675_v11 = vpop.f32.mrb[161].mxu0 }
 0x3d7   : > { %v8458_v7 = vadd.f32 %v3043_v17, %v8299_v31  ;;  %v3045_v46 = vpop.f32.mrb[193].mxu1  ;;  %3682 = vmatmul.mubr.f32.gmra.mrb[10].mxu0 %v8325_v9 }
 0x3d8   : > { %3686 = vmatprep.mubr.f32.mxu0 %v8338_v8 }
 0x3d9   : > { %v2678_v25 = vpop.f32.mrb[162].mxu0 }
 0x3da   : > { %v8463_v35 = vadd.f32 %v8378_v3, %v2678_v25  ;;  %v3048_v2 = vpop.f32.mrb[194].mxu1  ;;  %v2680_v62 = vpop.f32.mrb[163].mxu0 }
 0x3db   : > { %v8466_v37 = vadd.f32 %v3048_v2, %v8305_v15  ;;  %v3050_v59 = vpop.f32.mrb[195].mxu1  ;;  %3687 = vmatmul.mubr.f32.gmra.mrb[12].mxu0 %v8328_v16 }
 0x3dc   : > { %3691 = vmatprep.mubr.f32.mxu0 %v8346_v52 }
 0x3dd   : > { %v2683_v31 = vpop.f32.mrb[164].mxu0 }
 0x3de   : > { %v8471_v45 = vadd.f32 %v8396_v23, %v2683_v31  ;;  %v3053_v9 = vpop.f32.mrb[196].mxu1  ;;  %v2685_v30 = vpop.f32.mrb[165].mxu0 }
 0x3df   : > { %v8474_v56 = vadd.f32 %v3053_v9, %v8314_v53  ;;  %v3055_v3 = vpop.f32.mrb[197].mxu1  ;;  %3692 = vmatmul.mubr.f32.gmra.mrb[14].mxu0 %v8334_v34 }
 0x3e0   : > { %3696 = vmatprep.mubr.f32.mxu0 %v8350_v12 }
 0x3e1   : > { %v2688_v15 = vpop.f32.mrb[166].mxu0 }
 0x3e2   : > { %v8479_v21 = vadd.f32 %v8392_v39, %v2688_v15  ;;  %v3058_v16 = vpop.f32.mrb[198].mxu1  ;;  %v2690_v55 = vpop.f32.mrb[167].mxu0 }
 0x3e3   : > { %v8482_v14 = vadd.f32 %v3058_v16, %v8323_v41  ;;  %v3060_v23 = vpop.f32.mrb[199].mxu1  ;;  %3697 = vmatmul.mubr.f32.gmra.mrb[16].mxu0 %v8338_v8 }
 0x3e4   : > { %3701 = vmatprep.mubr.f32.mxu0 %v8358_v0 }
 0x3e5   : > { %v2693_v53 = vpop.f32.mrb[168].mxu0 }
 0x3e6   : > { %v8487_v44 = vadd.f32 %v8407_v48, %v2693_v53  ;;  %v3063_v34 = vpop.f32.mrb[200].mxu1  ;;  %v2695_v13 = vpop.f32.mrb[169].mxu0 }
 0x3e7   : > { %v8490_v24 = vadd.f32 %v3063_v34, %v8332_v43  ;;  %v3065_v39 = vpop.f32.mrb[201].mxu1  ;;  %3702 = vmatmul.mubr.f32.gmra.mrb[18].mxu0 %v8346_v52 }
 0x3e8   : > { %3706 = vmatprep.mubr.f32.mxu0 %v8362_v40 }
 0x3e9   : > { %v2698_v41 = vpop.f32.mrb[170].mxu0 }
 0x3ea   : > { %v8495_v17 = vadd.f32 %v8403_v22, %v2698_v41  ;;  %v3068_v8 = vpop.f32.mrb[202].mxu1  ;;  %v2700_v11 = vpop.f32.mrb[171].mxu0 }
 0x3eb   : > { %v8498_v46 = vadd.f32 %v3068_v8, %v8344_v36  ;;  %v3070_v48 = vpop.f32.mrb[203].mxu1  ;;  %3707 = vmatmul.mubr.f32.gmra.mrb[20].mxu0 %v8350_v12 }
 0x3ec   : > { %3711 = vmatprep.mubr.f32.mxu0 %v8370_v5 }
 0x3ed   : > { %v2703_v43 = vpop.f32.mrb[172].mxu0 }
 0x3ee   : > { %v8503_v25 = vadd.f32 %v8416_v29, %v2703_v43  ;;  %v3073_v52 = vpop.f32.mrb[204].mxu1  ;;  %v2705_v2 = vpop.f32.mrb[173].mxu0 }
 0x3ef   : > { %v8506_v62 = vadd.f32 %v3073_v52, %v8356_v26  ;;  %v3075_v22 = vpop.f32.mrb[205].mxu1  ;;  %3712 = vmatmul.mubr.f32.gmra.mrb[22].mxu0 %v8358_v0 }
 0x3f0   : > { %3716 = vmatprep.mubr.f32.mxu0 %v8374_v42 }
 0x3f1   : > { %v2708_v36 = vpop.f32.mrb[174].mxu0 }
 0x3f2   : > { %v8511_v59 = vadd.f32 %v8411_v32, %v2708_v36  ;;  %v3078_v12 = vpop.f32.mrb[206].mxu1  ;;  %v2710_v31 = vpop.f32.mrb[175].mxu0 }
 0x3f3   : > { %v8514_v9 = vadd.f32 %v3078_v12, %v8368_v4  ;;  %v3080_v29 = vpop.f32.mrb[207].mxu1  ;;  %3717 = vmatmul.mubr.f32.gmra.mrb[24].mxu0 %v8362_v40 }
 0x3f4   : > { %3721 = vmatprep.mubr.f32.mxu0 %v8384_v6 }
 0x3f5   : > { %v2713_v26 = vpop.f32.mrb[176].mxu0 }
 0x3f6   : > { %v8519_v30 = vadd.f32 %v8424_v54, %v2713_v26  ;;  %v3083_v0 = vpop.f32.mrb[208].mxu1  ;;  %v2715_v3 = vpop.f32.mrb[177].mxu0 }
 0x3f7   : > { %v8522_v15 = vadd.f32 %v3083_v0, %v8380_v20  ;;  %v3085_v32 = vpop.f32.mrb[209].mxu1  ;;  %3722 = vmatmul.mubr.f32.gmra.mrb[26].mxu0 %v8370_v5 }
 0x3f8   : > { %3726 = vmatprep.mubr.f32.mxu0 %v8388_v58 }
 0x3f9   : > { %v2718_v4 = vpop.f32.mrb[178].mxu0 }
 0x3fa   : > { %v8527_v16 = vadd.f32 %v8420_v57, %v2718_v4  ;;  %v3088_v40 = vpop.f32.mrb[210].mxu1  ;;  %v2720_v55 = vpop.f32.mrb[179].mxu0 }
 0x3fb   : > { %v8530_v23 = vadd.f32 %v3088_v40, %v8394_v50  ;;  %v3090_v54 = vpop.f32.mrb[211].mxu1  ;;  %3727 = vmatmul.mubr.f32.gmra.mrb[28].mxu0 %v8374_v42 }
 0x3fc   : > { %3731 = vmatprep.mubr.f32.mxu0 %v8398_v61 }
 0x3fd   : > { %v2723_v20 = vpop.f32.mrb[180].mxu0 }
 0x3fe   : > { %v8535_v53 = vadd.f32 %v8433_v1, %v2723_v20  ;;  %v3093_v5 = vpop.f32.mrb[212].mxu1  ;;  %v2725_v58 = vpop.f32.mrb[181].mxu0 }
 0x3ff   : > { %v8538_v34 = vadd.f32 %v3093_v5, %v8405_v47  ;;  %v3095_v57 = vpop.f32.mrb[213].mxu1  ;;  %3732 = vmatmul.mubr.f32.gmra.mrb[30].mxu0 %v8384_v6 }
 0x401   : > { %v2728_v13 = vpop.f32.mrb[182].mxu0 }
 0x402   : > { %v8542_v50 = vadd.f32 %v8428_v10, %v2728_v13  ;;  %v3098_v39 = vpop.f32.mrb[214].mxu1  ;;  %v2730_v42 = vpop.f32.mrb[183].mxu0 }
 0x403   : > { %v8545_v61 = vadd.f32 %v3098_v39, %v8414_v63  ;;  %v3100_v41 = vpop.f32.mrb[215].mxu1 }
 0x405   : > { %v2733_v1 = vpop.f32.mrb[184].mxu0 }
 0x406   : > { %v8548_v8 = vadd.f32 %v8441_v19, %v2733_v1  ;;  %v3103_v11 = vpop.f32.mrb[216].mxu1  ;;  %v2735_v47 = vpop.f32.mrb[185].mxu0 }
 0x407   : > { %v8551_v48 = vadd.f32 %v3103_v11, %v8422_v18  ;;  %v3105_v6 = vpop.f32.mrb[217].mxu1 }
 0x409   : > { %v2738_v43 = vpop.f32.mrb[186].mxu0 }
 0x40a   : > { %v8554_v10 = vadd.f32 %v8437_v60, %v2738_v43  ;;  %v3108_v52 = vpop.f32.mrb[218].mxu1  ;;  %v2740_v2 = vpop.f32.mrb[187].mxu0 }
 0x40b   : > { %v3109_v63 = vadd.f32 %v3108_v52, %v8431_v33  ;;  %v3110_v22 = vpop.f32.mrb[219].mxu1 }
 0x40d   : > { %v2743_v36 = vpop.f32.mrb[188].mxu0 }
 0x40e   : > { %v8558_v12 = vadd.f32 %v8450_v49, %v2743_v36  ;;  %v3113_v19 = vpop.f32.mrb[220].mxu1  ;;  %v2745_v31 = vpop.f32.mrb[189].mxu0 }
 0x40f   : > { %v8561_v29 = vadd.f32 %v3113_v19, %v8439_v51  ;;  %v3115_v18 = vpop.f32.mrb[221].mxu1 }
 0x411   : > { %v2748_v26 = vpop.f32.mrb[190].mxu0 }
 0x412   : > { %v8564_v0 = vadd.f32 %v8445_v27, %v2748_v26  ;;  %v3118_v60 = vpop.f32.mrb[222].mxu1  ;;  %v2750_v3 = vpop.f32.mrb[191].mxu0 }
 0x413   : > { %v3119_v32 = vadd.f32 %v3118_v60, %v8448_v28  ;;  %v3120_v33 = vpop.f32.mrb[223].mxu1 }
 0x415   : > { %v5206_v4 = vpop.f32.mrb[192].mxu0 }
 0x416   : > { %v3123_v40 = vpop.f32.mrb[224].mxu1  ;;  %v8568_v49 = vadd.f32 %v5206_v4, %v8466_v37  ;;  %v3268_v55 = vpop.f32.mrb[193].mxu0 }
 0x417   : > { %v3124_v54 = vadd.f32 %v3123_v40, %v8455_v38  ;;  %v3125_v51 = vpop.f32.mrb[225].mxu1  ;;  %v8572_v20 = vadd.f32 %v3268_v55, %v8458_v7 }
 0x419   : > { %v5209_v5 = vpop.f32.mrb[194].mxu0 }
 0x41a   : > { %v3128_v27 = vpop.f32.mrb[226].mxu1  ;;  %v8575_v58 = vadd.f32 %v5209_v5, %v8482_v14  ;;  %v3278_v57 = vpop.f32.mrb[195].mxu0 }
 0x41b   : > { %v3129_v28 = vadd.f32 %v3128_v27, %v8463_v35  ;;  %v3130_v13 = vpop.f32.mrb[227].mxu1  ;;  %v8579_v39 = vadd.f32 %v3278_v57, %v8474_v56 }
 0x41d   : > { %v5212_v37 = vpop.f32.mrb[196].mxu0 }
 0x41e   : > { %v3133_v42 = vpop.f32.mrb[228].mxu1  ;;  %v8582_v38 = vadd.f32 %v5212_v37, %v8498_v46  ;;  %v3288_v41 = vpop.f32.mrb[197].mxu0 }
 0x41f   : > { %v3134_v7 = vadd.f32 %v3133_v42, %v8471_v45  ;;  %v3135_v1 = vpop.f32.mrb[229].mxu1  ;;  %v8586_v11 = vadd.f32 %v3288_v41, %v8490_v24 }
 0x421   : > { %v5215_v14 = vpop.f32.mrb[198].mxu0 }
 0x422   : > { %v3138_v47 = vpop.f32.mrb[230].mxu1  ;;  %v8589_v35 = vadd.f32 %v5215_v14, %v8514_v9  ;;  %v3298_v6 = vpop.f32.mrb[199].mxu0 }
 0x423   : > { %v3139_v56 = vadd.f32 %v3138_v47, %v8479_v21  ;;  %v3140_v43 = vpop.f32.mrb[231].mxu1  ;;  %v8593_v52 = vadd.f32 %v3298_v6, %v8506_v62 }
 0x425   : > { %v5218_v46 = vpop.f32.mrb[200].mxu0 }
 0x426   : > { %v3143_v2 = vpop.f32.mrb[232].mxu1  ;;  %v8596_v45 = vadd.f32 %v5218_v46, %v8530_v23  ;;  %v3308_v22 = vpop.f32.mrb[201].mxu0 }
 0x427   : > { %v3144_v24 = vadd.f32 %v3143_v2, %v8487_v44  ;;  %v3145_v36 = vpop.f32.mrb[233].mxu1  ;;  %v8600_v19 = vadd.f32 %v3308_v22, %v8522_v15 }
 0x429   : > { %v5221_v9 = vpop.f32.mrb[202].mxu0 }
 0x42a   : > { %v3148_v31 = vpop.f32.mrb[234].mxu1  ;;  %v8603_v21 = vadd.f32 %v5221_v9, %v8545_v61  ;;  %v3318_v18 = vpop.f32.mrb[203].mxu0 }
 0x42b   : > { %v3149_v62 = vadd.f32 %v3148_v31, %v8495_v17  ;;  %v3150_v26 = vpop.f32.mrb[235].mxu1  ;;  %v8607_v60 = vadd.f32 %v3318_v18, %v8538_v34 }
 0x42d   : > { %v5224_v23 = vpop.f32.mrb[204].mxu0 }
 0x42e   : > { %v3153_v3 = vpop.f32.mrb[236].mxu1  ;;  %v8609_v33 = vadd.f32 %v5224_v23, %v3109_v63  ;;  %v3328_v44 = vpop.f32.mrb[205].mxu0 }
 0x42f   : > { %v3154_v15 = vadd.f32 %v3153_v3, %v8503_v25  ;;  %v3155_v4 = vpop.f32.mrb[237].mxu1  ;;  %v8613_v40 = vadd.f32 %v3328_v44, %v8551_v48 }
 0x431   : > { %v5227_v61 = vpop.f32.mrb[206].mxu0 }
 0x432   : > { %v3158_v55 = vpop.f32.mrb[238].mxu1  ;;  %v8615_v51 = vadd.f32 %v5227_v61, %v3119_v32  ;;  %v3338_v17 = vpop.f32.mrb[207].mxu0 }
 0x433   : > { %v3159_v5 = vadd.f32 %v3158_v55, %v8511_v59  ;;  %v3160_v34 = vpop.f32.mrb[239].mxu1  ;;  %v8619_v27 = vadd.f32 %v3338_v17, %v8561_v29 }
 0x435   : > { %v5230_v63 = vpop.f32.mrb[208].mxu0 }
 0x436   : > { %v3163_v57 = vpop.f32.mrb[240].mxu1  ;;  %v8621_v13 = vadd.f32 %v5230_v63, %v3129_v28  ;;  %v3348_v25 = vpop.f32.mrb[209].mxu0 }
 0x437   : > { %v3164_v37 = vadd.f32 %v3163_v57, %v8519_v30  ;;  %v3165_v48 = vpop.f32.mrb[241].mxu1  ;;  %v8624_v42 = vadd.f32 %v3348_v25, %v3124_v54 }
 0x439   : > { %v5233_v41 = vpop.f32.mrb[210].mxu0 }
 0x43a   : > { %v3168_v32 = vpop.f32.mrb[242].mxu1  ;;  %v8626_v1 = vadd.f32 %v5233_v41, %v3139_v56  ;;  %v3358_v14 = vpop.f32.mrb[211].mxu0 }
 0x43b   : > { %v3169_v59 = vadd.f32 %v3168_v32, %v8527_v16  ;;  %v3170_v47 = vpop.f32.mrb[243].mxu1  ;;  %v8629_v29 = vadd.f32 %v3358_v14, %v3134_v7 }
 0x43d   : > { %v5236_v6 = vpop.f32.mrb[212].mxu0 }
 0x43e   : > { %v3173_v43 = vpop.f32.mrb[244].mxu1  ;;  %v8631_v28 = vadd.f32 %v5236_v6, %v3149_v62  ;;  %v3368_v46 = vpop.f32.mrb[213].mxu0 }
 0x43f   : > { %v3174_v30 = vadd.f32 %v3173_v43, %v8535_v53  ;;  %v3175_v2 = vpop.f32.mrb[245].mxu1  ;;  %v8634_v54 = vadd.f32 %v3368_v46, %v3144_v24 }
 0x441   : > { %v5239_v22 = vpop.f32.mrb[214].mxu0 }
 0x442   : > { %v3178_v36 = vpop.f32.mrb[246].mxu1  ;;  %v8636_v56 = vadd.f32 %v5239_v22, %v3159_v5  ;;  %v3378_v9 = vpop.f32.mrb[215].mxu0 }
 0x443   : > { %v3179_v16 = vadd.f32 %v3178_v36, %v8542_v50  ;;  %v3180_v31 = vpop.f32.mrb[247].mxu1  ;;  %v8639_v7 = vadd.f32 %v3378_v9, %v3154_v15 }
 0x445   : > { %v5242_v18 = vpop.f32.mrb[216].mxu0 }
 0x446   : > { %v3183_v26 = vpop.f32.mrb[248].mxu1  ;;  %v8641_v62 = vadd.f32 %v5242_v18, %v3169_v59  ;;  %v3388_v23 = vpop.f32.mrb[217].mxu0 }
 0x447   : > { %v3184_v53 = vadd.f32 %v3183_v26, %v8548_v8  ;;  %v3185_v3 = vpop.f32.mrb[249].mxu1  ;;  %v8644_v24 = vadd.f32 %v3388_v23, %v3164_v37 }
 0x449   : > { %v5245_v44 = vpop.f32.mrb[218].mxu0 }
 0x44a   : > { %v3188_v4 = vpop.f32.mrb[250].mxu1  ;;  %v8646_v61 = vadd.f32 %v5245_v44, %v3179_v16  ;;  %v3398_v55 = vpop.f32.mrb[219].mxu0 }
 0x44b   : > { %v3189_v50 = vadd.f32 %v3188_v4, %v8554_v10  ;;  %v3190_v17 = vpop.f32.mrb[251].mxu1  ;;  %v8649_v15 = vadd.f32 %v3398_v55, %v3174_v30 }
 0x44d   : > { %v5248_v5 = vpop.f32.mrb[220].mxu0 }
 0x44e   : > { %v3193_v34 = vpop.f32.mrb[252].mxu1  ;;  %v8651_v63 = vadd.f32 %v5248_v5, %v3189_v50  ;;  %v3408_v57 = vpop.f32.mrb[221].mxu0 }
 0x44f   : > { %v3194_v8 = vadd.f32 %v3193_v34, %v8558_v12  ;;  %v3195_v25 = vpop.f32.mrb[253].mxu1  ;;  %v8654_v37 = vadd.f32 %v3408_v57, %v3184_v53 }
 0x451   : > { %v5251_v48 = vpop.f32.mrb[222].mxu0 }
 0x452   : > { %v3198_v41 = vpop.f32.mrb[254].mxu1  ;;  %v3418_v32 = vpop.f32.mrb[223].mxu0 }
 0x453   : > { %v3199_v14 = vadd.f32 %v3198_v41, %v8564_v0  ;;  %v3200_v59 = vpop.f32.mrb[255].mxu1  ;;  %v8657_v10 = vadd.f32 %v3418_v32, %v3194_v8 }
 0x455   : > { %v8659_v47 = vadd.f32 %v5251_v48, %v3199_v14 }
 0x456   : > { %v3578_v6 = vpop.f32.mrb[224].mxu0  ;;  %v5286_v43 = vpop.f32.mrb[0].mxu1 }
 0x457   : > { %v3580_v46 = vpop.f32.mrb[225].mxu0  ;;  %v3803_v30 = vpop.f32.mrb[1].mxu1 }
 0x458   : > { %v3804_v2 = vadd.f32 %v3803_v30, %v3578_v6 }
 0x45a   : > { %v8662_v12 = vadd.f32 %v3804_v2, %v8572_v20  ;;  %v3583_v22 = vpop.f32.mrb[226].mxu0  ;;  %v5289_v36 = vpop.f32.mrb[2].mxu1 }
 0x45b   : > { %v3809_v9 = vadd.f32 %v5286_v43, %v3583_v22  ;;  %v3585_v16 = vpop.f32.mrb[227].mxu0  ;;  %v3813_v31 = vpop.f32.mrb[3].mxu1 }
 0x45d   : > { %v8665_v0 = vadd.f32 %v3809_v9, %v8568_v49 }
 0x45e   : > { %v3588_v18 = vpop.f32.mrb[228].mxu0  ;;  %v5292_v26 = vpop.f32.mrb[4].mxu1 }
 0x45f   : > { %v3814_v23 = vadd.f32 %v3813_v31, %v3588_v18  ;;  %v3590_v53 = vpop.f32.mrb[229].mxu0  ;;  %v3823_v3 = vpop.f32.mrb[5].mxu1 }
 0x461   : > { %v8668_v44 = vadd.f32 %v3814_v23, %v8579_v39 }
 0x462   : > { %v3593_v4 = vpop.f32.mrb[230].mxu0  ;;  %v5295_v55 = vpop.f32.mrb[6].mxu1 }
 0x463   : > { %v3819_v20 = vadd.f32 %v5289_v36, %v3593_v4  ;;  %v3595_v50 = vpop.f32.mrb[231].mxu0  ;;  %v3833_v17 = vpop.f32.mrb[7].mxu1 }
 0x465   : > { %v3965_v5 = vadd.f32 %v3819_v20, %v8575_v58 }
 0x466   : > { %v3598_v34 = vpop.f32.mrb[232].mxu0  ;;  %v5298_v57 = vpop.f32.mrb[8].mxu1 }
 0x467   : > { %v3824_v8 = vadd.f32 %v3823_v3, %v3598_v34  ;;  %v3600_v49 = vpop.f32.mrb[233].mxu0  ;;  %v3843_v25 = vpop.f32.mrb[9].mxu1 }
 0x469   : > { %v3966_v48 = vadd.f32 %v3824_v8, %v8586_v11 }
 0x46a   : > { %v3603_v41 = vpop.f32.mrb[234].mxu0  ;;  %v5301_v32 = vpop.f32.mrb[10].mxu1 }
 0x46b   : > { %v3829_v14 = vadd.f32 %v5292_v26, %v3603_v41  ;;  %v3605_v59 = vpop.f32.mrb[235].mxu0  ;;  %v3853_v39 = vpop.f32.mrb[11].mxu1 }
 0x46d   : > { %v3967_v6 = vadd.f32 %v3829_v14, %v8582_v38 }
 0x46e   : > { %v3608_v43 = vpop.f32.mrb[236].mxu0  ;;  %v5304_v46 = vpop.f32.mrb[12].mxu1 }
 0x46f   : > { %v3834_v30 = vadd.f32 %v3833_v17, %v3608_v43  ;;  %v3610_v2 = vpop.f32.mrb[237].mxu0  ;;  %v3863_v22 = vpop.f32.mrb[13].mxu1 }
 0x471   : > { %v3968_v58 = vadd.f32 %v3834_v30, %v8593_v52 }
 0x472   : > { %v3613_v36 = vpop.f32.mrb[238].mxu0  ;;  %v8674_v9 = vpop.f32.mrb[14].mxu1 }
 0x473   : > { %v3839_v16 = vadd.f32 %v5295_v55, %v3613_v36  ;;  %v3615_v31 = vpop.f32.mrb[239].mxu0  ;;  %v3873_v11 = vpop.f32.mrb[15].mxu1 }
 0x475   : > { %v3969_v18 = vadd.f32 %v3839_v16, %v8589_v35 }
 0x476   : > { %v3618_v26 = vpop.f32.mrb[240].mxu0  ;;  %v8677_v23 = vpop.f32.mrb[16].mxu1 }
 0x477   : > { %v3844_v53 = vadd.f32 %v3843_v25, %v3618_v26  ;;  %v3620_v38 = vpop.f32.mrb[241].mxu0  ;;  %v8679_v3 = vpop.f32.mrb[17].mxu1 }
 0x479   : > { %v3970_v4 = vadd.f32 %v3844_v53, %v8600_v19 }
 0x47a   : > { %v3623_v20 = vpop.f32.mrb[242].mxu0  ;;  %v8682_v50 = vpop.f32.mrb[18].mxu1 }
 0x47b   : > { %v3849_v52 = vadd.f32 %v5298_v57, %v3623_v20  ;;  %v3625_v17 = vpop.f32.mrb[243].mxu0  ;;  %v8684_v34 = vpop.f32.mrb[19].mxu1 }
 0x47d   : > { %v3971_v55 = vadd.f32 %v3849_v52, %v8596_v45  ;;  %v8700_v45 = vld [vmem:[%s9214_s4] ss:$0 sm:$0xff] }
 0x47e   : > { %v3628_v8 = vpop.f32.mrb[244].mxu0  ;;  %v8687_v35 = vpop.f32.mrb[20].mxu1  ;;  %v8712_v26 = vadd.f32 %v8700_v45, %v8662_v12 }
 0x47f   : > { %v3854_v49 = vadd.f32 %v3853_v39, %v3628_v8  ;;  %v3630_v41 = vpop.f32.mrb[245].mxu0  ;;  %v8689_v25 = vpop.f32.mrb[21].mxu1 }
 0x481   : > { %v3972_v14 = vadd.f32 %v3854_v49, %v8607_v60  ;;  %v8706_v60 = vadd.f32 %v8700_v45, %v8665_v0 }
 0x482   : > { %v3633_v59 = vpop.f32.mrb[246].mxu0  ;;  %v8692_v19 = vpop.f32.mrb[22].mxu1 }
 0x483   : > { %v3859_v43 = vadd.f32 %v5301_v32, %v3633_v59  ;;  %v3635_v30 = vpop.f32.mrb[247].mxu0  ;;  %v8694_v57 = vpop.f32.mrb[23].mxu1  ;;  %v4032_v0 = vadd.f32 %v8706_v60, %v8712_v26 }
 0x485   : > { %v3973_v2 = vadd.f32 %v3859_v43, %v8603_v21  ;;  %v8716_v21 = vadd.f32 %v8700_v45, %v8668_v44  ;;  %v8730_v44 = vadd.f32 %v8700_v45, %v3966_v48  ;;  %v8737_v43 = vadd.f32 %v8700_v45, %v3967_v6 }
 0x486   : > { %v3638_v39 = vpop.f32.mrb[248].mxu0  ;;  %v8702_v36 = vpop.f32.mrb[24].mxu1 }
 0x487   : > { %v3864_v16 = vadd.f32 %v3863_v22, %v3638_v39  ;;  %v3640_v31 = vpop.f32.mrb[249].mxu0  ;;  %v8708_v32 = vpop.f32.mrb[25].mxu1  ;;  %v8724_v22 = vadd.f32 %v8700_v45, %v3965_v5  ;;  %v4033_v12 = vadd.f32 %v4032_v0, %v8716_v21  ;;  %v8750_v0 = vadd.f32 %v8700_v45, %v3969_v18 }
 0x489   : > { %v3974_v53 = vadd.f32 %v3864_v16, %v8613_v40  ;;  %v4034_v59 = vadd.f32 %v4033_v12, %v8724_v22  ;;  %v8743_v16 = vadd.f32 %v8700_v45, %v3968_v58  ;;  %v8757_v58 = vadd.f32 %v8700_v45, %v3970_v4 }
 0x48a   : > { %v3643_v38 = vpop.f32.mrb[250].mxu0  ;;  %v8719_v20 = vpop.f32.mrb[26].mxu1 }
 0x48b   : > { %v3869_v52 = vadd.f32 %v5304_v46, %v3643_v38  ;;  %v3645_v17 = vpop.f32.mrb[251].mxu0  ;;  %v8726_v8 = vpop.f32.mrb[27].mxu1  ;;  %v4035_v39 = vadd.f32 %v4034_v59, %v8730_v44  ;;  %v8762_v59 = vadd.f32 %v8700_v45, %v3971_v55 }
 0x48d   : > { %v3975_v40 = vadd.f32 %v3869_v52, %v8609_v33  ;;  %v4036_v38 = vadd.f32 %v4035_v39, %v8737_v43 }
 0x48e   : > { %v3648_v49 = vpop.f32.mrb[252].mxu0  ;;  %v8733_v41 = vpop.f32.mrb[28].mxu1 }
 0x48f   : > { %v3874_v5 = vadd.f32 %v3873_v11, %v3648_v49  ;;  %v3650_v46 = vpop.f32.mrb[253].mxu0  ;;  %v8739_v30 = vpop.f32.mrb[29].mxu1  ;;  %v4037_v17 = vadd.f32 %v4036_v38, %v8743_v16 }
 0x490   : > { %v8767_v46 = vadd.f32 %v8700_v45, %v3972_v14 }
 0x491   : > { %v3976_v48 = vadd.f32 %v3874_v5, %v8619_v27  ;;  %v4038_v49 = vadd.f32 %v4037_v17, %v8750_v0 }
 0x492   : > { %v3653_v33 = vpop.f32.mrb[254].mxu0  ;;  %v8746_v31 = vpop.f32.mrb[30].mxu1 }
 0x493   : > { %v3879_v6 = vadd.f32 %v8674_v9, %v3653_v33  ;;  %v3655_v11 = vpop.f32.mrb[255].mxu0  ;;  %v8753_v52 = vpop.f32.mrb[31].mxu1  ;;  %v4039_v9 = vadd.f32 %v4038_v49, %v8757_v58 }
 0x495   : > { %v3977_v27 = vadd.f32 %v3879_v6, %v8615_v51  ;;  %v4040_v33 = vadd.f32 %v4039_v9, %v8762_v59  ;;  %v8772_v51 = vadd.f32 %v8700_v45, %v3973_v2 }
 0x496   : > { %v3658_v12 = vpop.f32.mrb[0].mxu0 }
 0x497   : > { %v3884_v18 = vadd.f32 %v8679_v3, %v3658_v12  ;;  %v3660_v5 = vpop.f32.mrb[1].mxu0  ;;  %v4041_v6 = vadd.f32 %v4040_v33, %v8767_v46  ;;  %v8777_v3 = vadd.f32 %v8700_v45, %v3974_v53 }
 0x499   : > { %v3978_v39 = vadd.f32 %v3884_v18, %v8624_v42  ;;  %v4042_v17 = vadd.f32 %v4041_v6, %v8772_v51  ;;  %v8782_v42 = vadd.f32 %v8700_v45, %v3975_v40 }
 0x49a   : > { %v3663_v4 = vpop.f32.mrb[2].mxu0 }
 0x49b   : > { %v3889_v38 = vadd.f32 %v8677_v23, %v3663_v4  ;;  %v3665_v55 = vpop.f32.mrb[3].mxu0  ;;  %v4043_v49 = vadd.f32 %v4042_v17, %v8777_v3  ;;  %v8787_v23 = vadd.f32 %v8700_v45, %v3976_v48 }
 0x49d   : > { %v3979_v11 = vadd.f32 %v3889_v38, %v8621_v13  ;;  %v4044_v5 = vadd.f32 %v4043_v49, %v8782_v42  ;;  %v8792_v13 = vadd.f32 %v8700_v45, %v3977_v27 }
 0x49e   : > { %v3668_v14 = vpop.f32.mrb[4].mxu0 }
 0x49f   : > { %v3894_v12 = vadd.f32 %v8684_v34, %v3668_v14  ;;  %v3670_v2 = vpop.f32.mrb[5].mxu0  ;;  %v4045_v4 = vadd.f32 %v4044_v5, %v8787_v23  ;;  %v8797_v34 = vadd.f32 %v8700_v45, %v3978_v39 }
 0x4a1   : > { %v3980_v18 = vadd.f32 %v3894_v12, %v8629_v29  ;;  %v4046_v38 = vadd.f32 %v4045_v4, %v8792_v13  ;;  %v8802_v29 = vadd.f32 %v8700_v45, %v3979_v11 }
 0x4a2   : > { %v3673_v53 = vpop.f32.mrb[6].mxu0 }
 0x4a3   : > { %v3899_v9 = vadd.f32 %v8682_v50, %v3673_v53  ;;  %v3675_v40 = vpop.f32.mrb[7].mxu0  ;;  %v4047_v6 = vadd.f32 %v4046_v38, %v8797_v34  ;;  %v8807_v50 = vadd.f32 %v8700_v45, %v3980_v18 }
 0x4a5   : > { %v3981_v33 = vadd.f32 %v3899_v9, %v8626_v1  ;;  %v4048_v17 = vadd.f32 %v4047_v6, %v8802_v29 }
 0x4a6   : > { %v3678_v48 = vpop.f32.mrb[8].mxu0 }
 0x4a7   : > { %v3904_v55 = vadd.f32 %v8689_v25, %v3678_v48  ;;  %v3680_v27 = vpop.f32.mrb[9].mxu0  ;;  %v8812_v1 = vadd.f32 %v8700_v45, %v3981_v33  ;;  %v4049_v2 = vadd.f32 %v4048_v17, %v8807_v50 }
 0x4a9   : > { %v3982_v14 = vadd.f32 %v3904_v55, %v8634_v54  ;;  %v4050_v53 = vadd.f32 %v4049_v2, %v8812_v1 }
 0x4aa   : > { %v3683_v39 = vpop.f32.mrb[10].mxu0 }
 0x4ab   : > { %v3909_v12 = vadd.f32 %v8687_v35, %v3683_v39  ;;  %v3685_v11 = vpop.f32.mrb[11].mxu0  ;;  %v8817_v25 = vadd.f32 %v8700_v45, %v3982_v14 }
 0x4ad   : > { %v3983_v49 = vadd.f32 %v3909_v12, %v8631_v28  ;;  %v4051_v40 = vadd.f32 %v4050_v53, %v8817_v25 }
 0x4ae   : > { %v3688_v18 = vpop.f32.mrb[12].mxu0 }
 0x4af   : > { %v8822_v54 = vadd.f32 %v8700_v45, %v3983_v49  ;;  %v3914_v5 = vadd.f32 %v8694_v57, %v3688_v18  ;;  %v3690_v9 = vpop.f32.mrb[13].mxu0 }
 0x4b1   : > { %v3984_v35 = vadd.f32 %v3914_v5, %v8639_v7  ;;  %v4052_v33 = vadd.f32 %v4051_v40, %v8822_v54 }
 0x4b2   : > { %v3693_v4 = vpop.f32.mrb[14].mxu0 }
 0x4b3   : > { %v8829_v48 = vadd.f32 %v8700_v45, %v3984_v35  ;;  %v3919_v28 = vadd.f32 %v8692_v19, %v3693_v4  ;;  %v3695_v38 = vpop.f32.mrb[15].mxu0 }
 0x4b5   : > { %v4053_v55 = vadd.f32 %v4052_v33, %v8829_v48  ;;  %v3985_v27 = vadd.f32 %v3919_v28, %v8636_v56 }
 0x4b6   : > { %v3698_v6 = vpop.f32.mrb[16].mxu0 }
 0x4b7   : > { %v4023_v57 = vadd.f32 %v8700_v45, %v3985_v27  ;;  %v3924_v14 = vadd.f32 %v8708_v32, %v3698_v6  ;;  %v3700_v39 = vpop.f32.mrb[17].mxu0 }
 0x4b9   : > { %v4054_v7 = vadd.f32 %v4053_v55, %v4023_v57  ;;  %v3986_v17 = vadd.f32 %v3924_v14, %v8644_v24 }
 0x4ba   : > { %v3703_v12 = vpop.f32.mrb[18].mxu0 }
 0x4bb   : > { %v4024_v11 = vadd.f32 %v8700_v45, %v3986_v17  ;;  %v3929_v2 = vadd.f32 %v8702_v36, %v3703_v12  ;;  %v3705_v19 = vpop.f32.mrb[19].mxu0 }
 0x4bd   : > { %v4055_v49 = vadd.f32 %v4054_v7, %v4024_v11  ;;  %v3987_v18 = vadd.f32 %v3929_v2, %v8641_v62 }
 0x4be   : > { %v3708_v53 = vpop.f32.mrb[20].mxu0 }
 0x4bf   : > { %v4025_v56 = vadd.f32 %v8700_v45, %v3987_v18  ;;  %v3934_v5 = vadd.f32 %v8726_v8, %v3708_v53  ;;  %v3710_v9 = vpop.f32.mrb[21].mxu0 }
 0x4c1   : > { %v4056_v32 = vadd.f32 %v4055_v49, %v4025_v56  ;;  %v3988_v40 = vadd.f32 %v3934_v5, %v8649_v15 }
 0x4c2   : > { %v3713_v35 = vpop.f32.mrb[22].mxu0 }
 0x4c3   : > { %v4026_v24 = vadd.f32 %v8700_v45, %v3988_v40  ;;  %v3939_v4 = vadd.f32 %v8719_v20, %v3713_v35  ;;  %v3715_v33 = vpop.f32.mrb[23].mxu0 }
 0x4c5   : > { %v4057_v36 = vadd.f32 %v4056_v32, %v4026_v24  ;;  %v3989_v28 = vadd.f32 %v3939_v4, %v8646_v61 }
 0x4c6   : > { %v3718_v38 = vpop.f32.mrb[24].mxu0 }
 0x4c7   : > { %v4027_v62 = vadd.f32 %v8700_v45, %v3989_v28  ;;  %v3944_v55 = vadd.f32 %v8739_v30, %v3718_v38  ;;  %v3720_v27 = vpop.f32.mrb[25].mxu0 }
 0x4c9   : > { %v4058_v8 = vadd.f32 %v4057_v36, %v4027_v62  ;;  %v3990_v6 = vadd.f32 %v3944_v55, %v8654_v37 }
 0x4ca   : > { %v3723_v14 = vpop.f32.mrb[26].mxu0 }
 0x4cb   : > { %v4028_v15 = vadd.f32 %v8700_v45, %v3990_v6  ;;  %v3949_v39 = vadd.f32 %v8733_v41, %v3723_v14  ;;  %v3725_v7 = vpop.f32.mrb[27].mxu0 }
 0x4cd   : > { %v4059_v20 = vadd.f32 %v4058_v8, %v4028_v15  ;;  %v3991_v17 = vadd.f32 %v3949_v39, %v8651_v63 }
 0x4ce   : > { %v3728_v12 = vpop.f32.mrb[28].mxu0 }
 0x4cf   : > { %v4029_v61 = vadd.f32 %v8700_v45, %v3991_v17  ;;  %v3954_v2 = vadd.f32 %v8753_v52, %v3728_v12  ;;  %v3730_v19 = vpop.f32.mrb[29].mxu0 }
 0x4d1   : > { %v4060_v30 = vadd.f32 %v4059_v20, %v4029_v61  ;;  %v3992_v49 = vadd.f32 %v3954_v2, %v8657_v10 }
 0x4d2   : > { %v3733_v18 = vpop.f32.mrb[30].mxu0 }
 0x4d3   : > { %v4030_v37 = vadd.f32 %v8700_v45, %v3992_v49  ;;  %v3959_v53 = vadd.f32 %v8746_v31, %v3733_v18  ;;  %v3735_v5 = vpop.f32.mrb[31].mxu0 }
 0x4d5   : > { %v4061_v41 = vadd.f32 %v4060_v30, %v4030_v37  ;;  %v3993_v9 = vadd.f32 %v3959_v53, %v8659_v47 }
 0x4d7   : > { %v4031_v63 = vadd.f32 %v8700_v45, %v3993_v9 }
 0x4d9   : > { %v4062_v32 = vadd.f32 %v4061_v41, %v4031_v63 }
 0x4db   : > { %v4063_v40 = vrot.slane %v4062_v32, 4 }
 0x4dd   : > { %v4064_v35 = vadd.f32 %v4063_v40, %v4062_v32 }
 0x4df   : > { %v4065_v4 = vrot.slane %v4064_v35, 2 }
 0x4e1   : > { %v4066_v52 = vadd.f32 %v4065_v4, %v4064_v35 }
 0x4e3   : > { %v4067_v33 = vrot.slane %v4066_v52, 1 }
 0x4e5   : > { %v4068_v36 = vadd.f32 %v4067_v33, %v4066_v52 }
 0x4e7   : > { %v8859_v28 = vmul.f32 0.00390625, %v4068_v36 }
 0x4e9   : > { %v8863_v10 = vsub.f32 %v8822_v54, %v8859_v28  ;;  %v8867_v31 = vsub.f32 %v8829_v48, %v8859_v28  ;;  %v8870_v47 = vsub.f32 %v4023_v57, %v8859_v28  ;;  %v8873_v45 = vsub.f32 %v4024_v11, %v8859_v28 }
 0x4ea   : > { %v8876_v38 = vsub.f32 %v4025_v56, %v8859_v28  ;;  %v8879_v55 = vsub.f32 %v4026_v24, %v8859_v28  ;;  %v8882_v27 = vsub.f32 %v4027_v62, %v8859_v28  ;;  %v8885_v54 = vsub.f32 %v4028_v15, %v8859_v28 }
 0x4eb   : > { %v8888_v48 = vsub.f32 %v4029_v61, %v8859_v28  ;;  %v8891_v57 = vsub.f32 %v4030_v37, %v8859_v28  ;;  %v8894_v11 = vsub.f32 %v4031_v63, %v8859_v28  ;;  %v8898_v56 = vsub.f32 %v8712_v26, %v8859_v28 }
 0x4ec   : > { %v8902_v24 = vsub.f32 %v8706_v60, %v8859_v28  ;;  %v8906_v62 = vsub.f32 %v8716_v21, %v8859_v28  ;;  %v8914_v14 = vsub.f32 %v8724_v22, %v8859_v28  ;;  %v8918_v26 = vsub.f32 %v8730_v44, %v8859_v28 }
 0x4ed   : > { %v4102_v8 = vmul.f32 %v8898_v56, %v8898_v56  ;;  %v8924_v21 = vsub.f32 %v8737_v43, %v8859_v28  ;;  %v8930_v22 = vsub.f32 %v8743_v16, %v8859_v28  ;;  %v8936_v17 = vsub.f32 %v8750_v0, %v8859_v28 }
 0x4ee   : > { %v4103_v6 = vmul.f32 %v8902_v24, %v8902_v24  ;;  %v4104_v60 = vmul.f32 %v8906_v62, %v8906_v62  ;;  %v4105_v39 = vmul.f32 %v8914_v14, %v8914_v14  ;;  %v4106_v44 = vmul.f32 %v8918_v26, %v8918_v26 }
 0x4ef   : > { %v4107_v43 = vmul.f32 %v8924_v21, %v8924_v21  ;;  %v8942_v61 = vsub.f32 %v8757_v58, %v8859_v28  ;;  %v4108_v16 = vmul.f32 %v8930_v22, %v8930_v22  ;;  %v8948_v19 = vsub.f32 %v8762_v59, %v8859_v28 }
 0x4f0   : > { %v4134_v15 = vadd.f32 %v4103_v6, %v4102_v8  ;;  %v4109_v0 = vmul.f32 %v8936_v17, %v8936_v17  ;;  %v8954_v49 = vsub.f32 %v8767_v46, %v8859_v28  ;;  %v8960_v37 = vsub.f32 %v8772_v51, %v8859_v28 }
 0x4f1   : > { %v4110_v58 = vmul.f32 %v8942_v61, %v8942_v61  ;;  %v4111_v59 = vmul.f32 %v8948_v19, %v8948_v19  ;;  %v8966_v5 = vsub.f32 %v8777_v3, %v8859_v28  ;;  %v8972_v9 = vsub.f32 %v8782_v42, %v8859_v28 }
 0x4f2   : > { %v4135_v7 = vadd.f32 %v4134_v15, %v4104_v60  ;;  %v4112_v46 = vmul.f32 %v8954_v49, %v8954_v49  ;;  %v4113_v51 = vmul.f32 %v8960_v37, %v8960_v37  ;;  %v8978_v32 = vsub.f32 %v8787_v23, %v8859_v28 }
 0x4f3   : > { %v4114_v3 = vmul.f32 %v8966_v5, %v8966_v5  ;;  %v8984_v35 = vsub.f32 %v8792_v13, %v8859_v28  ;;  %v4115_v42 = vmul.f32 %v8972_v9, %v8972_v9  ;;  %v8990_v52 = vsub.f32 %v8797_v34, %v8859_v28 }
 0x4f4   : > { %v4136_v20 = vadd.f32 %v4135_v7, %v4105_v39  ;;  %v4116_v23 = vmul.f32 %v8978_v32, %v8978_v32  ;;  %v8996_v36 = vsub.f32 %v8802_v29, %v8859_v28  ;;  %v9002_v6 = vsub.f32 %v8807_v50, %v8859_v28 }
 0x4f5   : > { %v4117_v13 = vmul.f32 %v8984_v35, %v8984_v35  ;;  %v4118_v34 = vmul.f32 %v8990_v52, %v8990_v52  ;;  %v9008_v15 = vsub.f32 %v8812_v1, %v8859_v28  ;;  %v9014_v7 = vsub.f32 %v8817_v25, %v8859_v28 }
 0x4f6   : > { %v4137_v12 = vadd.f32 %v4136_v20, %v4106_v44  ;;  %v4119_v29 = vmul.f32 %v8996_v36, %v8996_v36  ;;  %v4120_v50 = vmul.f32 %v9002_v6, %v9002_v6  ;;  %v4124_v25 = vmul.f32 %v8867_v31, %v8867_v31 }
 0x4f7   : > { %v4121_v20 = vmul.f32 %v9008_v15, %v9008_v15  ;;  %v4122_v1 = vmul.f32 %v9014_v7, %v9014_v7 }
 0x4f8   : > { %v4138_v2 = vadd.f32 %v4137_v12, %v4107_v43 }
 0x4fa   : > { %v4139_v30 = vadd.f32 %v4138_v2, %v4108_v16  ;;  %v4123_v16 = vmul.f32 %v8863_v10, %v8863_v10 }
 0x4fc   : > { %v4140_v18 = vadd.f32 %v4139_v30, %v4109_v0  ;;  %v4125_v0 = vmul.f32 %v8870_v47, %v8870_v47 }
 0x4fe   : > { %v4141_v53 = vadd.f32 %v4140_v18, %v4110_v58  ;;  %v4126_v58 = vmul.f32 %v8873_v45, %v8873_v45 }
 0x500   : > { %v4142_v41 = vadd.f32 %v4141_v53, %v4111_v59  ;;  %v4127_v59 = vmul.f32 %v8876_v38, %v8876_v38 }
 0x502   : > { %v4143_v63 = vadd.f32 %v4142_v41, %v4112_v46  ;;  %v4128_v46 = vmul.f32 %v8879_v55, %v8879_v55 }
 0x504   : > { %v4144_v40 = vadd.f32 %v4143_v63, %v4113_v51  ;;  %v4129_v51 = vmul.f32 %v8882_v27, %v8882_v27 }
 0x506   : > { %v4145_v4 = vadd.f32 %v4144_v40, %v4114_v3  ;;  %v4130_v3 = vmul.f32 %v8885_v54, %v8885_v54 }
 0x508   : > { %v4146_v33 = vadd.f32 %v4145_v4, %v4115_v42  ;;  %v4131_v42 = vmul.f32 %v8888_v48, %v8888_v48 }
 0x50a   : > { %v4147_v8 = vadd.f32 %v4146_v33, %v4116_v23  ;;  %v4132_v23 = vmul.f32 %v8891_v57, %v8891_v57 }
 0x50c   : > { %v4148_v60 = vadd.f32 %v4147_v8, %v4117_v13  ;;  %v4133_v13 = vmul.f32 %v8894_v11, %v8894_v11 }
 0x50e   : > { %v4149_v39 = vadd.f32 %v4148_v60, %v4118_v34 }
 0x510   : > { %v4150_v44 = vadd.f32 %v4149_v39, %v4119_v29 }
 0x512   : > { %v4151_v43 = vadd.f32 %v4150_v44, %v4120_v50 }
 0x514   : > { %v4152_v12 = vadd.f32 %v4151_v43, %v4121_v20 }
 0x516   : > { %v4153_v2 = vadd.f32 %v4152_v12, %v4122_v1 }
 0x518   : > { %v4154_v28 = vadd.f32 %v4153_v2, %v4123_v16 }
 0x51a   : > { %v4155_v30 = vadd.f32 %v4154_v28, %v4124_v25 }
 0x51c   : > { %v4156_v18 = vadd.f32 %v4155_v30, %v4125_v0 }
 0x51e   : > { %v4157_v53 = vadd.f32 %v4156_v18, %v4126_v58 }
 0x520   : > { %v4158_v41 = vadd.f32 %v4157_v53, %v4127_v59  ;;  %v4211_v53 = vld [vmem:[%s5924_s28 + $0x28] sm:$0xff] }
 0x522   : > { %v4159_v63 = vadd.f32 %v4158_v41, %v4128_v46  ;;  %v4212_v46 = vld [vmem:[%s5924_s28 + $0x30] sm:$0xff]  ;;  %v4213_v41 = vld [vmem:[%s5924_s28 + $0x38] sm:$0xff] }
 0x524   : > { %v4160_v40 = vadd.f32 %v4159_v63, %v4129_v51  ;;  %v4214_v51 = vld [vmem:[%s5924_s28 + $0x40] sm:$0xff]  ;;  %v4215_v63 = vld [vmem:[%s5924_s28 + $0x48] sm:$0xff] }
 0x526   : > { %v4161_v4 = vadd.f32 %v4160_v40, %v4130_v3  ;;  %v4216_v3 = vld [vmem:[%s5924_s28 + $0x50] sm:$0xff] }
 0x528   : > { %v4162_v33 = vadd.f32 %v4161_v4, %v4131_v42  ;;  %v4218_v42 = vld [vmem:[%s5924_s28 + $0x60] sm:$0xff]  ;;  %v4219_v4 = vld [vmem:[%s5924_s28 + $0x68] sm:$0xff] }
 0x52a   : > { %v4163_v8 = vadd.f32 %v4162_v33, %v4132_v23  ;;  %v4220_v23 = vld [vmem:[%s5924_s28 + $0x70] sm:$0xff]  ;;  %v4221_v33 = vld [vmem:[%s5924_s28 + $0x78] sm:$0xff] }
 0x52c   : > { %v4164_v34 = vadd.f32 %v4163_v8, %v4133_v13  ;;  %v4222_v13 = vld [vmem:[%s5924_s28 + $0x80] sm:$0xff]  ;;  %v4223_v8 = vld [vmem:[%s5924_s28 + $0x88] sm:$0xff] }
 0x52e   : > { %v4165_v60 = vrot.slane %v4164_v34, 4 }
 0x530   : > { %v4166_v29 = vadd.f32 %v4165_v60, %v4164_v34  ;;  %v4224_v34 = vld [vmem:[%s5924_s28 + $0x90] sm:$0xff] }
 0x532   : > { %v4167_v39 = vrot.slane %v4166_v29, 2 }
 0x534   : > { %v4168_v50 = vadd.f32 %v4167_v39, %v4166_v29 }
 0x536   : > { %v4169_v44 = vrot.slane %v4168_v50, 1 }
 0x538   : > { %v4170_v20 = vadd.f32 %v4169_v44, %v4168_v50  ;;  %v4227_v50 = vld [vmem:[%s5924_s28 + $0xa8] sm:$0xff] }
 0x53a   : > { %v4171_v43 = vmul.f32 0.00390625, %v4170_v20 }
 0x53c   : > { %v4172_v1 = vadd.f32 1e-05, %v4171_v43 }
 0x53e   : > { %5823 = vrsqrt.f32 %v4172_v1 }
 0x548   : > { %v5824_v12 = vpop.eup %5823 }
 0x549   : > { %v4174_v16 = vmul.f32 %v5824_v12, %v8898_v56  ;;  %v4175_v2 = vmul.f32 %v5824_v12, %v8902_v24  ;;  %v4176_v25 = vmul.f32 %v5824_v12, %v8906_v62  ;;  %v4177_v28 = vmul.f32 %v5824_v12, %v8914_v14 }
 0x54a   : > { %v4178_v0 = vmul.f32 %v5824_v12, %v8918_v26  ;;  %v4179_v30 = vmul.f32 %v5824_v12, %v8924_v21  ;;  %v4180_v58 = vmul.f32 %v5824_v12, %v8930_v22  ;;  %v4181_v18 = vmul.f32 %v5824_v12, %v8936_v17 }
 0x54b   : > { %v4182_v56 = vmul.f32 %v5824_v12, %v8942_v61  ;;  %v4183_v24 = vmul.f32 %v5824_v12, %v8948_v19  ;;  %v4184_v62 = vmul.f32 %v5824_v12, %v8954_v49  ;;  %v4185_v14 = vmul.f32 %v5824_v12, %v8960_v37  ;;  %v4206_v61 = vld [vmem:[%s5924_s28] sm:$0xff]  ;;  %v4207_v19 = vld [vmem:[%s5924_s28 + $0x8] sm:$0xff]  ;;  %v4208_v49 = vld [vmem:[%s5924_s28 + $0x10] sm:$0xff] }
 0x54c   : > { %v9057_v26 = vmul.f32 %v5824_v12, %v8966_v5  ;;  %v9060_v21 = vmul.f32 %v5824_v12, %v8972_v9  ;;  %v9063_v22 = vmul.f32 %v5824_v12, %v8978_v32  ;;  %v9066_v17 = vmul.f32 %v5824_v12, %v8984_v35  ;;  %v4209_v37 = vld [vmem:[%s5924_s28 + $0x18] sm:$0xff]  ;;  %v4210_v35 = vld [vmem:[%s5924_s28 + $0x20] sm:$0xff] }
 0x54d   : > { %v9073_v59 = vmul.f32 %v5824_v12, %v8990_v52  ;;  %v9076_v5 = vmul.f32 %v5824_v12, %v8996_v36  ;;  %v9079_v9 = vmul.f32 %v5824_v12, %v9002_v6  ;;  %v9082_v32 = vmul.f32 %v5824_v12, %v9008_v15 }
 0x54e   : > { %v9089_v52 = vmul.f32 %v5824_v12, %v9014_v7  ;;  %v9092_v36 = vmul.f32 %v5824_v12, %v8863_v10  ;;  %v9095_v6 = vmul.f32 %v5824_v12, %v8867_v31  ;;  %v9098_v15 = vmul.f32 %v5824_v12, %v8870_v47  ;;  %v4217_v7 = vld [vmem:[%s5924_s28 + $0x58] sm:$0xff] }
 0x54f   : > { %v9104_v40 = vmul.f32 %v5824_v12, %v8873_v45  ;;  %v9107_v10 = vmul.f32 %v5824_v12, %v8876_v38  ;;  %v9110_v31 = vmul.f32 %v5824_v12, %v8879_v55  ;;  %v9113_v47 = vmul.f32 %v5824_v12, %v8882_v27 }
 0x550   : > { %v9126_v45 = vmul.f32 %v5824_v12, %v8885_v54  ;;  %v9129_v38 = vmul.f32 %v5824_v12, %v8888_v48  ;;  %v9132_v55 = vmul.f32 %v5824_v12, %v8891_v57  ;;  %v9135_v27 = vmul.f32 %v5824_v12, %v8894_v11  ;;  %v4225_v54 = vld [vmem:[%s5924_s28 + $0x98] sm:$0xff]  ;;  %v4226_v57 = vld [vmem:[%s5924_s28 + $0xa0] sm:$0xff]  ;;  %v4228_v11 = vld [vmem:[%s5924_s28 + $0xb0] sm:$0xff] }
 0x551   : > { %v4238_v60 = vadd.f32 %v4206_v61, %v4174_v16  ;;  %v4239_v29 = vadd.f32 %v4207_v19, %v4175_v2  ;;  %v4240_v39 = vadd.f32 %v4208_v49, %v4176_v25  ;;  %v4241_v48 = vadd.f32 %v4209_v37, %v4177_v28  ;;  %v4229_v12 = vld [vmem:[%s5924_s28 + $0xb8] sm:$0xff]  ;;  %v4231_v16 = vld [vmem:[%s5924_s28 + $0xc8] sm:$0xff]  ;;  %v4236_v19 = vld [vmem:[%s5924_s28 + $0xf0] sm:$0xff] }
 0x552   : > { %9216 = vst [vmem:[#allocation3_spill] sm:$0xff] %v9135_v27  ;;  %v4242_v44 = vadd.f32 %v4210_v35, %v4178_v0  ;;  %v4243_v20 = vadd.f32 %v4211_v53, %v4179_v30  ;;  %v4244_v43 = vadd.f32 %v4212_v46, %v4180_v58  ;;  %v4245_v1 = vadd.f32 %v4213_v41, %v4181_v18  ;;  %v4230_v27 = vld [vmem:[%s5924_s28 + $0xc0] sm:$0xff]  ;;  %v4232_v0 = vld [vmem:[%s5924_s28 + $0xd0] sm:$0xff]  ;;  %v4233_v30 = vld [vmem:[%s5924_s28 + $0xd8] sm:$0xff] }
 0x553   : > { %v4246_v2 = vadd.f32 %v4214_v51, %v4182_v56  ;;  %v4247_v25 = vadd.f32 %v4215_v63, %v4183_v24  ;;  %v4248_v28 = vadd.f32 %v4216_v3, %v4184_v62  ;;  %v4249_v61 = vadd.f32 %v4217_v7, %v4185_v14  ;;  %4270 = vst [vmem:[%s9123_s12] sm:$0xff] %v4238_v60  ;;  %v4234_v58 = vld [vmem:[%s5924_s28 + $0xe0] sm:$0xff]  ;;  %v4235_v14 = vld [vmem:[%s5924_s28 + $0xe8] sm:$0xff]  ;;  %v4237_v49 = vld [vmem:[%s5924_s28 + $0xf8] sm:$0xff] }
 0x554   : > { %4271 = vst [vmem:[%s9123_s12 + $0x8] sm:$0xff] %v4239_v29  ;;  %4272 = vst [vmem:[%s9123_s12 + $0x10] sm:$0xff] %v4240_v39  ;;  %v4250_v18 = vadd.f32 %v4218_v42, %v9057_v26  ;;  %v4251_v56 = vadd.f32 %v4219_v4, %v9060_v21  ;;  %v4252_v24 = vadd.f32 %v4220_v23, %v9063_v22 }
 0x555   : > { %4273 = vst [vmem:[%s9123_s12 + $0x18] sm:$0xff] %v4241_v48  ;;  %v4253_v62 = vadd.f32 %v4221_v33, %v9066_v17  ;;  %4274 = vst [vmem:[%s9123_s12 + $0x20] sm:$0xff] %v4242_v44  ;;  %v4254_v26 = vadd.f32 %v4222_v13, %v9073_v59  ;;  %v4255_v21 = vadd.f32 %v4223_v8, %v9076_v5 }
 0x556   : > { %4275 = vst [vmem:[%s9123_s12 + $0x28] sm:$0xff] %v4243_v20  ;;  %4276 = vst [vmem:[%s9123_s12 + $0x30] sm:$0xff] %v4244_v43  ;;  %v4256_v22 = vadd.f32 %v4224_v34, %v9079_v9  ;;  %v4257_v37 = vadd.f32 %v4225_v54, %v9082_v32  ;;  %v4258_v17 = vadd.f32 %v4226_v57, %v9089_v52 }
 0x557   : > { %4277 = vst [vmem:[%s9123_s12 + $0x38] sm:$0xff] %v4245_v1  ;;  %4278 = vst [vmem:[%s9123_s12 + $0x40] sm:$0xff] %v4246_v2  ;;  %v4259_v35 = vadd.f32 %v4227_v50, %v9092_v36  ;;  %v4260_v59 = vadd.f32 %v4228_v11, %v9095_v6  ;;  %v4261_v5 = vadd.f32 %v4229_v12, %v9098_v15 }
 0x558   : > { %4279 = vst [vmem:[%s9123_s12 + $0x48] sm:$0xff] %v4247_v25  ;;  %4280 = vst [vmem:[%s9123_s12 + $0x50] sm:$0xff] %v4248_v28  ;;  %v4262_v9 = vadd.f32 %v4230_v27, %v9104_v40  ;;  %v4263_v32 = vadd.f32 %v4231_v16, %v9107_v10  ;;  %v4264_v53 = vadd.f32 %v4232_v0, %v9110_v31 }
 0x559   : > { %4281 = vst [vmem:[%s9123_s12 + $0x58] sm:$0xff] %v4249_v61  ;;  %4282 = vst [vmem:[%s9123_s12 + $0x60] sm:$0xff] %v4250_v18  ;;  %v4265_v46 = vadd.f32 %v4233_v30, %v9113_v47  ;;  %v4266_v41 = vadd.f32 %v4234_v58, %v9126_v45  ;;  %v4267_v52 = vadd.f32 %v4235_v14, %v9129_v38  ;;  %v9217_v6 = vld [vmem:[#allocation3_spill] sm:$0xff] }
 0x55a   : > { %4283 = vst [vmem:[%s9123_s12 + $0x68] sm:$0xff] %v4251_v56  ;;  %4284 = vst [vmem:[%s9123_s12 + $0x70] sm:$0xff] %v4252_v24  ;;  %v4268_v36 = vadd.f32 %v4236_v19, %v9132_v55  ;;  %v4269_v15 = vadd.f32 %v4237_v49, %v9217_v6 }
 0x55b   : > { %4285 = vst [vmem:[%s9123_s12 + $0x78] sm:$0xff] %v4253_v62  ;;  %4286 = vst [vmem:[%s9123_s12 + $0x80] sm:$0xff] %v4254_v26 }
 0x55c   : > { %4287 = vst [vmem:[%s9123_s12 + $0x88] sm:$0xff] %v4255_v21  ;;  %4288 = vst [vmem:[%s9123_s12 + $0x90] sm:$0xff] %v4256_v22 }
 0x55d   : > { %4289 = vst [vmem:[%s9123_s12 + $0x98] sm:$0xff] %v4257_v37  ;;  %4290 = vst [vmem:[%s9123_s12 + $0xa0] sm:$0xff] %v4258_v17 }
 0x55e   : > { %4291 = vst [vmem:[%s9123_s12 + $0xa8] sm:$0xff] %v4259_v35  ;;  %4292 = vst [vmem:[%s9123_s12 + $0xb0] sm:$0xff] %v4260_v59 }
 0x55f   : > { %4293 = vst [vmem:[%s9123_s12 + $0xb8] sm:$0xff] %v4261_v5  ;;  %4294 = vst [vmem:[%s9123_s12 + $0xc0] sm:$0xff] %v4262_v9 }
 0x560   : > { %4295 = vst [vmem:[%s9123_s12 + $0xc8] sm:$0xff] %v4263_v32  ;;  %4296 = vst [vmem:[%s9123_s12 + $0xd0] sm:$0xff] %v4264_v53 }
 0x561   : > { %4297 = vst [vmem:[%s9123_s12 + $0xd8] sm:$0xff] %v4265_v46  ;;  %4298 = vst [vmem:[%s9123_s12 + $0xe0] sm:$0xff] %v4266_v41 }
 0x562   : > { %4299 = vst [vmem:[%s9123_s12 + $0xe8] sm:$0xff] %v4267_v52  ;;  %4300 = vst [vmem:[%s9123_s12 + $0xf0] sm:$0xff] %v4268_v36 }
 0x563   : > { %4301 = vst [vmem:[%s9123_s12 + $0xf8] sm:$0xff] %v4269_v15 }
 0x564 PF: > { %s15_s18 = sadd.s32 1, %s5831_s18  }
 0x565   : > { %p12_p4 = scmp.ge.s32.totalorder %s15_s18, 4  }
 0x567   :  { %14 = sbr.rel (!%p12_p4) target bundleno = 1 (0x1), region = 76 }

</bundles_post_ra>
